<compile_context>
chip_gen: v7x
topology: tpu7x:2x2x1
jax: 0.10.0
libtpu: 0.0.40
codegen_flags: <defaults>
</compile_context>

<pallas_src>
import functools

import jax
import jax.numpy as jnp
from jax.experimental import pallas as pl
from jax.experimental.pallas import tpu as pltpu

SELU_ALPHA = 1.6732632423543772
SELU_SCALE = 1.0507009873554805


# ---------------------------------------------------------------------------
# Fused kernel: CapsuleResidualBlock + degree routing + squash
# ---------------------------------------------------------------------------
def _capsule_layer_kernel(x_ref, w12_ref, w1b_ref, g12_ref, be12_ref,
                          g1b_ref, be1b_ref, g3_ref, be3_ref, o_ref,
                          *, n_batch, n_in, n_out, d_out, eps):
    cout = n_out * d_out
    l_tot = x_ref.shape[-1]          # n_in * n_batch * sp   (lane axis)
    l_ns = o_ref.shape[-1]           # n_batch * sp
    inv_l = 1.0 / float(l_tot)

    def selu(y):
        return SELU_SCALE * jnp.where(
            y > 0, y, SELU_ALPHA * (jnp.exp(jnp.minimum(y, 0.0)) - 1.0))

    def bn_selu(h, gamma, beta):
        # training-mode BatchNorm3d: per-row (channel) stats over the whole lane axis
        # (= batch * in_caps * spatial), centered two-pass variance for stability.
        mean = jnp.sum(h, axis=-1, keepdims=True) * inv_l
        c = h - mean
        var = jnp.sum(c * c, axis=-1, keepdims=True) * inv_l
        return selu(c * (gamma * jax.lax.rsqrt(var + eps)) + beta)

    xt = x_ref[...]                                          # (cin, l_tot)

    # ---- stage 1: both first-stage convs fused into one dot ------------------------
    # rows [0:cout)      = road2 conv output channels
    # rows [cout:2*cout) = road1 conv1 output channels
    h12 = bn_selu(jnp.dot(w12_ref[...], xt, preferred_element_type=jnp.float32),
                  g12_ref[...], be12_ref[...])               # (2*cout, l_tot)

    h2 = h12[:cout]                                          # road2 branch (aligned slice)
    # road1 conv2: weight is zero-extended to (cout, 2*cout) so it reads rows cout: of
    # the fused slab directly — no sublane-unaligned split needed.
    h1 = bn_selu(jnp.dot(w1b_ref[...], h12, preferred_element_type=jnp.float32),
                 g1b_ref[...], be1b_ref[...])                # (cout, l_tot)
    h3 = bn_selu(h1 + h2, g3_ref[...], be3_ref[...])         # (cout, l_tot)  == u_hat

    # ---- degree routing (softmax over out-capsules of ||u_hat||) + squash ----------
    # tiny constant group matrices (built in-registers once per call):
    #   g_sum  (n_out, cout): sums each out-capsule's d_out channel rows
    #   g_rep  (cout, n_out): broadcasts a per-out-capsule row back to its d_out rows
    col = jax.lax.broadcasted_iota(jnp.int32, (n_out, cout), 1)
    row = jax.lax.broadcasted_iota(jnp.int32, (n_out, cout), 0)
    g_sum = ((col >= row * d_out) & (col < (row + 1) * d_out)).astype(jnp.float32)
    rc = jax.lax.broadcasted_iota(jnp.int32, (cout, n_out), 0)
    cj = jax.lax.broadcasted_iota(jnp.int32, (cout, n_out), 1)
    g_rep = ((rc >= cj * d_out) & (rc < (cj + 1) * d_out)).astype(jnp.float32)

    nsq = jnp.dot(g_sum, h3 * h3, preferred_element_type=jnp.float32)   # (n_out, l_tot)
    nrm = jnp.sqrt(nsq + 1e-12)
    e = jnp.exp(nrm - jnp.max(nrm, axis=0, keepdims=True))
    score = e / jnp.sum(e, axis=0, keepdims=True)                       # exact softmax
    u_w = h3 * jnp.dot(g_rep, score, preferred_element_type=jnp.float32)

    # sum over in-capsules: lanes are ordered (in_cap, batch, spatial) with in_cap-major,
    # so the summands are contiguous lane-aligned chunks of width n_batch*sp.
    s = u_w[:, :l_ns]
    for i in range(1, n_in):
        s = s + u_w[:, i * l_ns:(i + 1) * l_ns]                          # (cout, l_ns)

    # squash along the out-capsule dim (d_out channel-row groups)
    ssq = jnp.dot(g_sum, s * s, preferred_element_type=jnp.float32)      # (n_out, l_ns)
    fac = ssq * jax.lax.rsqrt(ssq + 1e-9) / (1.0 + ssq)
    v = s * jnp.dot(g_rep, fac, preferred_element_type=jnp.float32)      # (cout, l_ns)

    o_ref[...] = v.astype(o_ref.dtype)                                   # single full store


# ---------------------------------------------------------------------------
# Wrapper
# ---------------------------------------------------------------------------
def _pack_params(p, cout):
    # stage-1 fused weight: rows [0:cout) = road2 conv, rows [cout:2*cout) = road1 conv1
    w12 = jnp.concatenate([p["w2"], p["w1a"]], axis=0)                     # (2*cout, cin)
    # road1 conv2 weight, zero-extended to consume the fused (2*cout)-row slab
    w1b_ext = jnp.concatenate(
        [jnp.zeros((cout, cout), jnp.float32), p["w1b"]], axis=1)          # (cout, 2*cout)
    col = lambda a: a.reshape(-1, 1).astype(jnp.float32)
    g12 = col(jnp.concatenate([p["g2"], p["g1a"]]))
    be12 = col(jnp.concatenate([p["be2"], p["be1a"]]))
    return (w12, w1b_ext, g12, be12,
            col(p["g1b"]), col(p["be1b"]), col(p["g3"]), col(p["be3"]))


def convolutional_capsule_layer(x, params, *, num_out_capsules, out_capsule_dim):
    """x: (N, num_in_caps, in_cap_dim, 2b, 2b, 2b) -> (N, n_out, d_out, 2b, 2b, 2b)."""
    N, n_in, in_dim, S0, S1, S2 = x.shape
    assert S0 == S1 == S2
    sp = S0 * S1 * S2
    cout = num_out_capsules * out_capsule_dim
    l_tot = n_in * N * sp

    w12, w1b_ext, g12, be12, g1b, be1b, g3, be3 = _pack_params(params, cout)

    # channels -> sublanes, (in_caps, batch, spatial) -> lanes; one tiny XLA transpose.
    xt = jnp.transpose(x.reshape(N, n_in, in_dim, sp), (2, 1, 0, 3)).reshape(in_dim, l_tot)

    kernel = functools.partial(
        _capsule_layer_kernel,
        n_batch=N, n_in=n_in, n_out=num_out_capsules, d_out=out_capsule_dim, eps=1e-5)

    full = lambda shape: pl.BlockSpec(tuple(shape), lambda i: (0,) * len(shape))

    out = pl.pallas_call(
        kernel,
        out_shape=jax.ShapeDtypeStruct((cout, N * sp), jnp.float32),
        grid_spec=pltpu.PrefetchScalarGridSpec(
            num_scalar_prefetch=0,
            grid=(1,),
            in_specs=[full(xt.shape), full(w12.shape), full(w1b_ext.shape),
                      full(g12.shape), full(be12.shape),
                      full(g1b.shape), full(be1b.shape),
                      full(g3.shape), full(be3.shape)],
            out_specs=full((cout, N * sp)),
        ),
        compiler_params=pltpu.CompilerParams(dimension_semantics=("arbitrary",)),
    )(xt, w12, w1b_ext, g12, be12, g1b, be1b, g3, be3)

    # (cout, N*sp) with rows c = j*d_out + d and lanes (n, s)  ->  (N, n_out, d_out, S,S,S)
    out = out.reshape(num_out_capsules, out_capsule_dim, N, sp)
    out = jnp.transpose(out, (2, 0, 1, 3))
    return out.reshape(N, num_out_capsules, out_capsule_dim, S0, S1, S2)


# ---------------------------------------------------------------------------
# Pure-JAX reference (same math) for validation
# ---------------------------------------------------------------------------
def reference_forward(x, p, *, num_out_capsules, out_capsule_dim, eps=1e-5):
    N, n_in, in_dim, S0, S1, S2 = x.shape
    sp = S0 * S1 * S2
    x3 = x.reshape(N * n_in, in_dim, sp)

    def conv(h, w):
        return jnp.einsum("oc,mcs->mos", w, h)

    def bn_selu(h, g, be):
        mean = jnp.mean(h, axis=(0, 2), keepdims=True)
        var = jnp.mean(jnp.square(h - mean), axis=(0, 2), keepdims=True)
        hn = (h - mean) * jax.lax.rsqrt(var + eps) * g[None, :, None] + be[None, :, None]
        return SELU_SCALE * jnp.where(
            hn > 0, hn, SELU_ALPHA * (jnp.exp(jnp.minimum(hn, 0.0)) - 1.0))

    h1 = bn_selu(conv(x3, p["w1a"]), p["g1a"], p["be1a"])
    h1 = bn_selu(conv(h1, p["w1b"]), p["g1b"], p["be1b"])
    h2 = bn_selu(conv(x3, p["w2"]), p["g2"], p["be2"])
    h3 = bn_selu(h1 + h2, p["g3"], p["be3"])

    u = h3.reshape(N, n_in, num_out_capsules, out_capsule_dim, sp)
    nrm = jnp.sqrt(jnp.sum(u * u, axis=3, keepdims=True) + 1e-12)
    score = jax.nn.softmax(nrm, axis=2)
    s = jnp.sum(score * u, axis=1)                          # (N, n_out, d_out, sp)
    s_sq = jnp.sum(s * s, axis=2, keepdims=True)
    v = s * (s_sq * jax.lax.rsqrt(s_sq + 1e-9) / (1.0 + s_sq))
    return v.reshape(N, num_out_capsules, out_capsule_dim, S0, S1, S2)


def init_params(key, in_dim, out_features):
    # Conv biases are intentionally omitted: every conv is followed by training-mode
    # BatchNorm, whose mean subtraction cancels any per-channel constant bias exactly.
    ks = jax.random.split(key, 11)

    def w(k, cout, cin):
        return jax.random.normal(k, (cout, cin), jnp.float32) / jnp.sqrt(cin)

    g = lambda k: 1.0 + 0.1 * jax.random.normal(k, (out_features,), jnp.float32)
    b = lambda k: 0.1 * jax.random.normal(k, (out_features,), jnp.float32)
    return dict(
        w1a=w(ks[0], out_features, in_dim),
        w1b=w(ks[1], out_features, out_features),
        w2=w(ks[2], out_features, in_dim),
        g1a=g(ks[3]), be1a=b(ks[4]),
        g1b=g(ks[5]), be1b=b(ks[6]),
        g2=g(ks[7]), be2=b(ks[8]),
        g3=g(ks[9]), be3=b(ks[10]),
    )


if __name__ == "__main__":
    # Small, module-consistent shapes.
    N, num_in_capsules, in_capsule_dim = 2, 2, 4
    num_out_capsules, out_capsule_dim = 3, 4
    b_in = b_out = 4                    # spatial = 2*b = 8  -> 8^3 = 512 points (lanes)
    S = 2 * b_in

    key = jax.random.PRNGKey(0)
    kx, kp = jax.random.split(key)
    x = jax.random.normal(
        kx, (N, num_in_capsules, in_capsule_dim, S, S, S), jnp.float32)

    out_features = num_out_capsules * out_capsule_dim
    params = init_params(kp, in_capsule_dim, out_features)

    fwd = jax.jit(functools.partial(
        convolutional_capsule_layer,
        num_out_capsules=num_out_capsules,
        out_capsule_dim=out_capsule_dim,
    ))

    v = fwd(x, params)
    jax.block_until_ready(v)

    assert v.shape == (N, num_out_capsules, out_capsule_dim, S, S, S), v.shape
    assert bool(jnp.all(jnp.isfinite(v)))
    # squash bounds the norm along the CAPSULE dim (axis=2).
    assert bool(jnp.all(jnp.linalg.norm(v, axis=2) < 1.0 + 1e-4))

    v_ref = reference_forward(x, params,
                              num_out_capsules=num_out_capsules,
                              out_capsule_dim=out_capsule_dim)
    max_err = float(jnp.max(jnp.abs(v - v_ref)))
    # exact softmax/squash divides now; remaining slack covers MXU f32 default precision.
    assert max_err < 3e-2, max_err

    print("KERNEL_OK")
</pallas_src>

<mosaic_0001>
module attributes {stable_mosaic.version = 11 : i64} {
  func.func @_capsule_layer_kernel(%arg0: i32, %arg1: memref<4x2048xf32, #tpu.memory_space<vmem>>, %arg2: memref<24x4xf32, #tpu.memory_space<vmem>>, %arg3: memref<12x24xf32, #tpu.memory_space<vmem>>, %arg4: memref<24x1xf32, #tpu.memory_space<vmem>>, %arg5: memref<24x1xf32, #tpu.memory_space<vmem>>, %arg6: memref<12x1xf32, #tpu.memory_space<vmem>>, %arg7: memref<12x1xf32, #tpu.memory_space<vmem>>, %arg8: memref<12x1xf32, #tpu.memory_space<vmem>>, %arg9: memref<12x1xf32, #tpu.memory_space<vmem>>, %arg10: memref<12x1024xf32, #tpu.memory_space<vmem>>) attributes {dimension_semantics = [#tpu.dimension_semantics<arbitrary>], iteration_bounds = array<i64: 1>, scalar_prefetch = 0 : i64, scratch_operands = 0 : i64, tpu.core_type = #tpu.core_type<tc>, window_params = [{pipeline_mode = #tpu.pipeline_mode<synchronous>, transform_indices = @transform_0, window_bounds = array<i64: 4, 2048>}, {pipeline_mode = #tpu.pipeline_mode<synchronous>, transform_indices = @transform_1, window_bounds = array<i64: 24, 4>}, {pipeline_mode = #tpu.pipeline_mode<synchronous>, transform_indices = @transform_2, window_bounds = array<i64: 12, 24>}, {pipeline_mode = #tpu.pipeline_mode<synchronous>, transform_indices = @transform_3, window_bounds = array<i64: 24, 1>}, {pipeline_mode = #tpu.pipeline_mode<synchronous>, transform_indices = @transform_4, window_bounds = array<i64: 24, 1>}, {pipeline_mode = #tpu.pipeline_mode<synchronous>, transform_indices = @transform_5, window_bounds = array<i64: 12, 1>}, {pipeline_mode = #tpu.pipeline_mode<synchronous>, transform_indices = @transform_6, window_bounds = array<i64: 12, 1>}, {pipeline_mode = #tpu.pipeline_mode<synchronous>, transform_indices = @transform_7, window_bounds = array<i64: 12, 1>}, {pipeline_mode = #tpu.pipeline_mode<synchronous>, transform_indices = @transform_8, window_bounds = array<i64: 12, 1>}, {pipeline_mode = #tpu.pipeline_mode<synchronous>, transform_indices = @transform_9, window_bounds = array<i64: 12, 1024>}]} {
    %c0 = arith.constant 0 : index
    %c0_0 = arith.constant 0 : index
    %0 = vector.load %arg1[%c0, %c0_0] : memref<4x2048xf32, #tpu.memory_space<vmem>>, vector<4x2048xf32>
    %c0_1 = arith.constant 0 : index
    %c0_2 = arith.constant 0 : index
    %1 = vector.load %arg2[%c0_1, %c0_2] : memref<24x4xf32, #tpu.memory_space<vmem>>, vector<24x4xf32>
    %cst = arith.constant dense<0.000000e+00> : vector<24x2048xf32>
    %2 = tpu.matmul %1, %0, %cst {dimension_numbers = #tpu.dot_dimension_numbers<[1], [0], [0], [1], [0, 0, 1, 1], [], []>} : vector<24x4xf32>, vector<4x2048xf32>, vector<24x2048xf32> -> vector<24x2048xf32>
    %c0_3 = arith.constant 0 : index
    %c0_4 = arith.constant 0 : index
    %3 = vector.load %arg4[%c0_3, %c0_4] : memref<24x1xf32, #tpu.memory_space<vmem>>, vector<24x1xf32>
    %c0_5 = arith.constant 0 : index
    %c0_6 = arith.constant 0 : index
    %4 = vector.load %arg5[%c0_5, %c0_6] : memref<24x1xf32, #tpu.memory_space<vmem>>, vector<24x1xf32>
    %cst_7 = arith.constant dense<0.000000e+00> : vector<24xf32>
    %5 = vector.multi_reduction <add>, %2, %cst_7 [1] : vector<24x2048xf32> to vector<24xf32>
    %6 = vector.shape_cast %5 : vector<24xf32> to vector<24x1xf32>
    %cst_8 = arith.constant 4.8828125E-4 : f32
    %7 = vector.broadcast %cst_8 : f32 to vector<24x1xf32>
    %8 = arith.mulf %6, %7 : vector<24x1xf32>
    %9 = vector.broadcast %8 : vector<24x1xf32> to vector<24x2048xf32>
    %10 = arith.subf %2, %9 : vector<24x2048xf32>
    %11 = arith.mulf %10, %10 : vector<24x2048xf32>
    %cst_9 = arith.constant dense<0.000000e+00> : vector<24xf32>
    %12 = vector.multi_reduction <add>, %11, %cst_9 [1] : vector<24x2048xf32> to vector<24xf32>
    %13 = vector.shape_cast %12 : vector<24xf32> to vector<24x1xf32>
    %cst_10 = arith.constant 4.8828125E-4 : f32
    %14 = vector.broadcast %cst_10 : f32 to vector<24x1xf32>
    %15 = arith.mulf %13, %14 : vector<24x1xf32>
    %cst_11 = arith.constant 9.99999974E-6 : f32
    %16 = vector.broadcast %cst_11 : f32 to vector<24x1xf32>
    %17 = arith.addf %15, %16 : vector<24x1xf32>
    %18 = math.rsqrt %17 : vector<24x1xf32>
    %19 = arith.mulf %3, %18 : vector<24x1xf32>
    %20 = vector.broadcast %19 : vector<24x1xf32> to vector<24x2048xf32>
    %21 = arith.mulf %10, %20 : vector<24x2048xf32>
    %22 = vector.broadcast %4 : vector<24x1xf32> to vector<24x2048xf32>
    %23 = arith.addf %21, %22 : vector<24x2048xf32>
    %cst_12 = arith.constant 0.000000e+00 : f32
    %24 = vector.broadcast %cst_12 : f32 to vector<24x2048xf32>
    %25 = arith.cmpf ogt, %23, %24 : vector<24x2048xf32>
    %cst_13 = arith.constant 0.000000e+00 : f32
    %26 = vector.broadcast %cst_13 : f32 to vector<24x2048xf32>
    %27 = arith.minimumf %23, %26 : vector<24x2048xf32>
    %28 = math.exp %27 : vector<24x2048xf32>
    %cst_14 = arith.constant 1.000000e+00 : f32
    %29 = vector.broadcast %cst_14 : f32 to vector<24x2048xf32>
    %30 = arith.subf %28, %29 : vector<24x2048xf32>
    %cst_15 = arith.constant 1.67326319 : f32
    %31 = vector.broadcast %cst_15 : f32 to vector<24x2048xf32>
    %32 = arith.mulf %31, %30 : vector<24x2048xf32>
    %33 = arith.select %25, %23, %32 : vector<24x2048xi1>, vector<24x2048xf32>
    %cst_16 = arith.constant 1.05070102 : f32
    %34 = vector.broadcast %cst_16 : f32 to vector<24x2048xf32>
    %35 = arith.mulf %34, %33 : vector<24x2048xf32>
    %36 = vector.extract_strided_slice %35 {offsets = [0, 0], sizes = [12, 2048], strides = [1, 1]} : vector<24x2048xf32> to vector<12x2048xf32>
    %c0_17 = arith.constant 0 : index
    %c0_18 = arith.constant 0 : index
    %37 = vector.load %arg3[%c0_17, %c0_18] : memref<12x24xf32, #tpu.memory_space<vmem>>, vector<12x24xf32>
    %cst_19 = arith.constant dense<0.000000e+00> : vector<12x2048xf32>
    %38 = tpu.matmul %37, %35, %cst_19 {dimension_numbers = #tpu.dot_dimension_numbers<[1], [0], [0], [1], [0, 0, 1, 1], [], []>} : vector<12x24xf32>, vector<24x2048xf32>, vector<12x2048xf32> -> vector<12x2048xf32>
    %c0_20 = arith.constant 0 : index
    %c0_21 = arith.constant 0 : index
    %39 = vector.load %arg6[%c0_20, %c0_21] : memref<12x1xf32, #tpu.memory_space<vmem>>, vector<12x1xf32>
    %c0_22 = arith.constant 0 : index
    %c0_23 = arith.constant 0 : index
    %40 = vector.load %arg7[%c0_22, %c0_23] : memref<12x1xf32, #tpu.memory_space<vmem>>, vector<12x1xf32>
    %cst_24 = arith.constant dense<0.000000e+00> : vector<12xf32>
    %41 = vector.multi_reduction <add>, %38, %cst_24 [1] : vector<12x2048xf32> to vector<12xf32>
    %42 = vector.shape_cast %41 : vector<12xf32> to vector<12x1xf32>
    %cst_25 = arith.constant 4.8828125E-4 : f32
    %43 = vector.broadcast %cst_25 : f32 to vector<12x1xf32>
    %44 = arith.mulf %42, %43 : vector<12x1xf32>
    %45 = vector.broadcast %44 : vector<12x1xf32> to vector<12x2048xf32>
    %46 = arith.subf %38, %45 : vector<12x2048xf32>
    %47 = arith.mulf %46, %46 : vector<12x2048xf32>
    %cst_26 = arith.constant dense<0.000000e+00> : vector<12xf32>
    %48 = vector.multi_reduction <add>, %47, %cst_26 [1] : vector<12x2048xf32> to vector<12xf32>
    %49 = vector.shape_cast %48 : vector<12xf32> to vector<12x1xf32>
    %cst_27 = arith.constant 4.8828125E-4 : f32
    %50 = vector.broadcast %cst_27 : f32 to vector<12x1xf32>
    %51 = arith.mulf %49, %50 : vector<12x1xf32>
    %cst_28 = arith.constant 9.99999974E-6 : f32
    %52 = vector.broadcast %cst_28 : f32 to vector<12x1xf32>
    %53 = arith.addf %51, %52 : vector<12x1xf32>
    %54 = math.rsqrt %53 : vector<12x1xf32>
    %55 = arith.mulf %39, %54 : vector<12x1xf32>
    %56 = vector.broadcast %55 : vector<12x1xf32> to vector<12x2048xf32>
    %57 = arith.mulf %46, %56 : vector<12x2048xf32>
    %58 = vector.broadcast %40 : vector<12x1xf32> to vector<12x2048xf32>
    %59 = arith.addf %57, %58 : vector<12x2048xf32>
    %cst_29 = arith.constant 0.000000e+00 : f32
    %60 = vector.broadcast %cst_29 : f32 to vector<12x2048xf32>
    %61 = arith.cmpf ogt, %59, %60 : vector<12x2048xf32>
    %cst_30 = arith.constant 0.000000e+00 : f32
    %62 = vector.broadcast %cst_30 : f32 to vector<12x2048xf32>
    %63 = arith.minimumf %59, %62 : vector<12x2048xf32>
    %64 = math.exp %63 : vector<12x2048xf32>
    %cst_31 = arith.constant 1.000000e+00 : f32
    %65 = vector.broadcast %cst_31 : f32 to vector<12x2048xf32>
    %66 = arith.subf %64, %65 : vector<12x2048xf32>
    %cst_32 = arith.constant 1.67326319 : f32
    %67 = vector.broadcast %cst_32 : f32 to vector<12x2048xf32>
    %68 = arith.mulf %67, %66 : vector<12x2048xf32>
    %69 = arith.select %61, %59, %68 : vector<12x2048xi1>, vector<12x2048xf32>
    %cst_33 = arith.constant 1.05070102 : f32
    %70 = vector.broadcast %cst_33 : f32 to vector<12x2048xf32>
    %71 = arith.mulf %70, %69 : vector<12x2048xf32>
    %72 = arith.addf %71, %36 : vector<12x2048xf32>
    %c0_34 = arith.constant 0 : index
    %c0_35 = arith.constant 0 : index
    %73 = vector.load %arg8[%c0_34, %c0_35] : memref<12x1xf32, #tpu.memory_space<vmem>>, vector<12x1xf32>
    %c0_36 = arith.constant 0 : index
    %c0_37 = arith.constant 0 : index
    %74 = vector.load %arg9[%c0_36, %c0_37] : memref<12x1xf32, #tpu.memory_space<vmem>>, vector<12x1xf32>
    %cst_38 = arith.constant dense<0.000000e+00> : vector<12xf32>
    %75 = vector.multi_reduction <add>, %72, %cst_38 [1] : vector<12x2048xf32> to vector<12xf32>
    %76 = vector.shape_cast %75 : vector<12xf32> to vector<12x1xf32>
    %cst_39 = arith.constant 4.8828125E-4 : f32
    %77 = vector.broadcast %cst_39 : f32 to vector<12x1xf32>
    %78 = arith.mulf %76, %77 : vector<12x1xf32>
    %79 = vector.broadcast %78 : vector<12x1xf32> to vector<12x2048xf32>
    %80 = arith.subf %72, %79 : vector<12x2048xf32>
    %81 = arith.mulf %80, %80 : vector<12x2048xf32>
    %cst_40 = arith.constant dense<0.000000e+00> : vector<12xf32>
    %82 = vector.multi_reduction <add>, %81, %cst_40 [1] : vector<12x2048xf32> to vector<12xf32>
    %83 = vector.shape_cast %82 : vector<12xf32> to vector<12x1xf32>
    %cst_41 = arith.constant 4.8828125E-4 : f32
    %84 = vector.broadcast %cst_41 : f32 to vector<12x1xf32>
    %85 = arith.mulf %83, %84 : vector<12x1xf32>
    %cst_42 = arith.constant 9.99999974E-6 : f32
    %86 = vector.broadcast %cst_42 : f32 to vector<12x1xf32>
    %87 = arith.addf %85, %86 : vector<12x1xf32>
    %88 = math.rsqrt %87 : vector<12x1xf32>
    %89 = arith.mulf %73, %88 : vector<12x1xf32>
    %90 = vector.broadcast %89 : vector<12x1xf32> to vector<12x2048xf32>
    %91 = arith.mulf %80, %90 : vector<12x2048xf32>
    %92 = vector.broadcast %74 : vector<12x1xf32> to vector<12x2048xf32>
    %93 = arith.addf %91, %92 : vector<12x2048xf32>
    %cst_43 = arith.constant 0.000000e+00 : f32
    %94 = vector.broadcast %cst_43 : f32 to vector<12x2048xf32>
    %95 = arith.cmpf ogt, %93, %94 : vector<12x2048xf32>
    %cst_44 = arith.constant 0.000000e+00 : f32
    %96 = vector.broadcast %cst_44 : f32 to vector<12x2048xf32>
    %97 = arith.minimumf %93, %96 : vector<12x2048xf32>
    %98 = math.exp %97 : vector<12x2048xf32>
    %cst_45 = arith.constant 1.000000e+00 : f32
    %99 = vector.broadcast %cst_45 : f32 to vector<12x2048xf32>
    %100 = arith.subf %98, %99 : vector<12x2048xf32>
    %cst_46 = arith.constant 1.67326319 : f32
    %101 = vector.broadcast %cst_46 : f32 to vector<12x2048xf32>
    %102 = arith.mulf %101, %100 : vector<12x2048xf32>
    %103 = arith.select %95, %93, %102 : vector<12x2048xi1>, vector<12x2048xf32>
    %cst_47 = arith.constant 1.05070102 : f32
    %104 = vector.broadcast %cst_47 : f32 to vector<12x2048xf32>
    %105 = arith.mulf %104, %103 : vector<12x2048xf32>
    %106 = tpu.iota {dimensions = array<i32: 1>} : vector<3x12xi32>
    %107 = tpu.iota {dimensions = array<i32: 0>} : vector<3x12xi32>
    %c4_i32 = arith.constant 4 : i32
    %108 = vector.broadcast %c4_i32 : i32 to vector<3x12xi32>
    %109 = arith.muli %107, %108 : vector<3x12xi32>
    %110 = arith.cmpi sge, %106, %109 : vector<3x12xi32>
    %c1_i32 = arith.constant 1 : i32
    %111 = vector.broadcast %c1_i32 : i32 to vector<3x12xi32>
    %112 = arith.addi %107, %111 : vector<3x12xi32>
    %c4_i32_48 = arith.constant 4 : i32
    %113 = vector.broadcast %c4_i32_48 : i32 to vector<3x12xi32>
    %114 = arith.muli %112, %113 : vector<3x12xi32>
    %115 = arith.cmpi slt, %106, %114 : vector<3x12xi32>
    %116 = arith.andi %110, %115 : vector<3x12xi1>
    %117 = arith.extui %116 : vector<3x12xi1> to vector<3x12xi32>
    %118 = arith.sitofp %117 : vector<3x12xi32> to vector<3x12xf32>
    %119 = tpu.iota {dimensions = array<i32: 0>} : vector<12x3xi32>
    %120 = tpu.iota {dimensions = array<i32: 1>} : vector<12x3xi32>
    %c4_i32_49 = arith.constant 4 : i32
    %121 = vector.broadcast %c4_i32_49 : i32 to vector<12x3xi32>
    %122 = arith.muli %120, %121 : vector<12x3xi32>
    %123 = arith.cmpi sge, %119, %122 : vector<12x3xi32>
    %c1_i32_50 = arith.constant 1 : i32
    %124 = vector.broadcast %c1_i32_50 : i32 to vector<12x3xi32>
    %125 = arith.addi %120, %124 : vector<12x3xi32>
    %c4_i32_51 = arith.constant 4 : i32
    %126 = vector.broadcast %c4_i32_51 : i32 to vector<12x3xi32>
    %127 = arith.muli %125, %126 : vector<12x3xi32>
    %128 = arith.cmpi slt, %119, %127 : vector<12x3xi32>
    %129 = arith.andi %123, %128 : vector<12x3xi1>
    %130 = arith.extui %129 : vector<12x3xi1> to vector<12x3xi32>
    %131 = arith.sitofp %130 : vector<12x3xi32> to vector<12x3xf32>
    %132 = arith.mulf %105, %105 : vector<12x2048xf32>
    %cst_52 = arith.constant dense<0.000000e+00> : vector<3x2048xf32>
    %133 = tpu.matmul %118, %132, %cst_52 {dimension_numbers = #tpu.dot_dimension_numbers<[1], [0], [0], [1], [0, 0, 1, 1], [], []>} : vector<3x12xf32>, vector<12x2048xf32>, vector<3x2048xf32> -> vector<3x2048xf32>
    %cst_53 = arith.constant 9.99999996E-13 : f32
    %134 = vector.broadcast %cst_53 : f32 to vector<3x2048xf32>
    %135 = arith.addf %133, %134 : vector<3x2048xf32>
    %136 = math.sqrt %135 : vector<3x2048xf32>
    %cst_54 = arith.constant dense<0xFF800000> : vector<2048xf32>
    %137 = vector.multi_reduction <maximumf>, %136, %cst_54 [0] : vector<3x2048xf32> to vector<2048xf32>
    %138 = vector.shape_cast %137 : vector<2048xf32> to vector<1x2048xf32>
    %139 = vector.broadcast %138 : vector<1x2048xf32> to vector<3x2048xf32>
    %140 = arith.subf %136, %139 : vector<3x2048xf32>
    %141 = math.exp %140 : vector<3x2048xf32>
    %cst_55 = arith.constant dense<0.000000e+00> : vector<2048xf32>
    %142 = vector.multi_reduction <add>, %141, %cst_55 [0] : vector<3x2048xf32> to vector<2048xf32>
    %143 = vector.shape_cast %142 : vector<2048xf32> to vector<1x2048xf32>
    %144 = vector.broadcast %143 : vector<1x2048xf32> to vector<3x2048xf32>
    %145 = arith.divf %141, %144 : vector<3x2048xf32>
    %cst_56 = arith.constant dense<0.000000e+00> : vector<12x2048xf32>
    %146 = tpu.matmul %131, %145, %cst_56 {dimension_numbers = #tpu.dot_dimension_numbers<[1], [0], [0], [1], [0, 0, 1, 1], [], []>} : vector<12x3xf32>, vector<3x2048xf32>, vector<12x2048xf32> -> vector<12x2048xf32>
    %147 = arith.mulf %105, %146 : vector<12x2048xf32>
    %148 = vector.extract_strided_slice %147 {offsets = [0, 0], sizes = [12, 1024], strides = [1, 1]} : vector<12x2048xf32> to vector<12x1024xf32>
    %149 = vector.extract_strided_slice %147 {offsets = [0, 1024], sizes = [12, 1024], strides = [1, 1]} : vector<12x2048xf32> to vector<12x1024xf32>
    %150 = arith.addf %148, %149 : vector<12x1024xf32>
    %151 = arith.mulf %150, %150 : vector<12x1024xf32>
    %cst_57 = arith.constant dense<0.000000e+00> : vector<3x1024xf32>
    %152 = tpu.matmul %118, %151, %cst_57 {dimension_numbers = #tpu.dot_dimension_numbers<[1], [0], [0], [1], [0, 0, 1, 1], [], []>} : vector<3x12xf32>, vector<12x1024xf32>, vector<3x1024xf32> -> vector<3x1024xf32>
    %cst_58 = arith.constant 9.99999971E-10 : f32
    %153 = vector.broadcast %cst_58 : f32 to vector<3x1024xf32>
    %154 = arith.addf %152, %153 : vector<3x1024xf32>
    %155 = math.rsqrt %154 : vector<3x1024xf32>
    %156 = arith.mulf %152, %155 : vector<3x1024xf32>
    %cst_59 = arith.constant 1.000000e+00 : f32
    %157 = vector.broadcast %cst_59 : f32 to vector<3x1024xf32>
    %158 = arith.addf %157, %152 : vector<3x1024xf32>
    %159 = arith.divf %156, %158 : vector<3x1024xf32>
    %cst_60 = arith.constant dense<0.000000e+00> : vector<12x1024xf32>
    %160 = tpu.matmul %131, %159, %cst_60 {dimension_numbers = #tpu.dot_dimension_numbers<[1], [0], [0], [1], [0, 0, 1, 1], [], []>} : vector<12x3xf32>, vector<3x1024xf32>, vector<12x1024xf32> -> vector<12x1024xf32>
    %161 = arith.mulf %150, %160 : vector<12x1024xf32>
    %c0_61 = arith.constant 0 : index
    %c0_62 = arith.constant 0 : index
    %162 = vector.load %arg10[%c0_61, %c0_62] : memref<12x1024xf32, #tpu.memory_space<vmem>>, vector<12x1024xf32>
    tpu.vector_store %arg10[%c0_61, %c0_62], %161 {strides = array<i32>} : memref<12x1024xf32, #tpu.memory_space<vmem>>, vector<12x1024xf32>,
    return
  }
  func.func @transform_0(%arg0: i32) -> (i32, i32) {
    %c0_i32 = arith.constant 0 : i32
    %c0_i32_0 = arith.constant 0 : i32
    %c0_i32_1 = arith.constant 0 : i32
    return %c0_i32, %c0_i32_0 : i32, i32
  }
  func.func @transform_1(%arg0: i32) -> (i32, i32) {
    %c0_i32 = arith.constant 0 : i32
    %c0_i32_0 = arith.constant 0 : i32
    %c0_i32_1 = arith.constant 0 : i32
    return %c0_i32, %c0_i32_0 : i32, i32
  }
  func.func @transform_2(%arg0: i32) -> (i32, i32) {
    %c0_i32 = arith.constant 0 : i32
    %c0_i32_0 = arith.constant 0 : i32
    %c0_i32_1 = arith.constant 0 : i32
    return %c0_i32, %c0_i32_0 : i32, i32
  }
  func.func @transform_3(%arg0: i32) -> (i32, i32) {
    %c0_i32 = arith.constant 0 : i32
    %c0_i32_0 = arith.constant 0 : i32
    %c0_i32_1 = arith.constant 0 : i32
    return %c0_i32, %c0_i32_0 : i32, i32
  }
  func.func @transform_4(%arg0: i32) -> (i32, i32) {
    %c0_i32 = arith.constant 0 : i32
    %c0_i32_0 = arith.constant 0 : i32
    %c0_i32_1 = arith.constant 0 : i32
    return %c0_i32, %c0_i32_0 : i32, i32
  }
  func.func @transform_5(%arg0: i32) -> (i32, i32) {
    %c0_i32 = arith.constant 0 : i32
    %c0_i32_0 = arith.constant 0 : i32
    %c0_i32_1 = arith.constant 0 : i32
    return %c0_i32, %c0_i32_0 : i32, i32
  }
  func.func @transform_6(%arg0: i32) -> (i32, i32) {
    %c0_i32 = arith.constant 0 : i32
    %c0_i32_0 = arith.constant 0 : i32
    %c0_i32_1 = arith.constant 0 : i32
    return %c0_i32, %c0_i32_0 : i32, i32
  }
  func.func @transform_7(%arg0: i32) -> (i32, i32) {
    %c0_i32 = arith.constant 0 : i32
    %c0_i32_0 = arith.constant 0 : i32
    %c0_i32_1 = arith.constant 0 : i32
    return %c0_i32, %c0_i32_0 : i32, i32
  }
  func.func @transform_8(%arg0: i32) -> (i32, i32) {
    %c0_i32 = arith.constant 0 : i32
    %c0_i32_0 = arith.constant 0 : i32
    %c0_i32_1 = arith.constant 0 : i32
    return %c0_i32, %c0_i32_0 : i32, i32
  }
  func.func @transform_9(%arg0: i32) -> (i32, i32) {
    %c0_i32 = arith.constant 0 : i32
    %c0_i32_0 = arith.constant 0 : i32
    %c0_i32_1 = arith.constant 0 : i32
    return %c0_i32, %c0_i32_0 : i32, i32
  }
}

</mosaic_0001>

<bundles_post_ra>
// kernel: convolutional_capsule_layer.1
= control target key start
LH: loop header
LB: loop body
LE: loop exit
PB: predicated region body
PF: predicated region fallthrough
CT: control target
= control target key end

     0   :  { %vm69_vm0 = vcmask 1043456   ;;  %v9882_v1 = vmov 0.0   ;;  %vm59_vm1 = vcmask 31744   ;;  %s9872_s0 = inlined_call_operand.vmem [shape: f32[4,2048], index: 0, kind: input, shape index: {}]   ;;  %s9873_s1 = inlined_call_operand.vmem [shape: f32[24,4], index: 1, kind: input, shape index: {}]   ;;  %s9874_s4 = inlined_call_operand.vmem [shape: f32[24,1], index: 4, kind: input, shape index: {}]   ;;  %s9875_s3 = inlined_call_operand.vmem [shape: f32[24,1], index: 3, kind: input, shape index: {}]   ;;  %s9876_s2 = inlined_call_operand.vmem [shape: f32[12,24], index: 2, kind: input, shape index: {}]   ;;  %s9877_s5 = inlined_call_operand.vmem [shape: f32[12,1], index: 5, kind: input, shape index: {}]   ;;  %s9878_s6 = inlined_call_operand.vmem [shape: f32[12,1], index: 6, kind: input, shape index: {}]   ;;  %s9879_s7 = inlined_call_operand.vmem [shape: f32[12,1], index: 7, kind: input, shape index: {}]   ;;  %s9880_s8 = inlined_call_operand.vmem [shape: f32[12,1], index: 8, kind: input, shape index: {}]   ;;  %s9881_s9 = inlined_call_operand.vmem [shape: f32[12,1024], index: 9, kind: output, shape index: {}]  }
   0x1   :  { %v32_v0 = vld [vmem:[%s9872_s0] sm:$0xff]  ;;  %166 = vmatprep.mubr.f32.mxu0 %v9882_v1  ;;  %v33_v2 = vld [vmem:[%s9872_s0 + $0x8] sm:$0xff]  ;;  %249 = vmatprep.mubr.f32.mxu1 %v9882_v1  ;;  %v34_v5 = vld [vmem:[%s9872_s0 + $0x10] sm:$0xff] }
   0x2   :  { %v51_v3 = vcombine.high %v32_v0, %v32_v0  ;;  %v52_v4 = vcombine.high %v33_v2, %v33_v2  ;;  %v6547_v6 = vld [vmem:[%s9873_s1] sm:$0xff]  ;;  %v35_v7 = vld [vmem:[%s9872_s0 + $0x18] sm:$0xff]  ;;  %v53_v8 = vcombine.high %v34_v5, %v34_v5  ;;  %v37_v11 = vld [vmem:[%s9872_s0 + $0x28] sm:$0xff] }
   0x3   :  { %v54_v9 = vcombine.high %v35_v7, %v35_v7  ;;  %v36_v10 = vld [vmem:[%s9872_s0 + $0x20] sm:$0xff]  ;;  %v41_v12 = vld [vmem:[%s9873_s1 + $0x8] sm:$0xff]  ;;  %v56_v14 = vcombine.high %v37_v11, %v37_v11  ;;  %v42_v15 = vld [vmem:[%s9873_s1 + $0x10] sm:$0xff] }
   0x4   :  { %5742 = vmatprep.subr.msk.mxu0 %vm69_vm0, %v51_v3  ;;  %5747 = vmatprep.subr.msk.mxu1 %vm69_vm0, %v52_v4  ;;  %v55_v13 = vcombine.high %v36_v10, %v36_v10  ;;  %v38_v16 = vld [vmem:[%s9872_s0 + $0x30] sm:$0xff]  ;;  %v39_v17 = vld [vmem:[%s9872_s0 + $0x38] sm:$0xff] }
   0x5   :  { %5743 = vmatpush1.msk.msra.mxu0 %vm69_vm0, %v32_v0  ;;  %5748 = vmatpush1.msk.msra.mxu1 %vm69_vm0, %v33_v2  ;;  %v57_v18 = vcombine.high %v38_v16, %v38_v16  ;;  %v58_v19 = vcombine.high %v39_v17, %v39_v17 }
   0x6   :  { %5744 = vmatmul.mubr.msk.f32.vlgmr.msra.gmra.mrb[0].mxu0 %vm59_vm1, %v6547_v6  ;;  %5749 = vmatmul.mubr.msk.f32.vlgmr.msra.gmra.mrb[0].mxu1 %vm59_vm1, %v6547_v6 }
   0x7   :  { %172 = vmatprep.mubr.f32.mxu0 %v9882_v1  ;;  %255 = vmatprep.mubr.f32.mxu1 %v9882_v1 }
   0x8   :  { %5752 = vmatprep.subr.msk.mxu0 %vm69_vm0, %v53_v8  ;;  %5757 = vmatprep.subr.msk.mxu1 %vm69_vm0, %v54_v9 }
   0x9   :  { %5753 = vmatpush1.msk.msra.mxu0 %vm69_vm0, %v34_v5  ;;  %5758 = vmatpush1.msk.msra.mxu1 %vm69_vm0, %v35_v7 }
   0xa   :  { %5745 = vmatmul.mubr.msk.f32.gmra.mrb[2].mxu0 %vm59_vm1, %v41_v12  ;;  %5750 = vmatmul.mubr.msk.f32.gmra.mrb[2].mxu1 %vm59_vm1, %v41_v12 }
   0xb   :  { %178 = vmatprep.mubr.f32.mxu0 %v9882_v1  ;;  %261 = vmatprep.mubr.f32.mxu1 %v9882_v1 }
   0xc   :  { %5762 = vmatprep.subr.msk.mxu0 %vm69_vm0, %v55_v13  ;;  %5767 = vmatprep.subr.msk.mxu1 %vm69_vm0, %v56_v14 }
   0xe   :  { %5746 = vmatmul.mubr.msk.f32.gmra.mrb[4].mxu0 %vm59_vm1, %v42_v15  ;;  %5751 = vmatmul.mubr.msk.f32.gmra.mrb[4].mxu1 %vm59_vm1, %v42_v15 }
   0xf   :  { %332 = vmatprep.mubr.f32.mxu0 %v9882_v1  ;;  %415 = vmatprep.mubr.f32.mxu1 %v9882_v1 }
  0x12   :  { %5754 = vmatmul.mubr.msk.f32.vlgmr.msra.gmra.mrb[6].mxu0 %vm59_vm1, %v6547_v6  ;;  %5759 = vmatmul.mubr.msk.f32.vlgmr.msra.gmra.mrb[6].mxu1 %vm59_vm1, %v6547_v6 }
  0x13   :  { %338 = vmatprep.mubr.f32.mxu0 %v9882_v1  ;;  %421 = vmatprep.mubr.f32.mxu1 %v9882_v1 }
  0x14   :  { %5763 = vmatpush1.msk.msra.mxu0 %vm69_vm0, %v36_v10  ;;  %5768 = vmatpush1.msk.msra.mxu1 %vm69_vm0, %v37_v11 }
  0x15   :  { %5772 = vmatprep.subr.msk.mxu0 %vm69_vm0, %v57_v18  ;;  %5777 = vmatprep.subr.msk.mxu1 %vm69_vm0, %v58_v19 }
  0x16   :  { %5755 = vmatmul.mubr.msk.f32.gmra.mrb[8].mxu0 %vm59_vm1, %v41_v12  ;;  %5760 = vmatmul.mubr.msk.f32.gmra.mrb[8].mxu1 %vm59_vm1, %v41_v12 }
  0x17   :  { %344 = vmatprep.mubr.f32.mxu0 %v9882_v1  ;;  %427 = vmatprep.mubr.f32.mxu1 %v9882_v1 }
  0x1a   :  { %5756 = vmatmul.mubr.msk.f32.gmra.mrb[10].mxu0 %vm59_vm1, %v42_v15  ;;  %5761 = vmatmul.mubr.msk.f32.gmra.mrb[10].mxu1 %vm59_vm1, %v42_v15 }
  0x1b   :  { %498 = vmatprep.mubr.f32.mxu0 %v9882_v1  ;;  %581 = vmatprep.mubr.f32.mxu1 %v9882_v1 }
  0x1e   :  { %5764 = vmatmul.mubr.msk.f32.vlgmr.msra.gmra.mrb[12].mxu0 %vm59_vm1, %v6547_v6  ;;  %5769 = vmatmul.mubr.msk.f32.vlgmr.msra.gmra.mrb[12].mxu1 %vm59_vm1, %v6547_v6 }
  0x1f   :  { %504 = vmatprep.mubr.f32.mxu0 %v9882_v1  ;;  %587 = vmatprep.mubr.f32.mxu1 %v9882_v1 }
  0x20   :  { %5773 = vmatpush1.msk.msra.mxu0 %vm69_vm0, %v38_v16  ;;  %5778 = vmatpush1.msk.msra.mxu1 %vm69_vm0, %v39_v17 }
  0x22   :  { %5765 = vmatmul.mubr.msk.f32.gmra.mrb[14].mxu0 %vm59_vm1, %v41_v12  ;;  %5770 = vmatmul.mubr.msk.f32.gmra.mrb[14].mxu1 %vm59_vm1, %v41_v12 }
  0x23   :  { %510 = vmatprep.mubr.f32.mxu0 %v9882_v1  ;;  %593 = vmatprep.mubr.f32.mxu1 %v9882_v1 }
  0x26   :  { %5766 = vmatmul.mubr.msk.f32.gmra.mrb[16].mxu0 %vm59_vm1, %v42_v15  ;;  %5771 = vmatmul.mubr.msk.f32.gmra.mrb[16].mxu1 %vm59_vm1, %v42_v15 }
  0x27   :  { %664 = vmatprep.mubr.f32.mxu0 %v9882_v1  ;;  %747 = vmatprep.mubr.f32.mxu1 %v9882_v1 }
  0x2a   :  { %5774 = vmatmul.mubr.msk.f32.vlgmr.msra.gmra.mrb[18].mxu0 %vm59_vm1, %v6547_v6  ;;  %5779 = vmatmul.mubr.msk.f32.vlgmr.msra.gmra.mrb[18].mxu1 %vm59_vm1, %v6547_v6 }
  0x2b   :  { %670 = vmatprep.mubr.f32.mxu0 %v9882_v1  ;;  %753 = vmatprep.mubr.f32.mxu1 %v9882_v1 }
  0x2e   :  { %5775 = vmatmul.mubr.msk.f32.gmra.mrb[20].mxu0 %vm59_vm1, %v41_v12  ;;  %5780 = vmatmul.mubr.msk.f32.gmra.mrb[20].mxu1 %vm59_vm1, %v41_v12 }
  0x2f   :  { %676 = vmatprep.mubr.f32.mxu0 %v9882_v1  ;;  %759 = vmatprep.mubr.f32.mxu1 %v9882_v1 }
  0x32   :  { %5776 = vmatmul.mubr.msk.f32.gmra.mrb[22].mxu0 %vm59_vm1, %v42_v15  ;;  %5781 = vmatmul.mubr.msk.f32.gmra.mrb[22].mxu1 %vm59_vm1, %v42_v15 }
  0x33   :  { %1568 = vmatprep.mubr.f32.mxu0 %v9882_v1  ;;  %1645 = vmatprep.mubr.f32.mxu1 %v9882_v1 }
  0xd9   :  { %v6642_v20 = vpop.f32.mrb[0].mxu0  ;;  %v6644_v21 = vpop.f32.mrb[0].mxu1 }
  0xda   :  { %v6646_v22 = vpop.f32.mrb[1].mxu0  ;;  %v6648_v23 = vpop.f32.mrb[1].mxu1 }
  0xdb   :  { %v772_v24 = vadd.f32 %v6646_v22, %v6642_v20 }
  0xdd   :  { %v773_v25 = vadd.f32 %v772_v24, %v6644_v21  ;;  %v6653_v26 = vpop.f32.mrb[2].mxu0  ;;  %v6655_v27 = vpop.f32.mrb[2].mxu1 }
  0xde   :  { %v6657_v28 = vpop.f32.mrb[3].mxu0  ;;  %v6659_v29 = vpop.f32.mrb[3].mxu1 }
  0xdf   :  { %v774_v30 = vadd.f32 %v773_v25, %v6648_v23  ;;  %v789_v31 = vadd.f32 %v6657_v28, %v6653_v26 }
  0xe1   :  { %v790_v32 = vadd.f32 %v789_v31, %v6655_v27  ;;  %v6665_v33 = vpop.f32.mrb[4].mxu0  ;;  %v6667_v34 = vpop.f32.mrb[4].mxu1 }
  0xe2   :  { %v6669_v35 = vpop.f32.mrb[5].mxu0  ;;  %v6671_v36 = vpop.f32.mrb[5].mxu1 }
  0xe3   :  { %v791_v37 = vadd.f32 %v790_v32, %v6659_v29  ;;  %v806_v38 = vadd.f32 %v6669_v35, %v6665_v33 }
  0xe5   :  { %v807_v39 = vadd.f32 %v806_v38, %v6667_v34  ;;  %v6677_v40 = vpop.f32.mrb[6].mxu0  ;;  %v6679_v41 = vpop.f32.mrb[6].mxu1 }
  0xe6   :  { %v775_v42 = vadd.f32 %v774_v30, %v6677_v40  ;;  %v6682_v43 = vpop.f32.mrb[7].mxu0  ;;  %v6684_v44 = vpop.f32.mrb[7].mxu1 }
  0xe7   :  { %v808_v45 = vadd.f32 %v807_v39, %v6671_v36 }
  0xe8   :  { %v776_v46 = vadd.f32 %v775_v42, %v6682_v43 }
  0xe9   :  { %v6688_v47 = vpop.f32.mrb[8].mxu0  ;;  %v6690_v48 = vpop.f32.mrb[8].mxu1 }
  0xea   :  { %v777_v49 = vadd.f32 %v776_v46, %v6679_v41  ;;  %v792_v50 = vadd.f32 %v791_v37, %v6688_v47  ;;  %v6694_v51 = vpop.f32.mrb[9].mxu0  ;;  %v6696_v52 = vpop.f32.mrb[9].mxu1 }
  0xec   :  { %v778_v53 = vadd.f32 %v777_v49, %v6684_v44  ;;  %v793_v54 = vadd.f32 %v792_v50, %v6694_v51 }
  0xed   :  { %v6700_v55 = vpop.f32.mrb[10].mxu0  ;;  %v6702_v56 = vpop.f32.mrb[10].mxu1 }
  0xee   :  { %v794_v57 = vadd.f32 %v793_v54, %v6690_v48  ;;  %v809_v58 = vadd.f32 %v808_v45, %v6700_v55  ;;  %v6706_v59 = vpop.f32.mrb[11].mxu0  ;;  %v6708_v60 = vpop.f32.mrb[11].mxu1 }
  0xf0   :  { %v795_v61 = vadd.f32 %v794_v57, %v6696_v52  ;;  %v810_v62 = vadd.f32 %v809_v58, %v6706_v59 }
  0xf1   :  { %v6712_v63 = vpop.f32.mrb[12].mxu0  ;;  %v6714_v0 = vpop.f32.mrb[12].mxu1 }
  0xf2   :  { %v811_v2 = vadd.f32 %v810_v62, %v6702_v56  ;;  %v779_v3 = vadd.f32 %v778_v53, %v6712_v63  ;;  %v6718_v4 = vpop.f32.mrb[13].mxu0  ;;  %v6720_v5 = vpop.f32.mrb[13].mxu1 }
  0xf4   :  { %v812_v6 = vadd.f32 %v811_v2, %v6708_v60  ;;  %v780_v7 = vadd.f32 %v779_v3, %v6718_v4 }
  0xf5   :  { %v6724_v8 = vpop.f32.mrb[14].mxu0  ;;  %v6726_v9 = vpop.f32.mrb[14].mxu1 }
  0xf6   :  { %v781_v10 = vadd.f32 %v780_v7, %v6714_v0  ;;  %v796_v11 = vadd.f32 %v795_v61, %v6724_v8  ;;  %v6730_v12 = vpop.f32.mrb[15].mxu0  ;;  %v6732_v13 = vpop.f32.mrb[15].mxu1 }
  0xf8   :  { %v782_v14 = vadd.f32 %v781_v10, %v6720_v5  ;;  %v797_v15 = vadd.f32 %v796_v11, %v6730_v12 }
  0xf9   :  { %v6736_v16 = vpop.f32.mrb[16].mxu0  ;;  %v6738_v17 = vpop.f32.mrb[16].mxu1 }
  0xfa   :  { %v798_v18 = vadd.f32 %v797_v15, %v6726_v9  ;;  %v813_v19 = vadd.f32 %v812_v6, %v6736_v16  ;;  %v6742_v24 = vpop.f32.mrb[17].mxu0  ;;  %v6744_v25 = vpop.f32.mrb[17].mxu1 }
  0xfc   :  { %v799_v30 = vadd.f32 %v798_v18, %v6732_v13  ;;  %v814_v31 = vadd.f32 %v813_v19, %v6742_v24 }
  0xfd   :  { %v6748_v32 = vpop.f32.mrb[18].mxu0  ;;  %v6750_v37 = vpop.f32.mrb[18].mxu1 }
  0xfe   :  { %v815_v38 = vadd.f32 %v814_v31, %v6738_v17  ;;  %v783_v39 = vadd.f32 %v782_v14, %v6748_v32  ;;  %v6754_v42 = vpop.f32.mrb[19].mxu0  ;;  %v6756_v45 = vpop.f32.mrb[19].mxu1 }
 0x100   :  { %v816_v46 = vadd.f32 %v815_v38, %v6744_v25  ;;  %v784_v49 = vadd.f32 %v783_v39, %v6754_v42 }
 0x101   :  { %v6760_v50 = vpop.f32.mrb[20].mxu0  ;;  %v6762_v53 = vpop.f32.mrb[20].mxu1 }
 0x102   :  { %v785_v54 = vadd.f32 %v784_v49, %v6750_v37  ;;  %v800_v57 = vadd.f32 %v799_v30, %v6760_v50  ;;  %v6766_v58 = vpop.f32.mrb[21].mxu0  ;;  %v6768_v61 = vpop.f32.mrb[21].mxu1 }
 0x104   :  { %v801_v62 = vadd.f32 %v800_v57, %v6766_v58  ;;  %v786_v2 = vadd.f32 %v785_v54, %v6756_v45 }
 0x105   :  { %v6772_v3 = vpop.f32.mrb[22].mxu0  ;;  %v6774_v6 = vpop.f32.mrb[22].mxu1 }
 0x106   :  { %v802_v7 = vadd.f32 %v801_v62, %v6762_v53  ;;  %v817_v10 = vadd.f32 %v816_v46, %v6772_v3  ;;  %787 = vadd.xlane.f32.xlu0 %v786_v2  ;;  %v6778_v11 = vpop.f32.mrb[23].mxu0  ;;  %v6780_v14 = vpop.f32.mrb[23].mxu1 }
 0x108   :  { %v818_v15 = vadd.f32 %v817_v10, %v6778_v11  ;;  %v803_v18 = vadd.f32 %v802_v7, %v6768_v61 }
 0x10a   :  { %v819_v19 = vadd.f32 %v818_v15, %v6774_v6  ;;  %804 = vadd.xlane.f32.xlu0 %v803_v18 }
 0x10c   :  { %v820_v30 = vadd.f32 %v819_v19, %v6780_v14 }
 0x10e   :  { %821 = vadd.xlane.f32.xlu1 %v820_v30 }
 0x193   :  { %v788_v31 = vpop.xlane.xlu0 %787 }
 0x194   :  { %v6786_v38 = vmul.f32 0.00048828125, %v788_v31 }
 0x196   :  { %v6790_v39 = vsub.f32 %v6642_v20, %v6786_v38  ;;  %v6794_v46 = vsub.f32 %v6646_v22, %v6786_v38  ;;  %v6798_v54 = vsub.f32 %v6644_v21, %v6786_v38  ;;  %v6808_v20 = vsub.f32 %v6648_v23, %v6786_v38 }
 0x197   :  { %v805_v49 = vpop.xlane.xlu0 %804  ;;  %v6812_v22 = vsub.f32 %v6677_v40, %v6786_v38  ;;  %v6826_v23 = vsub.f32 %v6682_v43, %v6786_v38  ;;  %v6832_v19 = vsub.f32 %v6679_v41, %v6786_v38  ;;  %v6876_v1 = vsub.f32 %v6714_v0, %v6786_v38 }
 0x198   :  { %v874_v57 = vmul.f32 %v6790_v39, %v6790_v39  ;;  %v875_v62 = vmul.f32 %v6794_v46, %v6794_v46  ;;  %v6804_v2 = vmul.f32 0.00048828125, %v805_v49  ;;  %v876_v21 = vmul.f32 %v6798_v54, %v6798_v54 }
 0x199   :  { %v877_v40 = vmul.f32 %v6808_v20, %v6808_v20  ;;  %v879_v41 = vmul.f32 %v6826_v23, %v6826_v23  ;;  %9929 = vst [vmem:[#allocation2_spill] sm:$0xff] %v6876_v1 }
 0x19a   :  { %v922_v7 = vadd.f32 %v875_v62, %v874_v57  ;;  %v6818_v10 = vsub.f32 %v6653_v26, %v6804_v2  ;;  %v6822_v15 = vsub.f32 %v6657_v28, %v6804_v2  ;;  %v878_v26 = vmul.f32 %v6812_v22, %v6812_v22 }
 0x19b   :  { %v822_v31 = vpop.xlane.xlu1 %821  ;;  %v6838_v28 = vsub.f32 %v6655_v27, %v6804_v2  ;;  %v6846_v57 = vsub.f32 %v6684_v44, %v6786_v38  ;;  %v6864_v44 = vsub.f32 %v6688_v47, %v6804_v2  ;;  %v6880_v47 = vsub.f32 %v6694_v51, %v6804_v2 }
 0x19c   :  { %v923_v18 = vadd.f32 %v922_v7, %v876_v21  ;;  %v890_v43 = vmul.f32 %v6818_v10, %v6818_v10  ;;  %v891_v49 = vmul.f32 %v6822_v15, %v6822_v15  ;;  %v6852_v21 = vsub.f32 %v6659_v29, %v6804_v2 }
 0x19d   :  { %v6854_v27 = vmul.f32 0.00048828125, %v822_v31  ;;  %v6858_v7 = vsub.f32 %v6712_v63, %v6786_v38  ;;  %v6870_v29 = vsub.f32 %v6718_v4, %v6786_v38  ;;  %v881_v63 = vmul.f32 %v6846_v57, %v6846_v57 }
 0x19e   :  { %v924_v30 = vadd.f32 %v923_v18, %v877_v40  ;;  %v880_v40 = vmul.f32 %v6832_v19, %v6832_v19  ;;  %v6896_v51 = vsub.f32 %v6720_v5, %v6786_v38 }
 0x19f   :  { %v882_v4 = vmul.f32 %v6858_v7, %v6858_v7  ;;  %v6892_v0 = vsub.f32 %v6669_v35, %v6854_v27  ;;  %v6910_v35 = vsub.f32 %v6754_v42, %v6786_v38  ;;  %v883_v5 = vmul.f32 %v6870_v29, %v6870_v29 }
 0x1a0   :  { %v925_v62 = vadd.f32 %v924_v30, %v878_v26  ;;  %v892_v26 = vmul.f32 %v6838_v28, %v6838_v28  ;;  %v939_v30 = vadd.f32 %v891_v49, %v890_v43  ;;  %v6924_v42 = vsub.f32 %v6667_v34, %v6854_v27 }
 0x1a1   :  { %v6942_v34 = vsub.f32 %v6756_v45, %v6786_v38 }
 0x1a2   :  { %v926_v18 = vadd.f32 %v925_v62, %v879_v41  ;;  %v893_v41 = vmul.f32 %v6852_v21, %v6852_v21  ;;  %v940_v43 = vadd.f32 %v939_v30, %v892_v26  ;;  %v6888_v62 = vsub.f32 %v6665_v33, %v6854_v27 }
 0x1a3   :  { %v6906_v33 = vsub.f32 %v6748_v32, %v6786_v38  ;;  %9932 = vst [vmem:[#allocation5_spill] sm:$0xff] %v6942_v34 }
 0x1a4   :  { %v927_v31 = vadd.f32 %v926_v18, %v880_v40  ;;  %v6900_v40 = vsub.f32 %v6690_v48, %v6804_v2  ;;  %v894_v18 = vmul.f32 %v6864_v44, %v6864_v44  ;;  %v941_v26 = vadd.f32 %v940_v43, %v893_v41 }
 0x1a5   :  { %9930 = vst [vmem:[#allocation3_spill] sm:$0xff] %v6906_v33  ;;  %v884_v48 = vmul.f32 %v6876_v1, %v6876_v1  ;;  %v906_v43 = vmul.f32 %v6888_v62, %v6888_v62  ;;  %v6954_v1 = vsub.f32 %v6730_v12, %v6804_v2  ;;  %v6968_v12 = vsub.f32 %v6726_v9, %v6804_v2 }
 0x1a6   :  { %v928_v49 = vadd.f32 %v927_v31, %v881_v63  ;;  %v6918_v63 = vsub.f32 %v6696_v52, %v6804_v2  ;;  %v895_v31 = vmul.f32 %v6880_v47, %v6880_v47  ;;  %v942_v32 = vadd.f32 %v941_v26, %v894_v18 }
 0x1a7   :  { %v6936_v52 = vsub.f32 %v6724_v8, %v6804_v2  ;;  %v896_v18 = vmul.f32 %v6900_v40, %v6900_v40  ;;  %v886_v8 = vmul.f32 %v6906_v33, %v6906_v33  ;;  %v6982_v9 = vsub.f32 %v6732_v13, %v6804_v2 }
 0x1a8   :  { %v929_v30 = vadd.f32 %v928_v49, %v882_v4  ;;  %v907_v4 = vmul.f32 %v6892_v0, %v6892_v0  ;;  %v6932_v49 = vsub.f32 %v6750_v37, %v6786_v38  ;;  %v943_v26 = vadd.f32 %v942_v32, %v895_v31 }
 0x1a9   :  { %v6948_v37 = vsub.f32 %v6671_v36, %v6854_v27  ;;  %v897_v31 = vmul.f32 %v6918_v63, %v6918_v63  ;;  %v6960_v32 = vsub.f32 %v6700_v55, %v6854_v27  ;;  %v908_v36 = vmul.f32 %v6924_v42, %v6924_v42 }
 0x1aa   :  { %v930_v41 = vadd.f32 %v929_v30, %v883_v5  ;;  %9931 = vst [vmem:[#allocation4_spill] sm:$0xff] %v6932_v49  ;;  %v885_v5 = vmul.f32 %v6896_v51, %v6896_v51  ;;  %v944_v45 = vadd.f32 %v943_v26, %v896_v18  ;;  %v898_v33 = vmul.f32 %v6936_v52, %v6936_v52 }
 0x1ab   :  { %v6974_v55 = vsub.f32 %v6706_v59, %v6854_v27  ;;  %v6988_v59 = vsub.f32 %v6702_v56, %v6854_v27  ;;  %v6996_v13 = vsub.f32 %v6760_v50, %v6804_v2  ;;  %v7002_v56 = vsub.f32 %v6708_v60, %v6854_v27 }
 0x1ac   :  { %v931_v30 = vadd.f32 %v930_v41, %v884_v48  ;;  %v956_v48 = vadd.f32 %v907_v4, %v906_v43  ;;  %v887_v41 = vmul.f32 %v6910_v35, %v6910_v35  ;;  %v945_v18 = vadd.f32 %v944_v45, %v897_v31 }
 0x1ad   :  { %v888_v4 = vmul.f32 %v6932_v49, %v6932_v49  ;;  %v910_v45 = vmul.f32 %v6960_v32, %v6960_v32  ;;  %9933 = vst [vmem:[#allocation6_spill] sm:$0xff] %v6996_v13  ;;  %v901_v50 = vmul.f32 %v6982_v9, %v6982_v9  ;;  %v912_v60 = vmul.f32 %v6988_v59, %v6988_v59 }
 0x1ae   :  { %v932_v38 = vadd.f32 %v931_v30, %v885_v5  ;;  %v909_v5 = vmul.f32 %v6948_v37, %v6948_v37  ;;  %v957_v43 = vadd.f32 %v956_v48, %v908_v36  ;;  %v899_v30 = vmul.f32 %v6954_v1, %v6954_v1 }
 0x1af   :  { %v946_v31 = vadd.f32 %v945_v18, %v898_v33  ;;  %v889_v36 = vmul.f32 %v6942_v34, %v6942_v34  ;;  %v900_v48 = vmul.f32 %v6968_v12, %v6968_v12  ;;  %v911_v18 = vmul.f32 %v6974_v55, %v6974_v55 }
 0x1b0   :  { %v933_v26 = vadd.f32 %v932_v38, %v886_v8  ;;  %v958_v38 = vadd.f32 %v957_v43, %v909_v5  ;;  %v7008_v5 = vsub.f32 %v6766_v58, %v6804_v2  ;;  %v902_v58 = vmul.f32 %v6996_v13, %v6996_v13 }
 0x1b1   :  { %v947_v33 = vadd.f32 %v946_v31, %v899_v30  ;;  %v7020_v31 = vsub.f32 %v6762_v53, %v6804_v2 }
 0x1b2   :  { %v934_v8 = vadd.f32 %v933_v26, %v887_v41  ;;  %v959_v26 = vadd.f32 %v958_v38, %v910_v45  ;;  %v7026_v45 = vsub.f32 %v6742_v24, %v6854_v27  ;;  %v903_v53 = vmul.f32 %v7008_v5, %v7008_v5 }
 0x1b3   :  { %v948_v43 = vadd.f32 %v947_v33, %v900_v48  ;;  %9934 = vst [vmem:[#allocation7_spill] sm:$0xff] %v7020_v31  ;;  %v7038_v33 = vsub.f32 %v6738_v17, %v6854_v27 }
 0x1b4   :  { %v935_v41 = vadd.f32 %v934_v8, %v888_v4  ;;  %v7014_v4 = vsub.f32 %v6736_v16, %v6854_v27  ;;  %v960_v30 = vadd.f32 %v959_v26, %v911_v18  ;;  %v913_v16 = vmul.f32 %v7002_v56, %v7002_v56 }
 0x1b5   :  { %v949_v8 = vadd.f32 %v948_v43, %v901_v50  ;;  %v7054_v43 = vsub.f32 %v6772_v3, %v6854_v27 }
 0x1b6   :  { %v936_v49 = vadd.f32 %v935_v41, %v889_v36  ;;  %v961_v38 = vadd.f32 %v960_v30, %v912_v60  ;;  %v7032_v36 = vsub.f32 %v6768_v61, %v6804_v2  ;;  %v914_v24 = vmul.f32 %v7014_v4, %v7014_v4 }
 0x1b7   :  { %v950_v48 = vadd.f32 %v949_v8, %v902_v58  ;;  %v904_v41 = vmul.f32 %v7020_v31, %v7020_v31  ;;  %v7046_v61 = vsub.f32 %v6744_v25, %v6854_v27  ;;  %v915_v2 = vmul.f32 %v7026_v45, %v7026_v45  ;;  %9936 = vst [vmem:[#allocation9_spill] sm:$0xff] %v7054_v43 }
 0x1b8   :  { %937 = vadd.xlane.f32.xlu1 %v936_v49  ;;  %9935 = vst [vmem:[#allocation8_spill] sm:$0xff] %v7032_v36  ;;  %v962_v49 = vadd.f32 %v961_v38, %v913_v16  ;;  %v905_v17 = vmul.f32 %v7032_v36, %v7032_v36  ;;  %v916_v60 = vmul.f32 %v7038_v33, %v7038_v33 }
 0x1b9   :  { %v951_v18 = vadd.f32 %v950_v48, %v903_v53  ;;  %v7060_v25 = vsub.f32 %v6778_v11, %v6854_v27  ;;  %v917_v8 = vmul.f32 %v7046_v61, %v7046_v61  ;;  %v7066_v38 = vsub.f32 %v6774_v6, %v6854_v27 }
 0x1ba   :  { %v963_v26 = vadd.f32 %v962_v49, %v914_v24  ;;  %v918_v3 = vmul.f32 %v7054_v43, %v7054_v43  ;;  %v7072_v48 = vsub.f32 %v6780_v14, %v6854_v27  ;;  %v769_v14 = vld [vmem:[%s9874_s4] sm:$0xff]  ;;  %v770_v27 = vld [vmem:[%s9874_s4 + $0x8] sm:$0xff] }
 0x1bb   :  { %v952_v50 = vadd.f32 %v951_v18, %v904_v41  ;;  %9937 = vst [vmem:[#allocation10_spill] sm:$0xff] %v7060_v25  ;;  %9938 = vst [vmem:[#allocation11_spill] sm:$0xff] %v7066_v38  ;;  %v919_v11 = vmul.f32 %v7060_v25, %v7060_v25  ;;  %v920_v49 = vmul.f32 %v7066_v38, %v7066_v38 }
 0x1bc   :  { %v964_v30 = vadd.f32 %v963_v26, %v915_v2  ;;  %9939 = vst [vmem:[#allocation12_spill] sm:$0xff] %v7072_v48  ;;  %v921_v6 = vmul.f32 %v7072_v48, %v7072_v48  ;;  %v6481_v26 = vmov 0  }
 0x1bd   :  { %v953_v58 = vadd.f32 %v952_v50, %v905_v17  ;;  %6105 = vset.pattern.permute.xlu1 %v6481_v26  ;;  %6104 = vset.pattern.permute.xlu0 %v6481_v26 }
 0x1be   :  { %v965_v16 = vadd.f32 %v964_v30, %v916_v60 }
 0x1bf   :  { %954 = vadd.xlane.f32.xlu0 %v953_v58 }
 0x1c0   :  { %v966_v53 = vadd.f32 %v965_v16, %v917_v8  ;;  %v766_v16 = vld [vmem:[%s9875_s3] sm:$0xff] }
 0x1c2   :  { %v967_v24 = vadd.f32 %v966_v53, %v918_v3 }
 0x1c4   :  { %v968_v41 = vadd.f32 %v967_v24, %v919_v11 }
 0x1c6   :  { %v969_v18 = vadd.f32 %v968_v41, %v920_v49  ;;  %v767_v49 = vld [vmem:[%s9875_s3 + $0x8] sm:$0xff] }
 0x1c8   :  { %v970_v2 = vadd.f32 %v969_v18, %v921_v6 }
 0x1ca   :  { %971 = vadd.xlane.f32.xlu1 %v970_v2  ;;  %v768_v2 = vld [vmem:[%s9875_s3 + $0x10] sm:$0xff] }
 0x1db   :  { %1050 = vperm.xlu1 %6105, %v769_v14  }
 0x1df   :  { %1055 = vperm.xlu1 %6105, %v770_v27   ;;  %v771_v27 = vld [vmem:[%s9874_s4 + $0x10] sm:$0xff] }
 0x245   :  { %v938_v17 = vpop.xlane.xlu1 %937 }
 0x246   :  { %v973_v50 = vmul.f32 0.00048828125, %v938_v17 }
 0x248   :  { %v976_v60 = vadd.f32 1e-05, %v973_v50 }
 0x24a   :  { %6114 = vrsqrt.f32 %v976_v60 }
 0x24c   :  { %v955_v30 = vpop.xlane.xlu0 %954 }
 0x24d   :  { %v974_v58 = vmul.f32 0.00048828125, %v955_v30 }
 0x24f   :  { %v977_v8 = vadd.f32 1e-05, %v974_v58 }
 0x251   :  { %6116 = vrsqrt.f32 %v977_v8 }
 0x254   :  { %v6115_v3 = vpop.eup %6114 }
 0x255   :  { %v982_v53 = vmul.f32 %v6115_v3, %v766_v16 }
 0x257   :  { %987 = vperm.xlu0 %6104, %v982_v53   ;;  %v972_v11 = vpop.xlane.xlu1 %971 }
 0x258   :  { %v975_v24 = vmul.f32 0.00048828125, %v972_v11 }
 0x25a   :  { %v978_v41 = vadd.f32 1e-05, %v975_v24 }
 0x25b   :  { %v6117_v6 = vpop.eup %6116  ;;  %v7098_v17 = vpop.permute.xlu1 %1050 }
 0x25c   :  { %6118 = vrsqrt.f32 %v978_v41  ;;  %v983_v18 = vmul.f32 %v6117_v6, %v767_v49 }
 0x25e   :  { %992 = vperm.xlu1 %6105, %v983_v18  }
 0x25f   :  { %v7127_v11 = vpop.permute.xlu1 %1055 }
 0x266   :  { %v6119_v26 = vpop.eup %6118 }
 0x267   :  { %v984_v14 = vmul.f32 %v6119_v26, %v768_v2 }
 0x269   :  { %997 = vperm.xlu1 %6105, %v984_v14  }
 0x26d   :  { %1060 = vperm.xlu1 %6105, %v771_v27  }
 0x2d6   :  { %v7100_v50 = vpop.permute.xlu0 %987 }
 0x2d7   :  { %v1001_v60 = vmul.f32 %v7100_v50, %v6794_v46  ;;  %v1003_v30 = vmul.f32 %v7100_v50, %v6808_v20  ;;  %v1000_v58 = vmul.f32 %v7100_v50, %v6790_v39  ;;  %v1002_v8 = vmul.f32 %v7100_v50, %v6798_v54 }
 0x2d8   :  { %v1005_v16 = vmul.f32 %v7100_v50, %v6826_v23 }
 0x2d9   :  { %v7113_v3 = vadd.f32 %v7098_v17, %v1001_v60  ;;  %v7116_v53 = vadd.f32 %v7098_v17, %v1003_v30  ;;  %v7119_v46 = vadd.f32 %v7098_v17, %v1000_v58  ;;  %v7122_v20 = vadd.f32 %v7098_v17, %v1002_v8 }
 0x2da   :  { %v7125_v39 = vadd.f32 %v7098_v17, %v1005_v16  ;;  %v1007_v60 = vmul.f32 %v7100_v50, %v6846_v57 }
 0x2db   :  { %v1160_v54 = vmin.f32 %v7113_v3, 0.0  ;;  %v1162_v23 = vmin.f32 %v7116_v53, 0.0  ;;  %v1159_v24 = vmin.f32 %v7119_v46, 0.0  ;;  %v1161_v49 = vmin.f32 %v7122_v20, 0.0 }
 0x2dc   :  { %v1164_v18 = vmin.f32 %v7125_v39, 0.0  ;;  %vm1112_vm2 = vcmp.gt.f32.partialorder %v7113_v3, 0.0  ;;  %vm1114_vm3 = vcmp.gt.f32.partialorder %v7116_v53, 0.0  ;;  %vm1111_vm4 = vcmp.gt.f32.partialorder %v7119_v46, 0.0 }
 0x2dd   :  { %v1209_v41 = vmul.f32 1.442695, %v1160_v54  ;;  %v1213_v6 = vmul.f32 1.442695, %v1162_v23  ;;  %v1207_v2 = vmul.f32 1.442695, %v1159_v24  ;;  %v7134_v14 = vpop.permute.xlu1 %992 }
 0x2de   :  { %v1211_v26 = vmul.f32 1.442695, %v1161_v49  ;;  %v1217_v27 = vmul.f32 1.442695, %v1164_v18  ;;  %v1017_v30 = vmul.f32 %v7134_v14, %v6822_v15  ;;  %v1019_v58 = vmul.f32 %v7134_v14, %v6852_v21 }
 0x2df   :  { %6120 = vpow2.f32 %v1209_v41  ;;  %v1016_v8 = vmul.f32 %v7134_v14, %v6818_v10  ;;  %v1018_v16 = vmul.f32 %v7134_v14, %v6838_v28  ;;  %v1021_v54 = vmul.f32 %v7134_v14, %v6880_v47 }
 0x2e0   :  { %6122 = vpow2.f32 %v1213_v6  ;;  %v1023_v57 = vmul.f32 %v7134_v14, %v6918_v63  ;;  %v7151_v23 = vadd.f32 %v7127_v11, %v1017_v30  ;;  %v7154_v15 = vadd.f32 %v7127_v11, %v1019_v58 }
 0x2e1   :  { %6124 = vpow2.f32 %v1207_v2  ;;  %v7157_v21 = vadd.f32 %v7127_v11, %v1016_v8  ;;  %v7160_v10 = vadd.f32 %v7127_v11, %v1018_v16  ;;  %v7163_v28 = vadd.f32 %v7127_v11, %v1021_v54 }
 0x2e2   :  { %6126 = vpow2.f32 %v1211_v26  ;;  %v7166_v47 = vadd.f32 %v7098_v17, %v1007_v60  ;;  %v1004_v63 = vmul.f32 %v7100_v50, %v6812_v22  ;;  %v1176_v24 = vmin.f32 %v7151_v23, 0.0 }
 0x2e3   :  { %v1178_v49 = vmin.f32 %v7154_v15, 0.0  ;;  %v7173_v41 = vadd.f32 %v7127_v11, %v1023_v57  ;;  %v1175_v6 = vmin.f32 %v7157_v21, 0.0  ;;  %v1177_v18 = vmin.f32 %v7160_v10, 0.0 }
 0x2e4   :  { %6128 = vpow2.f32 %v1217_v27  ;;  %v1006_v2 = vmul.f32 %v7100_v50, %v6832_v19  ;;  %v1241_v26 = vmul.f32 1.442695, %v1176_v24  ;;  %v1180_v30 = vmin.f32 %v7163_v28, 0.0 }
 0x2e5   :  { %v1245_v60 = vmul.f32 1.442695, %v1178_v49  ;;  %v1239_v22 = vmul.f32 1.442695, %v1175_v6  ;;  %v1243_v58 = vmul.f32 1.442695, %v1177_v18  ;;  %v7182_v16 = vadd.f32 %v7098_v17, %v1004_v63 }
 0x2e6   :  { %v1166_v8 = vmin.f32 %v7166_v47, 0.0  ;;  %6130 = vpow2.f32 %v1241_v26  ;;  %v1182_v54 = vmin.f32 %v7173_v41, 0.0  ;;  %v1249_v27 = vmul.f32 1.442695, %v1180_v30 }
 0x2e7   :  { %6132 = vpow2.f32 %v1245_v60  ;;  %v7187_v19 = vadd.f32 %v7098_v17, %v1006_v2  ;;  %v1163_v38 = vmin.f32 %v7182_v16, 0.0  ;;  %v1020_v48 = vmul.f32 %v7134_v14, %v6864_v44 }
 0x2e8   :  { %v7189_v49 = vpop.permute.xlu1 %997  ;;  %6134 = vpow2.f32 %v1239_v22  ;;  %v1221_v26 = vmul.f32 1.442695, %v1166_v8  ;;  %v1253_v2 = vmul.f32 1.442695, %v1182_v54  ;;  %vm1113_vm5 = vcmp.gt.f32.partialorder %v7122_v20, 0.0 }
 0x2e9   :  { %v6121_v57 = vpop.eup %6120  ;;  %6136 = vpow2.f32 %v1243_v58  ;;  %v1035_v22 = vmul.f32 %v7189_v49, %v6948_v37  ;;  %vm1128_vm6 = vcmp.gt.f32.partialorder %v7151_v23, 0.0  ;;  %vm1130_vm7 = vcmp.gt.f32.partialorder %v7154_v15, 0.0 }
 0x2ea   :  { %v6123_v24 = vpop.eup %6122  ;;  %v5783_v6 = vadd.f32 -1.0, %v6121_v57  ;;  %v1033_v57 = vmul.f32 %v7189_v49, %v6892_v0  ;;  %6138 = vpow2.f32 %v1249_v27  ;;  %v7216_v27 = vmul.f32 1.442695, %v1163_v38 }
 0x2eb   :  { %v6125_v63 = vpop.eup %6124  ;;  %v5785_v18 = vadd.f32 -1.0, %v6123_v24  ;;  %v1032_v24 = vmul.f32 %v7189_v49, %v6888_v62  ;;  %6140 = vpow2.f32 %v1221_v26  ;;  %vm1127_vm8 = vcmp.gt.f32.partialorder %v7157_v21, 0.0 }
 0x2ec   :  { %v6127_v60 = vpop.eup %6126  ;;  %v1352_v30 = vmul.f32 1.6732632, %v5783_v6  ;;  %v5782_v43 = vadd.f32 -1.0, %v6125_v63  ;;  %v7201_v58 = vpop.permute.xlu1 %1060  ;;  %vm1129_vm9 = vcmp.gt.f32.partialorder %v7160_v10, 0.0  ;;  %vm1132_vm10 = vcmp.gt.f32.partialorder %v7163_v28, 0.0 }
 0x2ed   :  { %v1354_v25 = vmul.f32 1.6732632, %v5785_v18  ;;  %v5784_v44 = vadd.f32 -1.0, %v6127_v60  ;;  %v7214_v37 = vadd.f32 %v7201_v58, %v1033_v57  ;;  %v7223_v62 = vadd.f32 %v7201_v58, %v1032_v24 }
 0x2ee   :  { %v1400_v8 = vsel %vm1112_vm2, %v7113_v3, %v1352_v30  ;;  %v1351_v54 = vmul.f32 1.6732632, %v5782_v43  ;;  %v6129_v6 = vpop.eup %6128  ;;  %v7220_v43 = vadd.f32 %v7201_v58, %v1035_v22  ;;  %v7226_v3 = vadd.f32 %v7127_v11, %v1020_v48 }
 0x2ef   :  { %v1402_v0 = vsel %vm1114_vm3, %v7116_v53, %v1354_v25  ;;  %v7230_v25 = vmul.f32 %v7134_v14, %v6900_v40  ;;  %v7232_v53 = vmul.f32 1.050701, %v1400_v8  ;;  %v1192_v63 = vmin.f32 %v7214_v37, 0.0 }
 0x2f0   :  { %v1399_v38 = vsel %vm1111_vm4, %v7119_v46, %v1351_v54  ;;  %v1034_v18 = vmul.f32 %v7189_v49, %v6924_v42  ;;  %v6131_v26 = vpop.eup %6130  ;;  %v7241_v48 = vmul.f32 1.050701, %v1402_v0  ;;  %v1353_v60 = vmul.f32 1.6732632, %v5784_v44 }
 0x2f1   :  { %v1194_v40 = vmin.f32 %v7220_v43, 0.0  ;;  %v5787_v30 = vadd.f32 -1.0, %v6129_v6  ;;  %v6133_v57 = vpop.eup %6132  ;;  %v5799_v22 = vadd.f32 -1.0, %v6131_v26  ;;  %v1273_v8 = vmul.f32 1.442695, %v1192_v63 }
 0x2f2   :  { %v1191_v24 = vmin.f32 %v7223_v62, 0.0  ;;  %v7246_v46 = vadd.f32 %v7201_v58, %v1034_v18  ;;  %v6135_v54 = vpop.eup %6134  ;;  %v5801_v31 = vadd.f32 -1.0, %v6133_v57  ;;  %v7249_v42 = vmul.f32 1.050701, %v1399_v38 }
 0x2f3   :  { %v1277_v0 = vmul.f32 1.442695, %v1194_v40  ;;  %6142 = vpow2.f32 %v1253_v2  ;;  %v6137_v44 = vpop.eup %6136  ;;  %v1368_v13 = vmul.f32 1.6732632, %v5799_v22  ;;  %v5798_v36 = vadd.f32 -1.0, %v6135_v54 }
 0x2f4   :  { %6144 = vpow2.f32 %v1273_v8  ;;  %v1271_v6 = vmul.f32 1.442695, %v1191_v24  ;;  %vm1116_vm11 = vcmp.gt.f32.partialorder %v7125_v39, 0.0  ;;  %v1370_v63 = vmul.f32 1.6732632, %v5801_v31  ;;  %v6139_v34 = vpop.eup %6138 }
 0x2f5   :  { %v5800_v26 = vadd.f32 -1.0, %v6137_v44  ;;  %v1401_v18 = vsel %vm1113_vm5, %v7122_v20, %v1353_v60  ;;  %6146 = vpow2.f32 %v1277_v0  ;;  %v1416_v38 = vsel %vm1128_vm6, %v7151_v23, %v1368_v13  ;;  %v6141_v24 = vpop.eup %6140 }
 0x2f6   :  { %v1367_v2 = vmul.f32 1.6732632, %v5798_v36  ;;  %6148 = vpow2.f32 %v1271_v6  ;;  %v1193_v40 = vmin.f32 %v7246_v46, 0.0  ;;  %v7259_v57 = vmul.f32 1.050701, %v1416_v38 }
 0x2f7   :  { %v1418_v31 = vsel %vm1130_vm7, %v7154_v15, %v1370_v63  ;;  %v1369_v22 = vmul.f32 1.6732632, %v5800_v26  ;;  %v5803_v8 = vadd.f32 -1.0, %v6139_v34  ;;  %v1356_v36 = vmul.f32 1.6732632, %v5787_v30 }
 0x2f8   :  { %9940 = vst [vmem:[#allocation13_spill] sm:$0xff] %v7259_v57  ;;  %v7264_v20 = vmul.f32 1.050701, %v1418_v31  ;;  %v1415_v60 = vsel %vm1127_vm8, %v7157_v21, %v1367_v2  ;;  %v1275_v13 = vmul.f32 1.442695, %v1193_v40  ;;  %v5997_v23 = vpack.c.bf16 %v7259_v57, %v7232_v53 }
 0x2f9   :  { %v7271_v54 = vmul.f32 1.050701, %v1415_v60  ;;  %v1417_v15 = vsel %vm1129_vm9, %v7160_v10, %v1369_v22  ;;  %v1372_v0 = vmul.f32 1.6732632, %v5803_v8  ;;  %vm1134_vm12 = vcmp.gt.f32.partialorder %v7173_v41, 0.0 }
 0x2fa   :  { %9941 = vst [vmem:[#allocation14_spill] sm:$0xff] %v7264_v20  ;;  %v6001_v34 = vpack.c.bf16 %v7264_v20, %v7241_v48  ;;  %v7279_v44 = vmul.f32 1.050701, %v1401_v18  ;;  %v7281_v21 = vmul.f32 1.050701, %v1417_v15  ;;  %vm1144_vm13 = vcmp.gt.f32.partialorder %v7214_v37, 0.0  ;;  %5998 = vmatprep.subr.bf16.mxu0 %v5997_v23 }
 0x2fb   :  { %9942 = vst [vmem:[#allocation15_spill] sm:$0xff] %v7271_v54  ;;  %6150 = vpow2.f32 %v1275_v13  ;;  %vm1118_vm14 = vcmp.gt.f32.partialorder %v7166_v47, 0.0  ;;  %v5999_v30 = vpack.c.bf16 %v7271_v54, %v7249_v42  ;;  %v1420_v10 = vsel %vm1132_vm10, %v7163_v28, %v1372_v0 }
 0x2fc   :  { %9943 = vst [vmem:[#allocation16_spill] sm:$0xff] %v7281_v21  ;;  %v5789_v6 = vadd.f32 -1.0, %v6141_v24  ;;  %v1179_v63 = vmin.f32 %v7226_v3, 0.0  ;;  %6002 = vmatprep.subr.bf16.mxu1 %v6001_v34  ;;  %v6003_v26 = vpack.c.bf16 %v7281_v21, %v7279_v44  ;;  %vm1146_vm15 = vcmp.gt.f32.partialorder %v7220_v43, 0.0 }
 0x2fd   :  { %6152 = vpow2.f32 %v7216_v27  ;;  %v7297_v18 = vadd.f32 %v7127_v11, %v7230_v25  ;;  %v6143_v38 = vpop.eup %6142  ;;  %6000 = vmatpush1.bf16.msra.mxu0 %v5999_v30  ;;  %vm1143_vm1 = vcmp.gt.f32.partialorder %v7223_v62, 0.0  ;;  %v1404_v28 = vsel %vm1116_vm11, %v7125_v39, %v1356_v36 }
 0x2fe   :  { %v1247_v2 = vmul.f32 1.442695, %v1179_v63  ;;  %v1165_v40 = vmin.f32 %v7187_v19, 0.0  ;;  %v6145_v31 = vpop.eup %6144  ;;  %6004 = vmatpush1.bf16.msra.mxu1 %v6003_v26  ;;  %vm1497_vm2 = vcmask 195584   ;;  %v7304_v22 = vmul.f32 1.050701, %v1420_v10 }
 0x2ff   :  { %v5805_v27 = vadd.f32 -1.0, %v6143_v38  ;;  %v1181_v25 = vmin.f32 %v7297_v18, 0.0  ;;  %v1037_v8 = vmul.f32 %v7189_v49, %v6974_v55  ;;  %v6147_v24 = vpop.eup %6146  ;;  %v5815_v60 = vadd.f32 -1.0, %v6145_v31 }
 0x300   :  { %9944 = vst [vmem:[#allocation17_spill] sm:$0xff] %v7304_v22  ;;  %v1358_v13 = vmul.f32 1.6732632, %v5789_v6  ;;  %6154 = vpow2.f32 %v1247_v2  ;;  %v1219_v23 = vmul.f32 1.442695, %v1165_v40  ;;  %v6149_v39 = vpop.eup %6148  ;;  %v5817_v36 = vadd.f32 -1.0, %v6147_v24 }
 0x301   :  { %v7309_v15 = vmul.f32 1.050701, %v1404_v28  ;;  %v1374_v0 = vmul.f32 1.6732632, %v5805_v27  ;;  %v7312_v34 = vadd.f32 %v7201_v58, %v1037_v8  ;;  %v1384_v30 = vmul.f32 1.6732632, %v5815_v60 }
 0x302   :  { %v5814_v10 = vadd.f32 -1.0, %v6149_v39  ;;  %6156 = vpow2.f32 %v1219_v23  ;;  %v1251_v63 = vmul.f32 1.442695, %v1181_v25  ;;  %v1386_v26 = vmul.f32 1.6732632, %v5817_v36  ;;  %v7340_v39 = vld [vmem:[%s9876_s2] sm:$0xff] }
 0x303   :  { %v6005_v55 = vpack.c.bf16 %v7304_v22, %v7309_v15  ;;  %v1422_v6 = vsel %vm1134_vm12, %v7173_v41, %v1374_v0  ;;  %v1196_v38 = vmin.f32 %v7312_v34, 0.0  ;;  %v1432_v28 = vsel %vm1144_vm13, %v7214_v37, %v1384_v30 }
 0x304   :  { %v1383_v2 = vmul.f32 1.6732632, %v5814_v10  ;;  %v1406_v40 = vsel %vm1118_vm14, %v7166_v47, %v1358_v13  ;;  %vm1115_vm3 = vcmp.gt.f32.partialorder %v7182_v16, 0.0  ;;  %6158 = vpow2.f32 %v1251_v63 }
 0x305   :  { %v6151_v31 = vpop.eup %6150  ;;  %v1480_v27 = vmul.f32 1.050701, %v1432_v28  ;;  %v1434_v41 = vsel %vm1146_vm15, %v7220_v43, %v1386_v26  ;;  %v1281_v25 = vmul.f32 1.442695, %v1196_v38  ;;  %v1039_v8 = vmul.f32 %v7189_v49, %v7002_v56 }
 0x306   :  { %v1482_v24 = vmul.f32 1.050701, %v1434_v41  ;;  %v1431_v37 = vsel %vm1143_vm1, %v7223_v62, %v1383_v2  ;;  %v5816_v60 = vadd.f32 -1.0, %v6151_v31  ;;  %v7335_v47 = vmul.f32 1.050701, %v1422_v6 }
 0x307   :  { %v6153_v13 = vpop.eup %6152  ;;  %1508 = vmatprep.subr.mxu0 %v1480_v27  ;;  %v1479_v23 = vmul.f32 1.050701, %v1431_v37  ;;  %6160 = vpow2.f32 %v1281_v25  ;;  %v7343_v43 = vadd.f32 %v7201_v58, %v1039_v8  ;;  %v1036_v56 = vmul.f32 %v7189_v49, %v6960_v32 }
 0x308   :  { %9945 = vst [vmem:[#allocation18_spill] sm:$0xff] %v7335_v47  ;;  %1585 = vmatprep.subr.mxu1 %v1482_v24  ;;  %v1385_v62 = vmul.f32 1.6732632, %v5816_v60  ;;  %v5786_v36 = vadd.f32 -1.0, %v6153_v13  ;;  %vm1117_vm4 = vcmp.gt.f32.partialorder %v7187_v19, 0.0  ;;  %v1038_v0 = vmul.f32 %v7189_v49, %v6988_v59 }
 0x309   :  { %v1009_v30 = vmul.f32 %v7100_v50, %v6870_v29  ;;  %1509 = vmatpush1.msra.mxu0 %v1479_v23  ;;  %vm1145_vm5 = vcmp.gt.f32.partialorder %v7246_v46, 0.0  ;;  %v7353_v10 = vmul.f32 1.050701, %v1406_v40  ;;  %v1198_v63 = vmin.f32 %v7343_v43, 0.0 }
 0x30a   :  { %v7357_v32 = vadd.f32 %v7201_v58, %v1036_v56  ;;  %v6155_v26 = vpop.eup %6154  ;;  %v1433_v6 = vsel %vm1145_vm5, %v7246_v46, %v1385_v62  ;;  %5830 = vmatmul.mubr.msk.f32.vlgmr.msra.gmra.mrb[24].mxu0 %vm1497_vm2, %v7340_v39  ;;  %6006 = vmatprep.subr.bf16.mxu0 %v6005_v55  ;;  %v1355_v59 = vmul.f32 1.6732632, %v5786_v36  ;;  %v7363_v29 = vadd.f32 %v7201_v58, %v1038_v0  ;;  %v7377_v55 = vld [vmem:[%s9876_s2 + $0x8] sm:$0xf] }
 0x30b   :  { %v1025_v38 = vmul.f32 %v7134_v14, %v6954_v1  ;;  %v1481_v28 = vmul.f32 1.050701, %v1433_v6  ;;  %v5802_v2 = vadd.f32 -1.0, %v6155_v26  ;;  %v1285_v40 = vmul.f32 1.442695, %v1198_v63 }
 0x30c   :  { %v9946_v31 = vmov 0.0   ;;  %v7369_v27 = vadd.f32 %v7098_v17, %v1009_v30  ;;  %v6157_v46 = vpop.eup %6156  ;;  %v6009_v41 = vpack.c.bf16 %v7335_v47, %v7353_v10  ;;  %vm1131_vm6 = vcmp.gt.f32.partialorder %v7226_v3, 0.0 }
 0x30d   :  { %1574 = vmatprep.mubr.f32.mxu0 %v9946_v31  ;;  %v1195_v1 = vmin.f32 %v7357_v32, 0.0  ;;  %v1197_v25 = vmin.f32 %v7363_v29, 0.0  ;;  %1586 = vmatpush1.msra.mxu1 %v1481_v28  ;;  %v1371_v8 = vmul.f32 1.6732632, %v5802_v2  ;;  %v1403_v24 = vsel %vm1115_vm3, %v7182_v16, %v1355_v59 }
 0x30e   :  { %v5788_v37 = vadd.f32 -1.0, %v6157_v46  ;;  %6162 = vpow2.f32 %v1285_v40  ;;  %v6159_v60 = vpop.eup %6158  ;;  %5832 = vmatmul.mubr.msk.f32.vlgmr.msra.gmra.mrb[24].mxu1 %vm1497_vm2, %v7340_v39  ;;  %6010 = vmatprep.subr.bf16.mxu1 %v6009_v41  ;;  %vm1133_vm7 = vcmp.gt.f32.partialorder %v7297_v18, 0.0  ;;  %v7388_v56 = vadd.f32 %v7127_v11, %v1025_v38 }
 0x30f   :  { %v1279_v13 = vmul.f32 1.442695, %v1195_v1  ;;  %v1283_v23 = vmul.f32 1.442695, %v1197_v25  ;;  %v1419_v62 = vsel %vm1131_vm6, %v7226_v3, %v1371_v8  ;;  %v5804_v36 = vadd.f32 -1.0, %v6159_v60  ;;  %1651 = vmatprep.mubr.f32.mxu1 %v9946_v31  ;;  %5831 = vmatmul.mubr.msk.f32.gmra.mrb[26].mxu0 %vm1497_vm2, %v7377_v55 }
 0x310   :  { %v1357_v16 = vmul.f32 1.6732632, %v5788_v37  ;;  %v1168_v0 = vmin.f32 %v7369_v27, 0.0  ;;  %v7397_v30 = vmul.f32 1.050701, %v1403_v24  ;;  %v1184_v26 = vmin.f32 %v7388_v56, 0.0  ;;  %1722 = vmatprep.mubr.f32.mxu0 %v9946_v31 }
 0x311   :  { %v7399_v63 = vmul.f32 1.050701, %v1419_v62  ;;  %6164 = vpow2.f32 %v1279_v13  ;;  %v6161_v6 = vpop.eup %6160  ;;  %v1373_v3 = vmul.f32 1.6732632, %v5804_v36  ;;  %v1027_v1 = vmul.f32 %v7134_v14, %v6982_v9 }
 0x312   :  { %v1405_v59 = vsel %vm1117_vm4, %v7187_v19, %v1357_v16  ;;  %6166 = vpow2.f32 %v1283_v23  ;;  %v1225_v38 = vmul.f32 1.442695, %v1168_v0  ;;  %v5819_v40 = vadd.f32 -1.0, %v6161_v6  ;;  %5833 = vmatmul.mubr.msk.f32.gmra.mrb[26].mxu1 %vm1497_vm2, %v7377_v55 }
 0x313   :  { %9947 = vst [vmem:[#allocation19_spill] sm:$0xff] %v7399_v63  ;;  %v6007_v28 = vpack.c.bf16 %v7399_v63, %v7397_v30  ;;  %v7408_v2 = vmul.f32 1.050701, %v1405_v59  ;;  %v1257_v46 = vmul.f32 1.442695, %v1184_v26  ;;  %v1421_v41 = vsel %vm1133_vm7, %v7297_v18, %v1373_v3  ;;  %1799 = vmatprep.mubr.f32.mxu1 %v9946_v31 }
 0x314   :  { %6168 = vpow2.f32 %v1225_v38  ;;  %v1011_v19 = vmul.f32 %v7100_v50, %v6896_v51  ;;  %v7420_v25 = vmul.f32 1.050701, %v1421_v41  ;;  %v1388_v8 = vmul.f32 1.6732632, %v5819_v40 }
 0x315   :  { %6008 = vmatpush1.bf16.msra.mxu0 %v6007_v28  ;;  %6170 = vpow2.f32 %v1257_v46  ;;  %v1008_v24 = vmul.f32 %v7100_v50, %v6858_v7  ;;  %vm1148_vm8 = vcmp.gt.f32.partialorder %v7312_v34, 0.0  ;;  %v7429_v51 = vadd.f32 %v7127_v11, %v1027_v1  ;;  %v9949_v7 = vld [vmem:[#allocation2_spill] sm:$0xff] }
 0x316   :  { %9948 = vst [vmem:[#allocation20_spill] sm:$0xff] %v7420_v25  ;;  %v7426_v18 = vadd.f32 %v7098_v17, %v1011_v19  ;;  %v1024_v9 = vmul.f32 %v7134_v14, %v6936_v52  ;;  %v6011_v37 = vpack.c.bf16 %v7420_v25, %v7408_v2  ;;  %v1436_v60 = vsel %vm1148_vm8, %v7312_v34, %v1388_v8 }
 0x317   :  { %v7437_v13 = vadd.f32 %v7098_v17, %v1008_v24  ;;  %v1010_v23 = vmul.f32 %v7100_v50, %v9949_v7  ;;  %v1484_v36 = vmul.f32 1.050701, %v1436_v60  ;;  %vm1150_vm9 = vcmp.gt.f32.partialorder %v7343_v43, 0.0 }
 0x318   :  { %v6163_v62 = vpop.eup %6162  ;;  %v1170_v16 = vmin.f32 %v7426_v18, 0.0  ;;  %v1026_v52 = vmul.f32 %v7134_v14, %v6968_v12  ;;  %6012 = vmatpush1.bf16.msra.mxu1 %v6011_v37  ;;  %vm1147_vm10 = vcmp.gt.f32.partialorder %v7357_v32, 0.0  ;;  %v1186_v34 = vmin.f32 %v7429_v51, 0.0 }
 0x319   :  { %v5821_v0 = vadd.f32 -1.0, %v6163_v62  ;;  %v7448_v26 = vadd.f32 %v7127_v11, %v1024_v9  ;;  %1662 = vmatprep.subr.mxu0 %v1484_v36  ;;  %vm1149_vm11 = vcmp.gt.f32.partialorder %v7363_v29, 0.0  ;;  %vm1120_vm12 = vcmp.gt.f32.partialorder %v7369_v27, 0.0 }
 0x31a   :  { %v1229_v6 = vmul.f32 1.442695, %v1170_v16  ;;  %v1167_v3 = vmin.f32 %v7437_v13, 0.0  ;;  %v1261_v12 = vmul.f32 1.442695, %v1186_v34  ;;  %v7455_v40 = vadd.f32 %v7098_v17, %v1010_v23 }
 0x31b   :  { %v6165_v59 = vpop.eup %6164  ;;  %v1390_v38 = vmul.f32 1.6732632, %v5821_v0  ;;  %v1183_v28 = vmin.f32 %v7448_v26, 0.0  ;;  %v7458_v1 = vadd.f32 %v7127_v11, %v1026_v52  ;;  %vm1136_vm13 = vcmp.gt.f32.partialorder %v7388_v56, 0.0 }
 0x31c   :  { %v6167_v46 = vpop.eup %6166  ;;  %v5818_v41 = vadd.f32 -1.0, %v6165_v59  ;;  %6172 = vpow2.f32 %v1229_v6  ;;  %v1223_v19 = vmul.f32 1.442695, %v1167_v3  ;;  %v1169_v16 = vmin.f32 %v7455_v40, 0.0 }
 0x31d   :  { %v1438_v8 = vsel %vm1150_vm9, %v7343_v43, %v1390_v38  ;;  %v5820_v24 = vadd.f32 -1.0, %v6167_v46  ;;  %6174 = vpow2.f32 %v1261_v12  ;;  %v1255_v9 = vmul.f32 1.442695, %v1183_v28 }
 0x31e   :  { %v6169_v37 = vpop.eup %6168  ;;  %v1486_v60 = vmul.f32 1.050701, %v1438_v8  ;;  %v1387_v7 = vmul.f32 1.6732632, %v5818_v41  ;;  %6176 = vpow2.f32 %v1223_v19  ;;  %v1185_v0 = vmin.f32 %v7458_v1, 0.0 }
 0x31f   :  { %v6171_v23 = vpop.eup %6170  ;;  %v1389_v62 = vmul.f32 1.6732632, %v5820_v24  ;;  %v5791_v36 = vadd.f32 -1.0, %v6169_v37  ;;  %6178 = vpow2.f32 %v1255_v9  ;;  %v1041_v34 = vmul.f32 %v7189_v49, %v7026_v45 }
 0x320   :  { %1739 = vmatprep.subr.mxu1 %v1486_v60  ;;  %v1435_v43 = vsel %vm1147_vm10, %v7357_v32, %v1387_v7  ;;  %v5807_v52 = vadd.f32 -1.0, %v6171_v23  ;;  %v1227_v38 = vmul.f32 1.442695, %v1169_v16  ;;  %v1259_v46 = vmul.f32 1.442695, %v1185_v0 }
 0x321   :  { %v1483_v6 = vmul.f32 1.050701, %v1435_v43  ;;  %v1437_v3 = vsel %vm1149_vm11, %v7363_v29, %v1389_v62  ;;  %v1360_v59 = vmul.f32 1.6732632, %v5791_v36  ;;  %v7475_v41 = vadd.f32 %v7201_v58, %v1041_v34 }
 0x322   :  { %v1485_v12 = vmul.f32 1.050701, %v1437_v3  ;;  %v1376_v28 = vmul.f32 1.6732632, %v5807_v52  ;;  %6180 = vpow2.f32 %v1227_v38  ;;  %v1043_v45 = vmul.f32 %v7189_v49, %v7046_v61 }
 0x323   :  { %1663 = vmatpush1.msra.mxu0 %v1483_v6  ;;  %v1408_v32 = vsel %vm1120_vm12, %v7369_v27, %v1360_v59  ;;  %v1040_v29 = vmul.f32 %v7189_v49, %v7014_v4  ;;  %vm1122_vm14 = vcmp.gt.f32.partialorder %v7426_v18, 0.0  ;;  %6182 = vpow2.f32 %v1259_v46 }
 0x324   :  { %1740 = vmatpush1.msra.mxu1 %v1485_v12  ;;  %v1424_v19 = vsel %vm1136_vm13, %v7388_v56, %v1376_v28  ;;  %v7487_v8 = vmul.f32 1.050701, %v1408_v32  ;;  %5834 = vmatmul.mubr.msk.f32.vlgmr.msra.gmra.mrb[28].mxu0 %vm1497_vm2, %v7340_v39  ;;  %v1200_v4 = vmin.f32 %v7475_v41, 0.0  ;;  %v7498_v61 = vadd.f32 %v7201_v58, %v1043_v45  ;;  %v9951_v12 = vld [vmem:[#allocation5_spill] sm:$0xff] }
 0x325   :  { %v7492_v27 = vmul.f32 1.050701, %v1424_v19  ;;  %5836 = vmatmul.mubr.msk.f32.vlgmr.msra.gmra.mrb[28].mxu1 %vm1497_vm2, %v7340_v39  ;;  %1728 = vmatprep.mubr.f32.mxu0 %v9946_v31  ;;  %v7502_v56 = vadd.f32 %v7201_v58, %v1040_v29  ;;  %vm1138_vm15 = vcmp.gt.f32.partialorder %v7429_v51, 0.0  ;;  %vm1119_vm1 = vcmp.gt.f32.partialorder %v7437_v13, 0.0 }
 0x326   :  { %v6173_v24 = vpop.eup %6172  ;;  %vm1135_vm3 = vcmp.gt.f32.partialorder %v7448_v26, 0.0  ;;  %1805 = vmatprep.mubr.f32.mxu1 %v9946_v31  ;;  %v1042_v9 = vmul.f32 %v7189_v49, %v7038_v33  ;;  %v1289_v23 = vmul.f32 1.442695, %v1200_v4  ;;  %v1013_v62 = vmul.f32 %v7100_v50, %v6910_v35 }
 0x327   :  { %9950 = vst [vmem:[#allocation2_spill] sm:$0xff] %v7492_v27  ;;  %v6175_v37 = vpop.eup %6174  ;;  %v6013_v60 = vpack.c.bf16 %v7492_v27, %v7487_v8  ;;  %v5793_v7 = vadd.f32 -1.0, %v6173_v24  ;;  %v1202_v43 = vmin.f32 %v7498_v61, 0.0  ;;  %v1199_v52 = vmin.f32 %v7502_v56, 0.0 }
 0x328   :  { %v6177_v36 = vpop.eup %6176  ;;  %v5809_v16 = vadd.f32 -1.0, %v6175_v37  ;;  %5835 = vmatmul.mubr.msk.f32.gmra.mrb[30].mxu0 %vm1497_vm2, %v7377_v55  ;;  %v1029_v33 = vmul.f32 %v7134_v14, %v7008_v5  ;;  %6184 = vpow2.f32 %v1289_v23  ;;  %v7523_v35 = vadd.f32 %v7201_v58, %v1042_v9 }
 0x329   :  { %v6179_v0 = vpop.eup %6178  ;;  %6014 = vmatprep.subr.bf16.mxu0 %v6013_v60  ;;  %v1362_v34 = vmul.f32 1.6732632, %v5793_v7  ;;  %v5790_v6 = vadd.f32 -1.0, %v6177_v36  ;;  %5837 = vmatmul.mubr.msk.f32.gmra.mrb[30].mxu1 %vm1497_vm2, %v7377_v55  ;;  %v1293_v38 = vmul.f32 1.442695, %v1202_v43  ;;  %v1015_v28 = vmul.f32 %v7100_v50, %v9951_v12 }
 0x32a   :  { %v1378_v3 = vmul.f32 1.6732632, %v5809_v16  ;;  %v5806_v59 = vadd.f32 -1.0, %v6179_v0  ;;  %1876 = vmatprep.mubr.f32.mxu0 %v9946_v31  ;;  %1953 = vmatprep.mubr.f32.mxu1 %v9946_v31  ;;  %v1287_v32 = vmul.f32 1.442695, %v1199_v52  ;;  %v7533_v45 = vadd.f32 %v7098_v17, %v1013_v62 }
 0x32b   :  { %v1410_v5 = vsel %vm1122_vm14, %v7426_v18, %v1362_v34  ;;  %v1359_v46 = vmul.f32 1.6732632, %v5790_v6  ;;  %6186 = vpow2.f32 %v1293_v38  ;;  %v1201_v37 = vmin.f32 %v7523_v35, 0.0 }
 0x32c   :  { %v1426_v29 = vsel %vm1138_vm15, %v7429_v51, %v1378_v3  ;;  %v7538_v19 = vmul.f32 1.050701, %v1410_v5  ;;  %v1375_v4 = vmul.f32 1.6732632, %v5806_v59  ;;  %v6181_v24 = vpop.eup %6180  ;;  %6188 = vpow2.f32 %v1287_v32  ;;  %v9954_v59 = vld [vmem:[#allocation8_spill] sm:$0xff] }
 0x32d   :  { %v7540_v9 = vmul.f32 1.050701, %v1426_v29  ;;  %v1407_v18 = vsel %vm1119_vm1, %v7437_v13, %v1359_v46  ;;  %v6183_v60 = vpop.eup %6182  ;;  %v5792_v23 = vadd.f32 -1.0, %v6181_v24  ;;  %v7552_v62 = vadd.f32 %v7127_v11, %v1029_v33 }
 0x32e   :  { %v1423_v7 = vsel %vm1135_vm3, %v7448_v26, %v1375_v4  ;;  %v7549_v51 = vmul.f32 1.050701, %v1407_v18  ;;  %v5808_v13 = vadd.f32 -1.0, %v6183_v60  ;;  %v1291_v43 = vmul.f32 1.442695, %v1201_v37  ;;  %v9955_v4 = vld [vmem:[#allocation3_spill] sm:$0xff] }
 0x32f   :  { %9952 = vst [vmem:[#allocation5_spill] sm:$0xff] %v7540_v9  ;;  %v6017_v36 = vpack.c.bf16 %v7540_v9, %v7538_v19  ;;  %v7556_v16 = vmul.f32 1.050701, %v1423_v7  ;;  %vm1121_vm4 = vcmp.gt.f32.partialorder %v7455_v40, 0.0  ;;  %vm1137_vm5 = vcmp.gt.f32.partialorder %v7458_v1, 0.0  ;;  %v9957_v60 = vld [vmem:[#allocation6_spill] sm:$0xff] }
 0x330   :  { %v1361_v52 = vmul.f32 1.6732632, %v5792_v23  ;;  %v1172_v26 = vmin.f32 %v7533_v45, 0.0  ;;  %v1377_v33 = vmul.f32 1.6732632, %v5808_v13  ;;  %6190 = vpow2.f32 %v1291_v43 }
 0x331   :  { %9953 = vst [vmem:[#allocation21_spill] sm:$0xff] %v7556_v16  ;;  %6018 = vmatprep.subr.bf16.mxu1 %v6017_v36  ;;  %v6015_v0 = vpack.c.bf16 %v7556_v16, %v7549_v51  ;;  %v1188_v34 = vmin.f32 %v7552_v62, 0.0  ;;  %v1031_v38 = vmul.f32 %v7134_v14, %v9954_v59  ;;  %v7568_v12 = vadd.f32 %v7098_v17, %v1015_v28  ;;  %v9958_v59 = vld [vmem:[#allocation4_spill] sm:$0xff] }
 0x332   :  { %v1409_v6 = vsel %vm1121_vm4, %v7455_v40, %v1361_v52  ;;  %v1233_v3 = vmul.f32 1.442695, %v1172_v26  ;;  %v6185_v5 = vpop.eup %6184  ;;  %v1425_v46 = vsel %vm1137_vm5, %v7458_v1, %v1377_v33  ;;  %v1012_v24 = vmul.f32 %v7100_v50, %v9955_v4 }
 0x333   :  { %6016 = vmatpush1.bf16.msra.mxu0 %v6015_v0  ;;  %v7571_v32 = vmul.f32 1.050701, %v1409_v6  ;;  %v1265_v29 = vmul.f32 1.442695, %v1188_v34  ;;  %v7575_v18 = vmul.f32 1.050701, %v1425_v46  ;;  %v7578_v37 = vadd.f32 %v7127_v11, %v1031_v38 }
 0x334   :  { %v5823_v40 = vadd.f32 -1.0, %v6185_v5  ;;  %6192 = vpow2.f32 %v1233_v3  ;;  %v1174_v28 = vmin.f32 %v7568_v12, 0.0  ;;  %v1028_v7 = vmul.f32 %v7134_v14, %v9957_v60 }
 0x335   :  { %9956 = vst [vmem:[#allocation8_spill] sm:$0xff] %v7575_v18  ;;  %6194 = vpow2.f32 %v1265_v29  ;;  %v6187_v1 = vpop.eup %6186  ;;  %v6019_v23 = vpack.c.bf16 %v7575_v18, %v7571_v32  ;;  %vm1152_vm6 = vcmp.gt.f32.partialorder %v7475_v41, 0.0  ;;  %v1190_v13 = vmin.f32 %v7578_v37, 0.0 }
 0x336   :  { %v1392_v36 = vmul.f32 1.6732632, %v5823_v40  ;;  %v6189_v43 = vpop.eup %6188  ;;  %v5825_v52 = vadd.f32 -1.0, %v6187_v1  ;;  %v1237_v26 = vmul.f32 1.442695, %v1174_v28  ;;  %v7588_v0 = vadd.f32 %v7098_v17, %v1012_v24  ;;  %v9959_v28 = vld [vmem:[#allocation7_spill] sm:$0xff] }
 0x337   :  { %v7591_v33 = vadd.f32 %v7127_v11, %v1028_v7  ;;  %6020 = vmatpush1.bf16.msra.mxu1 %v6019_v23  ;;  %v5822_v6 = vadd.f32 -1.0, %v6189_v43  ;;  %v1269_v3 = vmul.f32 1.442695, %v1190_v13  ;;  %v1014_v38 = vmul.f32 %v7100_v50, %v9958_v59 }
 0x338   :  { %v1440_v34 = vsel %vm1152_vm6, %v7475_v41, %v1392_v36  ;;  %vm1154_vm7 = vcmp.gt.f32.partialorder %v7498_v61, 0.0  ;;  %v1394_v46 = vmul.f32 1.6732632, %v5825_v52  ;;  %6196 = vpow2.f32 %v1237_v26 }
 0x339   :  { %v1488_v5 = vmul.f32 1.050701, %v1440_v34  ;;  %vm1151_vm8 = vcmp.gt.f32.partialorder %v7502_v56, 0.0  ;;  %v1391_v29 = vmul.f32 1.6732632, %v5822_v6  ;;  %6198 = vpow2.f32 %v1269_v3 }
 0x33a   :  { %v1171_v4 = vmin.f32 %v7588_v0, 0.0  ;;  %v6191_v24 = vpop.eup %6190  ;;  %v1442_v41 = vsel %vm1154_vm7, %v7498_v61, %v1394_v46  ;;  %v1187_v40 = vmin.f32 %v7591_v33, 0.0  ;;  %v1030_v50 = vmul.f32 %v7134_v14, %v9959_v28  ;;  %v9960_v14 = vld [vmem:[#allocation10_spill] sm:$0xff] }
 0x33b   :  { %1816 = vmatprep.subr.mxu0 %v1488_v5  ;;  %v7604_v60 = vadd.f32 %v7098_v17, %v1014_v38  ;;  %v1490_v7 = vmul.f32 1.050701, %v1442_v41  ;;  %v1439_v1 = vsel %vm1151_vm8, %v7502_v56, %v1391_v29  ;;  %v5824_v23 = vadd.f32 -1.0, %v6191_v24  ;;  %v9961_v24 = vld [vmem:[#allocation12_spill] sm:$0xff] }
 0x33c   :  { %v1231_v36 = vmul.f32 1.442695, %v1171_v4  ;;  %v1487_v13 = vmul.f32 1.050701, %v1439_v1  ;;  %v1263_v43 = vmul.f32 1.442695, %v1187_v40  ;;  %v7608_v52 = vadd.f32 %v7127_v11, %v1030_v50 }
 0x33d   :  { %1893 = vmatprep.subr.mxu1 %v1490_v7  ;;  %v1393_v61 = vmul.f32 1.6732632, %v5824_v23  ;;  %v1173_v34 = vmin.f32 %v7604_v60, 0.0  ;;  %v1045_v17 = vmul.f32 %v7189_v49, %v9960_v14  ;;  %vm1153_vm9 = vcmp.gt.f32.partialorder %v7523_v35, 0.0 }
 0x33e   :  { %v6193_v26 = vpop.eup %6192  ;;  %6200 = vpow2.f32 %v1231_v36  ;;  %1817 = vmatpush1.msra.mxu0 %v1487_v13  ;;  %v1189_v3 = vmin.f32 %v7608_v52, 0.0  ;;  %v1047_v41 = vmul.f32 %v7189_v49, %v9961_v24  ;;  %vm1124_vm10 = vcmp.gt.f32.partialorder %v7533_v45, 0.0 }
 0x33f   :  { %v6195_v6 = vpop.eup %6194  ;;  %v5795_v56 = vadd.f32 -1.0, %v6193_v26  ;;  %6202 = vpow2.f32 %v1263_v43  ;;  %v1441_v11 = vsel %vm1153_vm9, %v7523_v35, %v1393_v61  ;;  %5838 = vmatmul.mubr.msk.f32.vlgmr.msra.gmra.mrb[32].mxu0 %vm1497_vm2, %v7340_v39  ;;  %v1235_v38 = vmul.f32 1.442695, %v1173_v34  ;;  %v9962_v43 = vld [vmem:[#allocation9_spill] sm:$0xff] }
 0x340   :  { %v5811_v59 = vadd.f32 -1.0, %v6195_v6  ;;  %v7619_v5 = vadd.f32 %v7201_v58, %v1045_v17  ;;  %v1489_v46 = vmul.f32 1.050701, %v1441_v11  ;;  %v1267_v4 = vmul.f32 1.442695, %v1189_v3  ;;  %1882 = vmatprep.mubr.f32.mxu0 %v9946_v31  ;;  %v9965_v6 = vld [vmem:[#allocation11_spill] sm:$0xff] }
 0x341   :  { %v1364_v29 = vmul.f32 1.6732632, %v5795_v56  ;;  %6204 = vpow2.f32 %v1235_v38  ;;  %vm1140_vm11 = vcmp.gt.f32.partialorder %v7552_v62, 0.0  ;;  %v7629_v7 = vadd.f32 %v7201_v58, %v1047_v41 }
 0x342   :  { %v1380_v40 = vmul.f32 1.6732632, %v5811_v59  ;;  %v1204_v35 = vmin.f32 %v7619_v5, 0.0  ;;  %v6197_v28 = vpop.eup %6196  ;;  %1894 = vmatpush1.msra.mxu1 %v1489_v46  ;;  %6206 = vpow2.f32 %v1267_v4  ;;  %v1044_v26 = vmul.f32 %v7189_v49, %v9962_v43 }
 0x343   :  { %v1412_v50 = vsel %vm1124_vm10, %v7533_v45, %v1364_v29  ;;  %v6199_v1 = vpop.eup %6198  ;;  %v5797_v36 = vadd.f32 -1.0, %v6197_v28  ;;  %5840 = vmatmul.mubr.msk.f32.vlgmr.msra.gmra.mrb[32].mxu1 %vm1497_vm2, %v7340_v39  ;;  %5839 = vmatmul.mubr.msk.f32.gmra.mrb[34].mxu0 %vm1497_vm2, %v7377_v55  ;;  %v1206_v14 = vmin.f32 %v7629_v7, 0.0  ;;  %v1046_v56 = vmul.f32 %v7189_v49, %v9965_v6 }
 0x344   :  { %v1428_v23 = vsel %vm1140_vm11, %v7552_v62, %v1380_v40  ;;  %v1297_v13 = vmul.f32 1.442695, %v1204_v35  ;;  %v7638_v61 = vmul.f32 1.050701, %v1412_v50  ;;  %v5813_v34 = vadd.f32 -1.0, %v6199_v1  ;;  %1959 = vmatprep.mubr.f32.mxu1 %v9946_v31  ;;  %2030 = vmatprep.mubr.f32.mxu0 %v9946_v31 }
 0x345   :  { %v7640_v45 = vmul.f32 1.050701, %v1428_v23  ;;  %v1366_v62 = vmul.f32 1.6732632, %v5797_v36  ;;  %v7646_v17 = vadd.f32 %v7201_v58, %v1044_v26  ;;  %vm1126_vm12 = vcmp.gt.f32.partialorder %v7568_v12, 0.0 }
 0x346   :  { %9963 = vst [vmem:[#allocation3_spill] sm:$0xff] %v7638_v61  ;;  %6208 = vpow2.f32 %v1297_v13  ;;  %v1382_v11 = vmul.f32 1.6732632, %v5813_v34  ;;  %v1301_v59 = vmul.f32 1.442695, %v1206_v14  ;;  %vm1142_vm13 = vcmp.gt.f32.partialorder %v7578_v37, 0.0 }
 0x347   :  { %9964 = vst [vmem:[#allocation6_spill] sm:$0xff] %v7640_v45  ;;  %v6021_v3 = vpack.c.bf16 %v7640_v45, %v7638_v61  ;;  %v1414_v46 = vsel %vm1126_vm12, %v7568_v12, %v1366_v62  ;;  %v1203_v29 = vmin.f32 %v7646_v17, 0.0  ;;  %v7657_v4 = vadd.f32 %v7201_v58, %v1046_v56  ;;  %5841 = vmatmul.mubr.msk.f32.gmra.mrb[34].mxu1 %vm1497_vm2, %v7377_v55 }
 0x348   :  { %v6201_v38 = vpop.eup %6200  ;;  %v1430_v24 = vsel %vm1142_vm13, %v7578_v37, %v1382_v11  ;;  %v7662_v41 = vmul.f32 1.050701, %v1414_v46  ;;  %6210 = vpow2.f32 %v1301_v59  ;;  %2107 = vmatprep.mubr.f32.mxu1 %v9946_v31  ;;  %vm1123_vm14 = vcmp.gt.f32.partialorder %v7588_v0, 0.0 }
 0x349   :  { %v6203_v49 = vpop.eup %6202  ;;  %6022 = vmatprep.subr.bf16.mxu0 %v6021_v3  ;;  %v5794_v40 = vadd.f32 -1.0, %v6201_v38  ;;  %v7665_v35 = vmul.f32 1.050701, %v1430_v24  ;;  %v1295_v28 = vmul.f32 1.442695, %v1203_v29  ;;  %v1205_v58 = vmin.f32 %v7657_v4, 0.0 }
 0x34a   :  { %9966 = vst [vmem:[#allocation4_spill] sm:$0xff] %v7662_v41  ;;  %v5810_v12 = vadd.f32 -1.0, %v6203_v49  ;;  %vm1139_vm15 = vcmp.gt.f32.partialorder %v7591_v33, 0.0  ;;  %vm1125_vm1 = vcmp.gt.f32.partialorder %v7604_v60, 0.0  ;;  %vm1141_vm3 = vcmp.gt.f32.partialorder %v7608_v52, 0.0 }
 0x34b   :  { %9967 = vst [vmem:[#allocation7_spill] sm:$0xff] %v7665_v35  ;;  %v1363_v50 = vmul.f32 1.6732632, %v5794_v40  ;;  %v6205_v1 = vpop.eup %6204  ;;  %v6025_v23 = vpack.c.bf16 %v7665_v35, %v7662_v41  ;;  %6212 = vpow2.f32 %v1295_v28  ;;  %v1299_v26 = vmul.f32 1.442695, %v1205_v58 }
 0x34c   :  { %v1379_v37 = vmul.f32 1.6732632, %v5810_v12  ;;  %v6207_v36 = vpop.eup %6206  ;;  %v5796_v43 = vadd.f32 -1.0, %v6205_v1  ;;  %vm1156_vm4 = vcmp.gt.f32.partialorder %v7619_v5, 0.0  ;;  %vm1158_vm5 = vcmp.gt.f32.partialorder %v7629_v7, 0.0 }
 0x34d   :  { %v1411_v13 = vsel %vm1123_vm14, %v7588_v0, %v1363_v50  ;;  %6026 = vmatprep.subr.bf16.mxu1 %v6025_v23  ;;  %v5812_v14 = vadd.f32 -1.0, %v6207_v36  ;;  %6214 = vpow2.f32 %v1299_v26  ;;  %vm1155_vm6 = vcmp.gt.f32.partialorder %v7646_v17, 0.0 }
 0x34e   :  { %v1427_v34 = vsel %vm1139_vm15, %v7591_v33, %v1379_v37  ;;  %v7674_v62 = vmul.f32 1.050701, %v1411_v13  ;;  %v1365_v56 = vmul.f32 1.6732632, %v5796_v43  ;;  %vm1157_vm7 = vcmp.gt.f32.partialorder %v7657_v4, 0.0 }
 0x34f   :  { %v7676_v6 = vmul.f32 1.050701, %v1427_v34  ;;  %v1381_v11 = vmul.f32 1.6732632, %v5812_v14 }
 0x350   :  { %v6209_v3 = vpop.eup %6208  ;;  %v1413_v0 = vsel %vm1125_vm1, %v7604_v60, %v1365_v56 }
 0x351   :  { %9968 = vst [vmem:[#allocation10_spill] sm:$0xff] %v7676_v6  ;;  %v6023_v59 = vpack.c.bf16 %v7676_v6, %v7674_v62  ;;  %v5827_v38 = vadd.f32 -1.0, %v6209_v3  ;;  %v1429_v33 = vsel %vm1141_vm3, %v7608_v52, %v1381_v11  ;;  %v7684_v29 = vmul.f32 1.050701, %v1413_v0 }
 0x352   :  { %v6211_v46 = vpop.eup %6210  ;;  %v7686_v49 = vmul.f32 1.050701, %v1429_v33 }
 0x353   :  { %6024 = vmatpush1.bf16.msra.mxu0 %v6023_v59  ;;  %9969 = vst [vmem:[#allocation12_spill] sm:$0xff] %v7684_v29  ;;  %v1396_v24 = vmul.f32 1.6732632, %v5827_v38  ;;  %v5829_v40 = vadd.f32 -1.0, %v6211_v46 }
 0x354   :  { %9970 = vst [vmem:[#allocation9_spill] sm:$0xff] %v7686_v49  ;;  %v6027_v12 = vpack.c.bf16 %v7686_v49, %v7684_v29 }
 0x355   :  { %v1444_v28 = vsel %vm1156_vm4, %v7619_v5, %v1396_v24  ;;  %v6213_v50 = vpop.eup %6212  ;;  %v1398_v58 = vmul.f32 1.6732632, %v5829_v40 }
 0x356   :  { %v1492_v60 = vmul.f32 1.050701, %v1444_v28  ;;  %6028 = vmatpush1.bf16.msra.mxu1 %v6027_v12  ;;  %v5826_v52 = vadd.f32 -1.0, %v6213_v50 }
 0x357   :  { %v1446_v1 = vsel %vm1158_vm5, %v7629_v7, %v1398_v58  ;;  %v6215_v23 = vpop.eup %6214 }
 0x358   :  { %1970 = vmatprep.subr.mxu0 %v1492_v60  ;;  %v1494_v37 = vmul.f32 1.050701, %v1446_v1  ;;  %v1395_v36 = vmul.f32 1.6732632, %v5826_v52  ;;  %v5828_v13 = vadd.f32 -1.0, %v6215_v23 }
 0x35a   :  { %2047 = vmatprep.subr.mxu1 %v1494_v37  ;;  %v1443_v43 = vsel %vm1155_vm6, %v7646_v17, %v1395_v36  ;;  %v1397_v26 = vmul.f32 1.6732632, %v5828_v13 }
 0x35b   :  { %v1491_v5 = vmul.f32 1.050701, %v1443_v43 }
 0x35c   :  { %v1445_v34 = vsel %vm1157_vm7, %v7657_v4, %v1397_v26 }
 0x35d   :  { %1971 = vmatpush1.msra.mxu0 %v1491_v5  ;;  %v1493_v14 = vmul.f32 1.050701, %v1445_v34 }
 0x35e   :  { %5842 = vmatmul.mubr.msk.f32.vlgmr.msra.gmra.mrb[36].mxu0 %vm1497_vm2, %v7340_v39 }
 0x35f   :  { %2036 = vmatprep.mubr.f32.mxu0 %v9946_v31  ;;  %2048 = vmatpush1.msra.mxu1 %v1493_v14 }
 0x360   :  { %5844 = vmatmul.mubr.msk.f32.vlgmr.msra.gmra.mrb[36].mxu1 %vm1497_vm2, %v7340_v39 }
 0x361   :  { %2113 = vmatprep.mubr.f32.mxu1 %v9946_v31 }
 0x362   :  { %5843 = vmatmul.mubr.msk.f32.gmra.mrb[38].mxu0 %vm1497_vm2, %v7377_v55 }
 0x363   :  { %3362 = vmatprep.mubr.f32.mxu0 %v9946_v31 }
 0x364   :  { %5845 = vmatmul.mubr.msk.f32.gmra.mrb[38].mxu1 %vm1497_vm2, %v7377_v55 }
 0x365   :  { %3433 = vmatprep.mubr.f32.mxu1 %v9946_v31 }
 0x3dd   :  { %v7710_v7 = vpop.f32.mrb[24].mxu0 }
 0x3de   :  { %v7712_v17 = vpop.f32.mrb[25].mxu0 }
 0x3df   :  { %v2124_v4 = vadd.f32 %v7712_v17, %v7710_v7 }
 0x3e1   :  { %v7716_v39 = vpop.f32.mrb[24].mxu1 }
 0x3e2   :  { %v2125_v56 = vadd.f32 %v2124_v4, %v7716_v39  ;;  %v7719_v3 = vpop.f32.mrb[26].mxu0  ;;  %v7721_v11 = vpop.f32.mrb[25].mxu1 }
 0x3e3   :  { %v2141_v55 = vsel %vm69_vm0, %v7719_v3, 0.0  ;;  %v7725_v59 = vpop.f32.mrb[27].mxu0 }
 0x3e4   :  { %v2126_v0 = vadd.f32 %v2125_v56, %v7721_v11  ;;  %v2142_v38 = vsel %vm69_vm0, %v7725_v59, 0.0 }
 0x3e5   :  { %v2143_v33 = vadd.f32 %v2142_v38, %v2141_v55  ;;  %v7730_v46 = vpop.f32.mrb[26].mxu1 }
 0x3e6   :  { %v2144_v24 = vsel %vm69_vm0, %v7730_v46, 0.0  ;;  %v7734_v40 = vpop.f32.mrb[27].mxu1 }
 0x3e7   :  { %v2145_v12 = vadd.f32 %v2144_v24, %v2143_v33  ;;  %v2146_v28 = vsel %vm69_vm0, %v7734_v40, 0.0 }
 0x3e9   :  { %v2147_v50 = vadd.f32 %v2146_v28, %v2145_v12 }
 0x3f7   :  { %v7738_v60 = vpop.f32.mrb[28].mxu0 }
 0x3f8   :  { %v2127_v58 = vadd.f32 %v2126_v0, %v7738_v60  ;;  %v7741_v52 = vpop.f32.mrb[29].mxu0  ;;  %v7743_v1 = vpop.f32.mrb[28].mxu1 }
 0x3f9   :  { %v7745_v23 = vpop.f32.mrb[29].mxu1 }
 0x3fa   :  { %v2128_v37 = vadd.f32 %v2127_v58, %v7741_v52 }
 0x3fb   :  { %v7748_v36 = vpop.f32.mrb[30].mxu0 }
 0x3fc   :  { %v2129_v13 = vadd.f32 %v2128_v37, %v7743_v1  ;;  %v2148_v43 = vsel %vm69_vm0, %v7748_v36, 0.0  ;;  %v7753_v5 = vpop.f32.mrb[31].mxu0  ;;  %v7755_v26 = vpop.f32.mrb[30].mxu1 }
 0x3fd   :  { %v2149_v34 = vadd.f32 %v2148_v43, %v2147_v50  ;;  %v2150_v14 = vsel %vm69_vm0, %v7753_v5, 0.0  ;;  %v7759_v4 = vpop.f32.mrb[31].mxu1  ;;  %v2152_v55 = vsel %vm69_vm0, %v7755_v26, 0.0 }
 0x3fe   :  { %v2130_v56 = vadd.f32 %v2129_v13, %v7745_v23  ;;  %v2154_v33 = vsel %vm69_vm0, %v7759_v4, 0.0 }
 0x3ff   :  { %v2151_v0 = vadd.f32 %v2150_v14, %v2149_v34 }
 0x401   :  { %v2153_v38 = vadd.f32 %v2152_v55, %v2151_v0 }
 0x403   :  { %v2155_v24 = vadd.f32 %v2154_v33, %v2153_v38 }
 0x412   :  { %v7766_v12 = vpop.f32.mrb[32].mxu0 }
 0x413   :  { %v2131_v28 = vadd.f32 %v2130_v56, %v7766_v12  ;;  %v7769_v50 = vpop.f32.mrb[33].mxu0 }
 0x415   :  { %v2132_v58 = vadd.f32 %v2131_v28, %v7769_v50 }
 0x416   :  { %v7772_v37 = vpop.f32.mrb[32].mxu1  ;;  %v7774_v13 = vpop.f32.mrb[34].mxu0 }
 0x417   :  { %v2133_v43 = vadd.f32 %v2132_v58, %v7772_v37  ;;  %v2156_v34 = vsel %vm69_vm0, %v7774_v13, 0.0  ;;  %v7779_v14 = vpop.f32.mrb[33].mxu1  ;;  %v7781_v55 = vpop.f32.mrb[35].mxu0 }
 0x418   :  { %v2157_v0 = vadd.f32 %v2156_v34, %v2155_v24  ;;  %v2158_v56 = vsel %vm69_vm0, %v7781_v55, 0.0 }
 0x419   :  { %v2134_v38 = vadd.f32 %v2133_v43, %v7779_v14 }
 0x41a   :  { %v2159_v33 = vadd.f32 %v2158_v56, %v2157_v0  ;;  %v7786_v28 = vpop.f32.mrb[34].mxu1 }
 0x41b   :  { %v2160_v31 = vsel %vm69_vm0, %v7786_v28, 0.0  ;;  %v7790_v58 = vpop.f32.mrb[35].mxu1 }
 0x41c   :  { %v2161_v35 = vadd.f32 %v2160_v31, %v2159_v33  ;;  %v2162_v49 = vsel %vm69_vm0, %v7790_v58, 0.0 }
 0x41e   :  { %v2163_v45 = vadd.f32 %v2162_v49, %v2161_v35 }
 0x431   :  { %v7794_v6 = vpop.f32.mrb[36].mxu0 }
 0x432   :  { %v2135_v24 = vadd.f32 %v2134_v38, %v7794_v6  ;;  %v7797_v34 = vpop.f32.mrb[37].mxu0 }
 0x433   :  { %v7800_v0 = vpop.f32.mrb[36].mxu1 }
 0x434   :  { %v2136_v43 = vadd.f32 %v2135_v24, %v7797_v34  ;;  %v7804_v9 = vpop.f32.mrb[37].mxu1 }
 0x435   :  { %v7802_v56 = vpop.f32.mrb[38].mxu0 }
 0x436   :  { %v2137_v31 = vadd.f32 %v2136_v43, %v7800_v0  ;;  %v2164_v33 = vsel %vm69_vm0, %v7802_v56, 0.0  ;;  %v7809_v35 = vpop.f32.mrb[39].mxu0 }
 0x437   :  { %v2165_v49 = vadd.f32 %v2164_v33, %v2163_v45  ;;  %v2166_v38 = vsel %vm69_vm0, %v7809_v35, 0.0  ;;  %v7813_v18 = vpop.f32.mrb[38].mxu1 }
 0x438   :  { %v2138_v24 = vadd.f32 %v2137_v31, %v7804_v9  ;;  %v2168_v16 = vsel %vm69_vm0, %v7813_v18, 0.0  ;;  %v7818_v47 = vpop.f32.mrb[39].mxu1 }
 0x439   :  { %v2167_v27 = vadd.f32 %v2166_v38, %v2165_v49  ;;  %v2170_v25 = vsel %vm69_vm0, %v7818_v47, 0.0 }
 0x43a   :  { %2139 = vadd.xlane.f32.xlu0 %v2138_v24 }
 0x43b   :  { %v2169_v43 = vadd.f32 %v2168_v16, %v2167_v27 }
 0x43d   :  { %v2171_v22 = vadd.f32 %v2170_v25, %v2169_v43 }
 0x43f   :  { %2172 = vadd.xlane.f32.xlu1 %v2171_v22 }
 0x4c7   :  { %v2140_v63 = vpop.xlane.xlu0 %2139 }
 0x4c8   :  { %v7836_v16 = vmul.f32 0.00048828125, %v2140_v63 }
 0x4ca   :  { %v7854_v63 = vsub.f32 %v7710_v7, %v7836_v16 }
 0x4cc   :  { %v2173_v45 = vpop.xlane.xlu1 %2172 }
 0x4cd   :  { %v7822_v33 = vmul.f32 0.00048828125, %v2173_v45 }
 0x4cf   :  { %v7826_v31 = vsub.f32 %v7719_v3, %v7822_v33  ;;  %v7830_v49 = vsub.f32 %v7725_v59, %v7822_v33  ;;  %v7834_v27 = vsub.f32 %v7730_v46, %v7822_v33  ;;  %v7840_v22 = vsub.f32 %v7734_v40, %v7822_v33 }
 0x4d0   :  { %v7848_v59 = vsub.f32 %v7748_v36, %v7822_v33  ;;  %v7858_v40 = vsub.f32 %v7712_v17, %v7836_v16  ;;  %v7862_v38 = vsub.f32 %v7753_v5, %v7822_v33  ;;  %v7870_v7 = vsub.f32 %v7755_v26, %v7822_v33 }
 0x4d1   :  { %v2224_v25 = vmul.f32 %v7826_v31, %v7826_v31  ;;  %v2225_v3 = vmul.f32 %v7830_v49, %v7830_v49  ;;  %v2226_v46 = vmul.f32 %v7834_v27, %v7834_v27  ;;  %v2227_v24 = vmul.f32 %v7840_v22, %v7840_v22 }
 0x4d2   :  { %v2228_v17 = vmul.f32 %v7848_v59, %v7848_v59  ;;  %v7877_v5 = vsub.f32 %v7716_v39, %v7836_v16  ;;  %v2229_v26 = vmul.f32 %v7862_v38, %v7862_v38  ;;  %v7892_v39 = vsub.f32 %v7774_v13, %v7822_v33 }
 0x4d3   :  { %v2257_v36 = vsel %vm69_vm0, %v2224_v25, 0.0  ;;  %v2258_v43 = vsel %vm69_vm0, %v2225_v3, 0.0  ;;  %v2260_v20 = vsel %vm69_vm0, %v2226_v46, 0.0  ;;  %v2208_v25 = vmul.f32 %v7854_v63, %v7854_v63 }
 0x4d4   :  { %v2259_v45 = vadd.f32 %v2258_v43, %v2257_v36  ;;  %v7883_v3 = vsub.f32 %v7759_v4, %v7822_v33  ;;  %v2262_v36 = vsel %vm69_vm0, %v2227_v24, 0.0  ;;  %v2209_v46 = vmul.f32 %v7858_v40, %v7858_v40 }
 0x4d5   :  { %v2230_v43 = vmul.f32 %v7870_v7, %v7870_v7  ;;  %v7899_v4 = vsub.f32 %v7721_v11, %v7836_v16  ;;  %v7903_v24 = vsub.f32 %v7738_v60, %v7836_v16  ;;  %v7909_v13 = vsub.f32 %v7781_v55, %v7822_v33 }
 0x4d6   :  { %v2261_v21 = vadd.f32 %v2260_v20, %v2259_v45  ;;  %v2264_v45 = vsel %vm69_vm0, %v2228_v17, 0.0  ;;  %v2266_v17 = vsel %vm69_vm0, %v2229_v26, 0.0  ;;  %v2240_v54 = vadd.f32 %v2209_v46, %v2208_v25 }
 0x4d7   :  { %v7916_v11 = vsub.f32 %v7786_v28, %v7822_v33  ;;  %v7920_v60 = vsub.f32 %v7741_v52, %v7836_v16  ;;  %v2268_v55 = vsel %vm69_vm0, %v2230_v43, 0.0  ;;  %v2211_v41 = vmul.f32 %v7899_v4, %v7899_v4 }
 0x4d8   :  { %v2263_v20 = vadd.f32 %v2262_v36, %v2261_v21  ;;  %v2210_v21 = vmul.f32 %v7877_v5, %v7877_v5  ;;  %v2231_v36 = vmul.f32 %v7883_v3, %v7883_v3  ;;  %v7929_v25 = vsub.f32 %v7790_v58, %v7822_v33 }
 0x4d9   :  { %v2233_v52 = vmul.f32 %v7909_v13, %v7909_v13  ;;  %v2212_v46 = vmul.f32 %v7903_v24, %v7903_v24 }
 0x4da   :  { %v2265_v57 = vadd.f32 %v2264_v45, %v2263_v20  ;;  %v2232_v45 = vmul.f32 %v7892_v39, %v7892_v39  ;;  %v2241_v29 = vadd.f32 %v2240_v54, %v2210_v21  ;;  %v2270_v26 = vsel %vm69_vm0, %v2231_v36, 0.0 }
 0x4db   :  { %v7942_v54 = vsub.f32 %v7802_v56, %v7822_v33  ;;  %v7946_v21 = vsub.f32 %v7745_v23, %v7836_v16  ;;  %v2213_v36 = vmul.f32 %v7920_v60, %v7920_v60  ;;  %v7959_v56 = vsub.f32 %v7766_v12, %v7836_v16 }
 0x4dc   :  { %v2267_v20 = vadd.f32 %v2266_v17, %v2265_v57  ;;  %v7933_v57 = vsub.f32 %v7743_v1, %v7836_v16  ;;  %v2242_v43 = vadd.f32 %v2241_v29, %v2211_v41  ;;  %v2234_v1 = vmul.f32 %v7916_v11, %v7916_v11 }
 0x4dd   :  { %v2272_v17 = vsel %vm69_vm0, %v2232_v45, 0.0  ;;  %v7955_v41 = vsub.f32 %v7809_v35, %v7822_v33  ;;  %v2235_v23 = vmul.f32 %v7929_v25, %v7929_v25  ;;  %v2236_v12 = vmul.f32 %v7942_v54, %v7942_v54 }
 0x4de   :  { %v2269_v28 = vadd.f32 %v2268_v55, %v2267_v20  ;;  %v2243_v20 = vadd.f32 %v2242_v43, %v2212_v46  ;;  %v2274_v55 = vsel %vm69_vm0, %v2233_v52, 0.0  ;;  %v2214_v45 = vmul.f32 %v7933_v57, %v7933_v57 }
 0x4df   :  { %v7972_v46 = vsub.f32 %v7769_v50, %v7836_v16  ;;  %v2276_v43 = vsel %vm69_vm0, %v2234_v1, 0.0  ;;  %v2215_v52 = vmul.f32 %v7946_v21, %v7946_v21  ;;  %v2237_v50 = vmul.f32 %v7955_v41, %v7955_v41 }
 0x4e0   :  { %v2271_v58 = vadd.f32 %v2270_v26, %v2269_v28  ;;  %v2244_v28 = vadd.f32 %v2243_v20, %v2213_v36  ;;  %v7968_v26 = vsub.f32 %v7813_v18, %v7822_v33  ;;  %v7985_v36 = vsub.f32 %v7772_v37, %v7836_v16 }
 0x4e1   :  { %v2278_v20 = vsel %vm69_vm0, %v2235_v23, 0.0  ;;  %v2216_v1 = vmul.f32 %v7959_v56, %v7959_v56  ;;  %v2280_v37 = vsel %vm69_vm0, %v2236_v12, 0.0  ;;  %v8003_v23 = vsub.f32 %v7794_v6, %v7836_v16 }
 0x4e2   :  { %v2273_v29 = vadd.f32 %v2272_v17, %v2271_v58  ;;  %v2245_v58 = vadd.f32 %v2244_v28, %v2214_v45  ;;  %v7981_v17 = vsub.f32 %v7818_v47, %v7822_v33  ;;  %v7994_v45 = vsub.f32 %v7779_v14, %v7836_v16 }
 0x4e3   :  { %v2238_v47 = vmul.f32 %v7968_v26, %v7968_v26  ;;  %v2217_v33 = vmul.f32 %v7972_v46, %v7972_v46  ;;  %v2282_v14 = vsel %vm69_vm0, %v2237_v50, 0.0  ;;  %v8020_v50 = vsub.f32 %v7800_v0, %v7836_v16 }
 0x4e4   :  { %v2275_v35 = vadd.f32 %v2274_v55, %v2273_v29  ;;  %9971 = vst [vmem:[#allocation11_spill] sm:$0xff] %v7981_v17  ;;  %v2246_v29 = vadd.f32 %v2245_v58, %v2215_v52  ;;  %v2218_v52 = vmul.f32 %v7985_v36, %v7985_v36  ;;  %v2219_v6 = vmul.f32 %v7994_v45, %v7994_v45 }
 0x4e5   :  { %v2284_v12 = vsel %vm69_vm0, %v2238_v47, 0.0 }
 0x4e6   :  { %v2277_v18 = vadd.f32 %v2276_v43, %v2275_v35  ;;  %v2247_v28 = vadd.f32 %v2246_v29, %v2216_v1  ;;  %v2239_v43 = vmul.f32 %v7981_v17, %v7981_v17 }
 0x4e8   :  { %v2279_v55 = vadd.f32 %v2278_v20, %v2277_v18  ;;  %v2248_v58 = vadd.f32 %v2247_v28, %v2217_v33  ;;  %v8013_v20 = vsub.f32 %v7797_v34, %v7836_v16  ;;  %v8026_v34 = vsub.f32 %v7804_v9, %v7836_v16 }
 0x4ea   :  { %v2281_v35 = vadd.f32 %v2280_v37, %v2279_v55  ;;  %v2249_v1 = vadd.f32 %v2248_v58, %v2218_v52  ;;  %v2286_v55 = vsel %vm69_vm0, %v2239_v43, 0.0  ;;  %v2220_v37 = vmul.f32 %v8003_v23, %v8003_v23 }
 0x4eb   :  { %v2221_v28 = vmul.f32 %v8013_v20, %v8013_v20  ;;  %v2222_v43 = vmul.f32 %v8020_v50, %v8020_v50  ;;  %v2223_v0 = vmul.f32 %v8026_v34, %v8026_v34 }
 0x4ec   :  { %v2283_v18 = vadd.f32 %v2282_v14, %v2281_v35  ;;  %v2250_v33 = vadd.f32 %v2249_v1, %v2219_v6 }
 0x4ee   :  { %v2285_v29 = vadd.f32 %v2284_v12, %v2283_v18  ;;  %v2251_v35 = vadd.f32 %v2250_v33, %v2220_v37  ;;  %v2122_v33 = vld [vmem:[%s9878_s6] sm:$0xff] }
 0x4f0   :  { %v2287_v47 = vadd.f32 %v2286_v55, %v2285_v29  ;;  %v2252_v14 = vadd.f32 %v2251_v35, %v2221_v28  ;;  %v2121_v29 = vld [vmem:[%s9877_s5 + $0x8] sm:$0xf] }
 0x4f2   :  { %2288 = vadd.xlane.f32.xlu1 %v2287_v47  ;;  %v2253_v52 = vadd.f32 %v2252_v14, %v2222_v43  ;;  %v2120_v47 = vld [vmem:[%s9877_s5] sm:$0xff]  ;;  %v2123_v43 = vld [vmem:[%s9878_s6 + $0x8] sm:$0xf] }
 0x4f4   :  { %v2254_v58 = vadd.f32 %v2253_v52, %v2223_v0 }
 0x4f6   :  { %2255 = vadd.xlane.f32.xlu1 %v2254_v58 }
 0x57f   :  { %v2289_v18 = vpop.xlane.xlu1 %2288 }
 0x580   :  { %v2291_v12 = vmul.f32 0.00048828125, %v2289_v18 }
 0x582   :  { %v2293_v6 = vadd.f32 1e-05, %v2291_v12 }
 0x583   :  { %v2256_v9 = vpop.xlane.xlu1 %2255 }
 0x584   :  { %6216 = vrsqrt.f32 %v2293_v6  ;;  %v2290_v16 = vmul.f32 0.00048828125, %v2256_v9 }
 0x586   :  { %v2292_v1 = vadd.f32 1e-05, %v2290_v16 }
 0x588   :  { %6218 = vrsqrt.f32 %v2292_v1 }
 0x58e   :  { %v6217_v55 = vpop.eup %6216 }
 0x58f   :  { %v2297_v37 = vmul.f32 %v6217_v55, %v2121_v29 }
 0x591   :  { %2305 = vperm.xlu0 %6104, %v2297_v37  }
 0x592   :  { %v6219_v28 = vpop.eup %6218 }
 0x593   :  { %v2296_v35 = vmul.f32 %v6219_v28, %v2120_v47 }
 0x595   :  { %2342 = vperm.xlu0 %6104, %v2122_v33   ;;  %2300 = vperm.xlu1 %6105, %v2296_v35  }
 0x599   :  { %2347 = vperm.xlu1 %6105, %v2123_v43  }
 0x610   :  { %v8046_v14 = vpop.permute.xlu0 %2305 }
 0x611   :  { %9972 = vst [vmem:[#allocation22_spill] sm:$0xff] %v8046_v14  ;;  %v8184_v17 = vmul.f32 %v8046_v14, %v7909_v13  ;;  %v8201_v13 = vmul.f32 %v8046_v14, %v7955_v41 }
 0x613   :  { %9974 = vst [vmem:[#allocation24_spill] sm:$0xff] %v8201_v13 }
 0x614   :  { %v8048_v0 = vpop.permute.xlu1 %2300  ;;  %v8056_v12 = vpop.permute.xlu0 %2342 }
 0x615   :  { %v2308_v52 = vmul.f32 %v8048_v0, %v7854_v63  ;;  %v2309_v58 = vmul.f32 %v8048_v0, %v7858_v40  ;;  %v2310_v18 = vmul.f32 %v8048_v0, %v7877_v5  ;;  %v2311_v6 = vmul.f32 %v8048_v0, %v7899_v4 }
 0x616   :  { %v2312_v63 = vmul.f32 %v8048_v0, %v7903_v24  ;;  %v2313_v40 = vmul.f32 %v8048_v0, %v7920_v60  ;;  %v2314_v5 = vmul.f32 %v8048_v0, %v7933_v57  ;;  %v2315_v24 = vmul.f32 %v8048_v0, %v7946_v21 }
 0x617   :  { %v8061_v9 = vadd.f32 %v8056_v12, %v2308_v52  ;;  %v8064_v16 = vadd.f32 %v8056_v12, %v2309_v58  ;;  %v8069_v1 = vadd.f32 %v8056_v12, %v2310_v18  ;;  %v8076_v4 = vadd.f32 %v8056_v12, %v2311_v6 }
 0x618   :  { %v8081_v37 = vadd.f32 %v8056_v12, %v2312_v63  ;;  %v2316_v60 = vmul.f32 %v8048_v0, %v7959_v56  ;;  %v8089_v57 = vadd.f32 %v8056_v12, %v2313_v40  ;;  %v8092_v47 = vadd.f32 %v8056_v12, %v2314_v5 }
 0x619   :  { %v2414_v29 = vmin.f32 %v8061_v9, 0.0  ;;  %v2415_v55 = vmin.f32 %v8064_v16, 0.0  ;;  %v2416_v33 = vmin.f32 %v8069_v1, 0.0  ;;  %v2417_v28 = vmin.f32 %v8076_v4, 0.0 }
 0x61a   :  { %v2418_v52 = vmin.f32 %v8081_v37, 0.0  ;;  %v2317_v21 = vmul.f32 %v8048_v0, %v7972_v46  ;;  %v8099_v58 = vadd.f32 %v8056_v12, %v2315_v24  ;;  %v2419_v18 = vmin.f32 %v8089_v57, 0.0 }
 0x61b   :  { %v2446_v35 = vmul.f32 1.442695, %v2414_v29  ;;  %v2448_v43 = vmul.f32 1.442695, %v2415_v55  ;;  %v2450_v56 = vmul.f32 1.442695, %v2416_v33  ;;  %v2318_v6 = vmul.f32 %v8048_v0, %v7985_v36 }
 0x61c   :  { %v8105_v63 = vadd.f32 %v8056_v12, %v2316_v60  ;;  %v2420_v40 = vmin.f32 %v8092_v47, 0.0  ;;  %v2452_v5 = vmul.f32 1.442695, %v2417_v28  ;;  %v2319_v46 = vmul.f32 %v8048_v0, %v7994_v45 }
 0x61d   :  { %6220 = vpow2.f32 %v2446_v35  ;;  %v2454_v29 = vmul.f32 1.442695, %v2418_v52  ;;  %v8111_v55 = vadd.f32 %v8056_v12, %v2317_v21  ;;  %v2421_v24 = vmin.f32 %v8099_v58, 0.0 }
 0x61e   :  { %6222 = vpow2.f32 %v2448_v43  ;;  %v2320_v33 = vmul.f32 %v8048_v0, %v8003_v23  ;;  %v2456_v36 = vmul.f32 1.442695, %v2419_v18  ;;  %v8117_v60 = vadd.f32 %v8056_v12, %v2318_v6 }
 0x61f   :  { %6224 = vpow2.f32 %v2450_v56  ;;  %v2422_v35 = vmin.f32 %v8105_v63, 0.0  ;;  %v2458_v28 = vmul.f32 1.442695, %v2420_v40  ;;  %v2321_v45 = vmul.f32 %v8048_v0, %v8013_v20 }
 0x620   :  { %6226 = vpow2.f32 %v2452_v5  ;;  %v8123_v43 = vadd.f32 %v8056_v12, %v2319_v46  ;;  %v2322_v52 = vmul.f32 %v8048_v0, %v8020_v50  ;;  %v2423_v23 = vmin.f32 %v8111_v55, 0.0 }
 0x621   :  { %6228 = vpow2.f32 %v2454_v29  ;;  %v2460_v21 = vmul.f32 1.442695, %v2421_v24  ;;  %v8130_v56 = vmul.f32 %v8046_v14, %v7826_v31  ;;  %v8133_v18 = vadd.f32 %v8056_v12, %v2320_v33 }
 0x622   :  { %6230 = vpow2.f32 %v2456_v36  ;;  %v8137_v20 = vmul.f32 %v8046_v14, %v7830_v49  ;;  %v8141_v6 = vmul.f32 %v8046_v14, %v7834_v27  ;;  %v2424_v40 = vmin.f32 %v8117_v60, 0.0 }
 0x623   :  { %6232 = vpow2.f32 %v2458_v28  ;;  %v2462_v5 = vmul.f32 1.442695, %v2422_v35  ;;  %v8146_v31 = vmul.f32 %v8046_v14, %v7840_v22  ;;  %v2323_v29 = vmul.f32 %v8048_v0, %v8026_v34 }
 0x624   :  { %v8151_v49 = vadd.f32 %v8056_v12, %v2321_v45  ;;  %v2425_v24 = vmin.f32 %v8123_v43, 0.0  ;;  %v8156_v27 = vmul.f32 %v8046_v14, %v7848_v59  ;;  %v8159_v33 = vadd.f32 %v8056_v12, %v2322_v52 }
 0x625   :  { %6234 = vpow2.f32 %v2460_v21  ;;  %v2464_v36 = vmul.f32 1.442695, %v2423_v23  ;;  %v8163_v22 = vmul.f32 %v8046_v14, %v7862_v38  ;;  %v2426_v34 = vmin.f32 %v8133_v18, 0.0 }
 0x626   :  { %v8168_v0 = vmul.f32 %v8046_v14, %v7870_v7  ;;  %v8172_v35 = vmul.f32 %v8046_v14, %v7883_v3  ;;  %v8176_v59 = vmul.f32 %v8046_v14, %v7892_v39  ;;  %6236 = vpow2.f32 %v2462_v5 }
 0x627   :  { %v6221_v50 = vpop.eup %6220  ;;  %v2466_v45 = vmul.f32 1.442695, %v2424_v40  ;;  %v8179_v23 = vadd.f32 %v8056_v12, %v2323_v29  ;;  %v2427_v21 = vmin.f32 %v8151_v49, 0.0  ;;  %v2468_v7 = vmul.f32 1.442695, %v2425_v24 }
 0x628   :  { %v6223_v46 = vpop.eup %6222  ;;  %v5846_v52 = vadd.f32 -1.0, %v6221_v50  ;;  %v2428_v61 = vmin.f32 %v8159_v33, 0.0  ;;  %6238 = vpow2.f32 %v2464_v36  ;;  %v8189_v39 = vmul.f32 %v8046_v14, %v7916_v11 }
 0x629   :  { %v6225_v28 = vpop.eup %6224  ;;  %v5847_v38 = vadd.f32 -1.0, %v6223_v46  ;;  %v8193_v50 = vmul.f32 %v8046_v14, %v7929_v25  ;;  %v2470_v40 = vmul.f32 1.442695, %v2426_v34  ;;  %v8197_v46 = vmul.f32 %v8046_v14, %v7942_v54 }
 0x62a   :  { %v6227_v3 = vpop.eup %6226  ;;  %v5848_v5 = vadd.f32 -1.0, %v6225_v28  ;;  %vm2382_vm2 = vcmp.gt.f32.partialorder %v8061_v9, 0.0  ;;  %6240 = vpow2.f32 %v2466_v45  ;;  %v2542_v11 = vmul.f32 1.6732632, %v5846_v52 }
 0x62b   :  { %v6229_v12 = vpop.eup %6228  ;;  %9973 = vst [vmem:[#allocation23_spill] sm:$0xff] %v8197_v46  ;;  %v2543_v29 = vmul.f32 1.6732632, %v5847_v38  ;;  %vm2383_vm8 = vcmp.gt.f32.partialorder %v8064_v16, 0.0  ;;  %v2429_v25 = vmin.f32 %v8179_v23, 0.0  ;;  %6242 = vpow2.f32 %v2468_v7  ;;  %v8217_v38 = vpop.permute.xlu1 %2347 }
 0x62c   :  { %v6231_v24 = vpop.eup %6230  ;;  %v2472_v36 = vmul.f32 1.442695, %v2427_v21  ;;  %vm2384_vm9 = vcmp.gt.f32.partialorder %v8069_v1, 0.0  ;;  %v2474_v54 = vmul.f32 1.442695, %v2428_v61  ;;  %v5849_v28 = vadd.f32 -1.0, %v6227_v3 }
 0x62d   :  { %v6233_v34 = vpop.eup %6232  ;;  %v5850_v46 = vadd.f32 -1.0, %v6229_v12  ;;  %vm2385_vm10 = vcmp.gt.f32.partialorder %v8076_v4, 0.0  ;;  %vm2386_vm11 = vcmp.gt.f32.partialorder %v8081_v37, 0.0  ;;  %6244 = vpow2.f32 %v2470_v40 }
 0x62e   :  { %v2544_v41 = vmul.f32 1.6732632, %v5848_v5  ;;  %vm2387_vm12 = vcmp.gt.f32.partialorder %v8089_v57, 0.0  ;;  %vm2388_vm13 = vcmp.gt.f32.partialorder %v8092_v47, 0.0  ;;  %v2574_v52 = vsel %vm2382_vm2, %v8061_v9, %v2542_v11 }
 0x62f   :  { %v6235_v45 = vpop.eup %6234  ;;  %v2575_v61 = vsel %vm2383_vm8, %v8064_v16, %v2543_v29  ;;  %6246 = vpow2.f32 %v2472_v36  ;;  %v2476_v21 = vmul.f32 1.442695, %v2429_v25  ;;  %v5851_v7 = vadd.f32 -1.0, %v6231_v24 }
 0x630   :  { %v5852_v3 = vadd.f32 -1.0, %v6233_v34  ;;  %v6237_v12 = vpop.eup %6236  ;;  %vm2389_vm14 = vcmp.gt.f32.partialorder %v8099_v58, 0.0  ;;  %6248 = vpow2.f32 %v2474_v54  ;;  %v2545_v40 = vmul.f32 1.6732632, %v5849_v28 }
 0x631   :  { %v2546_v5 = vmul.f32 1.6732632, %v5850_v46  ;;  %v5853_v13 = vadd.f32 -1.0, %v6235_v45  ;;  %v2576_v9 = vsel %vm2384_vm9, %v8069_v1, %v2544_v41  ;;  %v2606_v11 = vmul.f32 1.050701, %v2574_v52 }
 0x632   :  { %v2607_v14 = vmul.f32 1.050701, %v2575_v61  ;;  %v6239_v16 = vpop.eup %6238  ;;  %vm2390_vm15 = vcmp.gt.f32.partialorder %v8105_v63, 0.0  ;;  %v8226_v29 = vadd.f32 %v8217_v38, %v8130_v56  ;;  %v8230_v24 = vadd.f32 %v8217_v38, %v8137_v20 }
 0x633   :  { %v8234_v46 = vadd.f32 %v8217_v38, %v8141_v6  ;;  %6250 = vpow2.f32 %v2476_v21  ;;  %v5854_v25 = vadd.f32 -1.0, %v6237_v12  ;;  %v2547_v1 = vmul.f32 1.6732632, %v5851_v7 }
 0x634   :  { %v2548_v36 = vmul.f32 1.6732632, %v5852_v3  ;;  %v6241_v34 = vpop.eup %6240  ;;  %vm2391_vm1 = vcmp.gt.f32.partialorder %v8111_v55, 0.0  ;;  %v2577_v56 = vsel %vm2385_vm10, %v8076_v4, %v2545_v40  ;;  %v2578_v20 = vsel %vm2386_vm11, %v8081_v37, %v2546_v5 }
 0x635   :  { %v2608_v54 = vmul.f32 1.050701, %v2576_v9  ;;  %v8245_v6 = vadd.f32 %v8217_v38, %v8146_v31  ;;  %v6243_v28 = vpop.eup %6242  ;;  %v5855_v41 = vadd.f32 -1.0, %v6239_v16  ;;  %v2549_v45 = vmul.f32 1.6732632, %v5853_v13 }
 0x636   :  { %v8248_v52 = vadd.f32 %v2606_v11, %v7249_v42  ;;  %v8251_v61 = vadd.f32 %v2607_v14, %v7232_v53  ;;  %v8255_v4 = vadd.f32 %v8217_v38, %v8156_v27  ;;  %v8259_v37 = vadd.f32 %v8217_v38, %v8163_v22 }
 0x637   :  { %v8263_v31 = vadd.f32 %v8217_v38, %v8168_v0  ;;  %v8267_v13 = vadd.f32 %v8217_v38, %v8172_v35  ;;  %v6245_v42 = vpop.eup %6244  ;;  %vm2392_vm3 = vcmp.gt.f32.partialorder %v8117_v60, 0.0  ;;  %v2550_v53 = vmul.f32 1.6732632, %v5854_v25 }
 0x638   :  { %v2579_v14 = vsel %vm2387_vm12, %v8089_v57, %v2547_v1  ;;  %v2580_v27 = vsel %vm2388_vm13, %v8092_v47, %v2548_v36  ;;  %v2609_v22 = vmul.f32 1.050701, %v2577_v56  ;;  %v5856_v21 = vadd.f32 -1.0, %v6241_v34 }
 0x639   :  { %v5857_v0 = vadd.f32 -1.0, %v6243_v28  ;;  %v2610_v7 = vmul.f32 1.050701, %v2578_v20  ;;  %v8278_v35 = vadd.f32 %v8217_v38, %v8176_v59  ;;  %v6247_v3 = vpop.eup %6246  ;;  %vm2393_vm4 = vcmp.gt.f32.partialorder %v8123_v43, 0.0 }
 0x63a   :  { %v2551_v12 = vmul.f32 1.6732632, %v5855_v41  ;;  %v2581_v57 = vsel %vm2389_vm14, %v8099_v58, %v2549_v45  ;;  %v8285_v40 = vadd.f32 %v2608_v54, %v7279_v44  ;;  %v2674_v47 = vadd.f32 %v8251_v61, %v8248_v52  ;;  %v6249_v5 = vpop.eup %6248 }
 0x63b   :  { %v5858_v9 = vadd.f32 -1.0, %v6245_v42  ;;  %v2611_v11 = vmul.f32 1.050701, %v2579_v14  ;;  %v2612_v16 = vmul.f32 1.050701, %v2580_v27  ;;  %v2430_v59 = vmin.f32 %v8226_v29, 0.0 }
 0x63c   :  { %vm2394_vm5 = vcmp.gt.f32.partialorder %v8133_v18, 0.0  ;;  %v2582_v25 = vsel %vm2390_vm15, %v8105_v63, %v2550_v53  ;;  %v8295_v58 = vadd.f32 %v2609_v22, %v7241_v48  ;;  %v2675_v44 = vadd.f32 %v2674_v47, %v8285_v40 }
 0x63d   :  { %v2431_v1 = vmin.f32 %v8230_v24, 0.0  ;;  %v2552_v36 = vmul.f32 1.6732632, %v5856_v21  ;;  %v2553_v34 = vmul.f32 1.6732632, %v5857_v0  ;;  %v8301_v20 = vadd.f32 %v8217_v38, %v8184_v17  ;;  %v6251_v54 = vpop.eup %6250 }
 0x63e   :  { %v2613_v56 = vmul.f32 1.050701, %v2581_v57  ;;  %vm2395_vm6 = vcmp.gt.f32.partialorder %v8151_v49, 0.0  ;;  %v2583_v63 = vsel %vm2391_vm1, %v8111_v55, %v2551_v12  ;;  %v8308_v48 = vadd.f32 %v2610_v7, %v7397_v30 }
 0x63f   :  { %v2676_v28 = vadd.f32 %v2675_v44, %v8295_v58  ;;  %v2432_v41 = vmin.f32 %v8234_v46, 0.0  ;;  %v5859_v45 = vadd.f32 -1.0, %v6247_v3  ;;  %v5860_v42 = vadd.f32 -1.0, %v6249_v5 }
 0x640   :  { %v2614_v53 = vmul.f32 1.050701, %v2582_v25  ;;  %v2478_v14 = vmul.f32 1.442695, %v2430_v59  ;;  %vm2396_vm7 = vcmp.gt.f32.partialorder %v8159_v33, 0.0  ;;  %v8314_v17 = vadd.f32 %v2611_v11, %v7309_v15 }
 0x641   :  { %v2677_v27 = vadd.f32 %v2676_v28, %v8308_v48  ;;  %v2433_v55 = vmin.f32 %v8245_v6, 0.0  ;;  %v2480_v22 = vmul.f32 1.442695, %v2431_v1  ;;  %v5861_v30 = vadd.f32 -1.0, %v6251_v54 }
 0x642   :  { %v2554_v21 = vmul.f32 1.6732632, %v5858_v9  ;;  %v2584_v0 = vsel %vm2392_vm3, %v8117_v60, %v2552_v36  ;;  %v2615_v7 = vmul.f32 1.050701, %v2583_v63  ;;  %vm2397_vm2 = vcmp.gt.f32.partialorder %v8179_v23, 0.0 }
 0x643   :  { %v8323_v3 = vadd.f32 %v2612_v16, %v7408_v2  ;;  %v2678_v15 = vadd.f32 %v2677_v27, %v8314_v17  ;;  %v2434_v12 = vmin.f32 %v8255_v4, 0.0  ;;  %v2482_v57 = vmul.f32 1.442695, %v2432_v41 }
 0x644   :  { %v2555_v47 = vmul.f32 1.6732632, %v5859_v45  ;;  %v2585_v5 = vsel %vm2393_vm4, %v8123_v43, %v2553_v34  ;;  %v8331_v9 = vadd.f32 %v2613_v56, %v7353_v10  ;;  %6252 = vpow2.f32 %v2478_v14 }
 0x645   :  { %v2679_v60 = vadd.f32 %v2678_v15, %v8323_v3  ;;  %v2435_v11 = vmin.f32 %v8259_v37, 0.0  ;;  %6254 = vpow2.f32 %v2480_v22  ;;  %v2484_v2 = vmul.f32 1.442695, %v2433_v55 }
 0x646   :  { %v2556_v16 = vmul.f32 1.6732632, %v5860_v42  ;;  %v2586_v59 = vsel %vm2394_vm5, %v8133_v18, %v2554_v21  ;;  %v2616_v25 = vmul.f32 1.050701, %v2584_v0  ;;  %v8339_v44 = vadd.f32 %v2614_v53, %v7549_v51 }
 0x647   :  { %v2680_v43 = vadd.f32 %v2679_v60, %v8331_v9  ;;  %v2436_v10 = vmin.f32 %v8263_v31, 0.0  ;;  %6256 = vpow2.f32 %v2482_v57  ;;  %v2486_v1 = vmul.f32 1.442695, %v2434_v12  ;;  %v9977_v60 = vld [vmem:[#allocation3_spill] sm:$0xff] }
 0x648   :  { %v2557_v36 = vmul.f32 1.6732632, %v5861_v30  ;;  %v2587_v34 = vsel %vm2395_vm6, %v8151_v49, %v2555_v47  ;;  %v2617_v56 = vmul.f32 1.050701, %v2585_v5  ;;  %v8347_v54 = vadd.f32 %v2615_v7, %v7487_v8 }
 0x649   :  { %v2681_v18 = vadd.f32 %v2680_v43, %v8339_v44  ;;  %v2437_v51 = vmin.f32 %v8267_v13, 0.0  ;;  %6258 = vpow2.f32 %v2484_v2  ;;  %v2488_v63 = vmul.f32 1.442695, %v2435_v11 }
 0x64a   :  { %v2588_v28 = vsel %vm2396_vm7, %v8159_v33, %v2556_v16  ;;  %v2618_v41 = vmul.f32 1.050701, %v2586_v59  ;;  %v8355_v45 = vadd.f32 %v2616_v25, %v7571_v32  ;;  %v8359_v49 = vadd.f32 %v8217_v38, %v8189_v39 }
 0x64b   :  { %v2682_v8 = vadd.f32 %v2681_v18, %v8347_v54  ;;  %v2438_v42 = vmin.f32 %v8278_v35, 0.0  ;;  %6260 = vpow2.f32 %v2486_v1  ;;  %v2490_v53 = vmul.f32 1.442695, %v2436_v10  ;;  %v9979_v10 = vld [vmem:[#allocation12_spill] sm:$0xff] }
 0x64c   :  { %v2589_v14 = vsel %vm2397_vm2, %v8179_v23, %v2557_v36  ;;  %v2619_v27 = vmul.f32 1.050701, %v2587_v34  ;;  %v8367_v33 = vadd.f32 %v2617_v56, %v7538_v19  ;;  %v8371_v32 = vadd.f32 %v8217_v38, %v8193_v50  ;;  %v9975_v23 = vld [vmem:[#allocation22_spill] sm:$0xff]  ;;  %v9976_v19 = vld [vmem:[#allocation23_spill] sm:$0xff] }
 0x64d   :  { %v2683_v39 = vadd.f32 %v2682_v8, %v8355_v45  ;;  %v2439_v55 = vmin.f32 %v8301_v20, 0.0  ;;  %6262 = vpow2.f32 %v2488_v63  ;;  %v2492_v22 = vmul.f32 1.442695, %v2437_v51  ;;  %v9980_v36 = vld [vmem:[#allocation11_spill] sm:$0xff]  ;;  %v9981_v8 = vld [vmem:[#allocation4_spill] sm:$0xff] }
 0x64e   :  { %v6253_v30 = vpop.eup %6252  ;;  %v2620_v21 = vmul.f32 1.050701, %v2588_v28  ;;  %v8376_v0 = vadd.f32 %v2618_v41, %v7674_v62  ;;  %v2338_v7 = vmul.f32 %v9975_v23, %v7968_v26  ;;  %v8382_v15 = vadd.f32 %v8217_v38, %v9976_v19  ;;  %v9978_v62 = vld [vmem:[#allocation24_spill] sm:$0xff] }
 0x64f   :  { %v6255_v50 = vpop.eup %6254  ;;  %v2684_v12 = vadd.f32 %v2683_v39, %v8367_v33  ;;  %v2440_v57 = vmin.f32 %v8359_v49, 0.0  ;;  %6264 = vpow2.f32 %v2490_v53  ;;  %v2494_v47 = vmul.f32 1.442695, %v2438_v42 }
 0x650   :  { %v2621_v5 = vmul.f32 1.050701, %v2589_v14  ;;  %v8387_v11 = vadd.f32 %v2619_v27, %v9977_v60  ;;  %v8391_v2 = vadd.f32 %v8217_v38, %v9978_v62  ;;  %v2441_v26 = vmin.f32 %v8371_v32, 0.0 }
 0x651   :  { %v6257_v16 = vpop.eup %6256  ;;  %v2685_v59 = vadd.f32 %v2684_v12, %v8376_v0  ;;  %6266 = vpow2.f32 %v2492_v22  ;;  %v2496_v25 = vmul.f32 1.442695, %v2439_v55  ;;  %v5862_v43 = vadd.f32 -1.0, %v6253_v30 }
 0x652   :  { %v8396_v1 = vadd.f32 %v2620_v21, %v9979_v10  ;;  %v2339_v34 = vmul.f32 %v9975_v23, %v9980_v36  ;;  %v8401_v56 = vadd.f32 %v8217_v38, %v2338_v7  ;;  %v5863_v18 = vadd.f32 -1.0, %v6255_v50 }
 0x653   :  { %v6259_v51 = vpop.eup %6258  ;;  %v2686_v63 = vadd.f32 %v2685_v59, %v8387_v11  ;;  %v2442_v28 = vmin.f32 %v8382_v15, 0.0  ;;  %6268 = vpow2.f32 %v2494_v47  ;;  %v2498_v41 = vmul.f32 1.442695, %v2440_v57 }
 0x654   :  { %v8406_v42 = vadd.f32 %v2621_v5, %v9981_v8  ;;  %v8409_v53 = vadd.f32 %v8217_v38, %v2339_v34  ;;  %v2443_v14 = vmin.f32 %v8391_v2, 0.0  ;;  %v5864_v27 = vadd.f32 -1.0, %v6257_v16 }
 0x655   :  { %v6261_v39 = vpop.eup %6260  ;;  %v2687_v55 = vadd.f32 %v2686_v63, %v8396_v1  ;;  %6270 = vpow2.f32 %v2496_v25  ;;  %v2500_v22 = vmul.f32 1.442695, %v2441_v26  ;;  %v2558_v30 = vmul.f32 1.6732632, %v5862_v43 }
 0x656   :  { %v5865_v21 = vadd.f32 -1.0, %v6259_v51  ;;  %v2559_v23 = vmul.f32 1.6732632, %v5863_v18  ;;  %v2444_v50 = vmin.f32 %v8401_v56, 0.0  ;;  %6272 = vpow2.f32 %v2498_v41 }
 0x657   :  { %v6263_v7 = vpop.eup %6262  ;;  %v2688_v19 = vadd.f32 %v2687_v55, %v8406_v42  ;;  %v2502_v12 = vmul.f32 1.442695, %v2442_v28  ;;  %vm2398_vm8 = vcmp.gt.f32.partialorder %v8226_v29, 0.0  ;;  %vm2399_vm9 = vcmp.gt.f32.partialorder %v8230_v24, 0.0  ;;  %v9982_v55 = vld [vmem:[#allocation15_spill] sm:$0xff] }
 0x658   :  { %v5866_v38 = vadd.f32 -1.0, %v6261_v39  ;;  %v2560_v57 = vmul.f32 1.6732632, %v5864_v27  ;;  %v2445_v5 = vmin.f32 %v8409_v53, 0.0  ;;  %6274 = vpow2.f32 %v2500_v22 }
 0x659   :  { %v6265_v47 = vpop.eup %6264  ;;  %2689 = vadd.xlane.f32.xlu0 %v2688_v19  ;;  %v2504_v60 = vmul.f32 1.442695, %v2443_v14  ;;  %v2590_v62 = vsel %vm2398_vm8, %v8226_v29, %v2558_v30  ;;  %v5867_v26 = vadd.f32 -1.0, %v6263_v7  ;;  %v2561_v16 = vmul.f32 1.6732632, %v5865_v21 }
 0x65a   :  { %v2591_v59 = vsel %vm2399_vm9, %v8230_v24, %v2559_v23  ;;  %vm2400_vm10 = vcmp.gt.f32.partialorder %v8234_v46, 0.0  ;;  %6276 = vpow2.f32 %v2502_v12  ;;  %v2506_v43 = vmul.f32 1.442695, %v2444_v50  ;;  %v9983_v23 = vld [vmem:[#allocation13_spill] sm:$0xff] }
 0x65b   :  { %v6267_v25 = vpop.eup %6266  ;;  %v5868_v10 = vadd.f32 -1.0, %v6265_v47  ;;  %v2562_v36 = vmul.f32 1.6732632, %v5866_v38  ;;  %v2592_v34 = vsel %vm2400_vm10, %v8234_v46, %v2560_v57  ;;  %v2622_v18 = vmul.f32 1.050701, %v2590_v62 }
 0x65c   :  { %vm2401_vm11 = vcmp.gt.f32.partialorder %v8245_v6, 0.0  ;;  %6278 = vpow2.f32 %v2504_v60  ;;  %v2508_v63 = vmul.f32 1.442695, %v2445_v5  ;;  %v2623_v29 = vmul.f32 1.050701, %v2591_v59  ;;  %v9985_v59 = vld [vmem:[#allocation14_spill] sm:$0xff] }
 0x65d   :  { %v6269_v51 = vpop.eup %6268  ;;  %v5869_v28 = vadd.f32 -1.0, %v6267_v25  ;;  %v2563_v41 = vmul.f32 1.6732632, %v5867_v26  ;;  %v2593_v24 = vsel %vm2401_vm11, %v8245_v6, %v2561_v16  ;;  %vm2402_vm12 = vcmp.gt.f32.partialorder %v8255_v4, 0.0 }
 0x65e   :  { %6280 = vpow2.f32 %v2506_v43  ;;  %v2624_v14 = vmul.f32 1.050701, %v2592_v34  ;;  %v5870_v27 = vadd.f32 -1.0, %v6269_v51  ;;  %v2564_v39 = vmul.f32 1.6732632, %v5868_v10  ;;  %v9986_v51 = vld [vmem:[#allocation19_spill] sm:$0xff] }
 0x65f   :  { %v6271_v8 = vpop.eup %6270  ;;  %v2594_v46 = vsel %vm2402_vm12, %v8255_v4, %v2562_v36  ;;  %v8427_v22 = vadd.f32 %v2622_v18, %v9982_v55  ;;  %vm2403_vm13 = vcmp.gt.f32.partialorder %v8259_v37, 0.0  ;;  %6282 = vpow2.f32 %v2508_v63  ;;  %v9984_v4 = vld [vmem:[#allocation16_spill] sm:$0xff] }
 0x660   :  { %v6273_v30 = vpop.eup %6272  ;;  %v2625_v21 = vmul.f32 1.050701, %v2593_v24  ;;  %v8431_v7 = vadd.f32 %v2623_v29, %v9983_v23  ;;  %v5871_v6 = vadd.f32 -1.0, %v6271_v8  ;;  %v2565_v19 = vmul.f32 1.6732632, %v5869_v28 }
 0x661   :  { %v2595_v50 = vsel %vm2403_vm13, %v8259_v37, %v2563_v41  ;;  %vm2404_vm14 = vcmp.gt.f32.partialorder %v8263_v31, 0.0  ;;  %v2626_v38 = vmul.f32 1.050701, %v2594_v46  ;;  %v8436_v57 = vadd.f32 %v2624_v14, %v9984_v4 }
 0x662   :  { %v6275_v12 = vpop.eup %6274  ;;  %v5872_v47 = vadd.f32 -1.0, %v6273_v30  ;;  %v2566_v5 = vmul.f32 1.6732632, %v5870_v27  ;;  %v2596_v60 = vsel %vm2404_vm14, %v8263_v31, %v2564_v39  ;;  %v2691_v62 = vsel %vm69_vm0, %v8427_v22, 0.0  ;;  %v9987_v27 = vld [vmem:[#allocation17_spill] sm:$0xff] }
 0x663   :  { %vm2405_vm15 = vcmp.gt.f32.partialorder %v8267_v13, 0.0  ;;  %v2627_v16 = vmul.f32 1.050701, %v2595_v50  ;;  %v8443_v37 = vadd.f32 %v2625_v21, %v9985_v59  ;;  %v2692_v25 = vsel %vm69_vm0, %v8431_v7, 0.0 }
 0x664   :  { %v6277_v26 = vpop.eup %6276  ;;  %v5873_v43 = vadd.f32 -1.0, %v6275_v12  ;;  %v2567_v10 = vmul.f32 1.6732632, %v5871_v6  ;;  %v2597_v36 = vsel %vm2405_vm15, %v8267_v13, %v2565_v19  ;;  %v2693_v34 = vadd.f32 %v2692_v25, %v2691_v62  ;;  %v9988_v19 = vld [vmem:[#allocation20_spill] sm:$0xff] }
 0x665   :  { %vm2406_vm1 = vcmp.gt.f32.partialorder %v8278_v35, 0.0  ;;  %v2628_v31 = vmul.f32 1.050701, %v2596_v60  ;;  %v8450_v63 = vadd.f32 %v2626_v38, %v9986_v51  ;;  %v2694_v29 = vsel %vm69_vm0, %v8436_v57, 0.0 }
 0x666   :  { %v6279_v18 = vpop.eup %6278  ;;  %v5874_v28 = vadd.f32 -1.0, %v6277_v26  ;;  %v2568_v41 = vmul.f32 1.6732632, %v5872_v47  ;;  %v2598_v24 = vsel %vm2406_vm1, %v8278_v35, %v2566_v5  ;;  %v2695_v8 = vadd.f32 %v2694_v29, %v2693_v34 }
 0x667   :  { %vm2407_vm3 = vcmp.gt.f32.partialorder %v8301_v20, 0.0  ;;  %v2629_v13 = vmul.f32 1.050701, %v2597_v36  ;;  %v8457_v39 = vadd.f32 %v2627_v16, %v9987_v27  ;;  %v2696_v46 = vsel %vm69_vm0, %v8443_v37, 0.0  ;;  %v9990_v36 = vld [vmem:[#allocation21_spill] sm:$0xff]  ;;  %v9992_v27 = vld [vmem:[#allocation8_spill] sm:$0xff] }
 0x668   :  { %v6281_v14 = vpop.eup %6280  ;;  %v5875_v55 = vadd.f32 -1.0, %v6279_v18  ;;  %v2569_v30 = vmul.f32 1.6732632, %v5873_v43  ;;  %v2599_v21 = vsel %vm2407_vm3, %v8301_v20, %v2567_v10  ;;  %v2697_v23 = vadd.f32 %v2696_v46, %v2695_v8  ;;  %v9989_v20 = vld [vmem:[#allocation18_spill] sm:$0xff] }
 0x669   :  { %v6283_v6 = vpop.eup %6282  ;;  %vm2408_vm4 = vcmp.gt.f32.partialorder %v8359_v49, 0.0  ;;  %v2630_v35 = vmul.f32 1.050701, %v2598_v24  ;;  %v8464_v50 = vadd.f32 %v2628_v31, %v9988_v19  ;;  %v2698_v12 = vsel %vm69_vm0, %v8450_v63, 0.0 }
 0x66a   :  { %v5876_v38 = vadd.f32 -1.0, %v6281_v14  ;;  %v2570_v4 = vmul.f32 1.6732632, %v5874_v28  ;;  %v2600_v47 = vsel %vm2408_vm4, %v8359_v49, %v2568_v41  ;;  %v2699_v5 = vadd.f32 %v2698_v12, %v2697_v23  ;;  %v9991_v28 = vld [vmem:[#allocation2_spill] sm:$0xff]  ;;  %v9993_v23 = vld [vmem:[#allocation5_spill] sm:$0xff] }
 0x66b   :  { %vm2409_vm5 = vcmp.gt.f32.partialorder %v8371_v32, 0.0  ;;  %v2631_v60 = vmul.f32 1.050701, %v2599_v21  ;;  %v8471_v62 = vadd.f32 %v2629_v13, %v9989_v20  ;;  %v2700_v26 = vsel %vm69_vm0, %v8457_v39, 0.0 }
 0x66c   :  { %v5877_v16 = vadd.f32 -1.0, %v6283_v6  ;;  %v2571_v59 = vmul.f32 1.6732632, %v5875_v55  ;;  %v2601_v25 = vsel %vm2409_vm5, %v8371_v32, %v2569_v30  ;;  %v2701_v43 = vadd.f32 %v2700_v26, %v2699_v5 }
 0x66d   :  { %vm2410_vm6 = vcmp.gt.f32.partialorder %v8382_v15, 0.0  ;;  %v2632_v10 = vmul.f32 1.050701, %v2600_v47  ;;  %v8478_v49 = vadd.f32 %v2630_v35, %v9990_v36  ;;  %v2702_v34 = vsel %vm69_vm0, %v8464_v50, 0.0 }
 0x66e   :  { %v2572_v18 = vmul.f32 1.6732632, %v5876_v38  ;;  %v2602_v31 = vsel %vm2410_vm6, %v8382_v15, %v2570_v4  ;;  %v2703_v51 = vadd.f32 %v2702_v34, %v2701_v43  ;;  %vm2411_vm7 = vcmp.gt.f32.partialorder %v8391_v2, 0.0  ;;  %v9994_v38 = vld [vmem:[#allocation10_spill] sm:$0xff] }
 0x66f   :  { %v2633_v29 = vmul.f32 1.050701, %v2601_v25  ;;  %v8485_v41 = vadd.f32 %v2631_v60, %v9991_v28  ;;  %v2704_v32 = vsel %vm69_vm0, %v8471_v62, 0.0  ;;  %v2573_v24 = vmul.f32 1.6732632, %v5877_v16  ;;  %v9995_v60 = vld [vmem:[#allocation6_spill] sm:$0xff] }
 0x670   :  { %v2603_v8 = vsel %vm2411_vm7, %v8391_v2, %v2571_v59  ;;  %v2705_v14 = vadd.f32 %v2704_v32, %v2703_v51  ;;  %vm2412_vm2 = vcmp.gt.f32.partialorder %v8401_v56, 0.0  ;;  %v2634_v13 = vmul.f32 1.050701, %v2602_v31  ;;  %v9996_v59 = vld [vmem:[#allocation9_spill] sm:$0xff] }
 0x671   :  { %v8492_v46 = vadd.f32 %v2632_v10, %v9992_v27  ;;  %v2706_v15 = vsel %vm69_vm0, %v8478_v49, 0.0  ;;  %v2604_v55 = vsel %vm2412_vm2, %v8401_v56, %v2572_v18  ;;  %vm2413_vm8 = vcmp.gt.f32.partialorder %v8409_v53, 0.0  ;;  %v9997_v10 = vld [vmem:[#allocation7_spill] sm:$0xff] }
 0x672   :  { %v2707_v30 = vadd.f32 %v2706_v15, %v2705_v14  ;;  %v2635_v21 = vmul.f32 1.050701, %v2603_v8  ;;  %v8499_v6 = vadd.f32 %v2633_v29, %v9993_v23  ;;  %v2708_v2 = vsel %vm69_vm0, %v8485_v41, 0.0 }
 0x673   :  { %v2605_v35 = vsel %vm2413_vm8, %v8409_v53, %v2573_v24  ;;  %v2636_v12 = vmul.f32 1.050701, %v2604_v55  ;;  %v8505_v4 = vadd.f32 %v2634_v13, %v9994_v38  ;;  %v2710_v56 = vsel %vm69_vm0, %v8492_v46, 0.0 }
 0x674   :  { %v2709_v19 = vadd.f32 %v2708_v2, %v2707_v30  ;;  %v2637_v5 = vmul.f32 1.050701, %v2605_v35  ;;  %v8510_v20 = vadd.f32 %v2635_v21, %v9995_v60  ;;  %v2712_v26 = vsel %vm69_vm0, %v8499_v6, 0.0 }
 0x675   :  { %v8515_v25 = vadd.f32 %v2636_v12, %v9996_v59  ;;  %v2714_v53 = vsel %vm69_vm0, %v8505_v4, 0.0  ;;  %vm3246_vm2 = vcmask 97280  }
 0x676   :  { %v2711_v47 = vadd.f32 %v2710_v56, %v2709_v19  ;;  %v8520_v36 = vadd.f32 %v2637_v5, %v9997_v10  ;;  %v2716_v34 = vsel %vm69_vm0, %v8510_v20, 0.0 }
 0x677   :  { %v2718_v31 = vsel %vm69_vm0, %v8515_v25, 0.0 }
 0x678   :  { %v2713_v16 = vadd.f32 %v2712_v26, %v2711_v47  ;;  %v2720_v29 = vsel %vm69_vm0, %v8520_v36, 0.0 }
 0x67a   :  { %v2715_v43 = vadd.f32 %v2714_v53, %v2713_v16 }
 0x67c   :  { %v2717_v18 = vadd.f32 %v2716_v34, %v2715_v43 }
 0x67e   :  { %v2719_v51 = vadd.f32 %v2718_v31, %v2717_v18 }
 0x680   :  { %v2721_v28 = vadd.f32 %v2720_v29, %v2719_v51 }
 0x682   :  { %2722 = vadd.xlane.f32.xlu1 %v2721_v28 }
 0x6e6   :  { %v2690_v32 = vpop.xlane.xlu0 %2689 }
 0x6e7   :  { %v2724_v24 = vmul.f32 0.00048828125, %v2690_v32 }
 0x6e9   :  { %v8529_v8 = vsub.f32 %v8248_v52, %v2724_v24  ;;  %v8532_v14 = vsub.f32 %v8251_v61, %v2724_v24  ;;  %v8535_v13 = vsub.f32 %v8285_v40, %v2724_v24  ;;  %v8542_v55 = vsub.f32 %v8295_v58, %v2724_v24 }
 0x6ea   :  { %v8545_v30 = vsub.f32 %v8308_v48, %v2724_v24  ;;  %v8550_v21 = vsub.f32 %v8314_v17, %v2724_v24  ;;  %v8555_v2 = vsub.f32 %v8323_v3, %v2724_v24  ;;  %v8560_v48 = vsub.f32 %v8331_v9, %v2724_v24 }
 0x6eb   :  { %v2758_v27 = vmul.f32 %v8529_v8, %v8529_v8  ;;  %v2759_v15 = vmul.f32 %v8532_v14, %v8532_v14  ;;  %v2760_v52 = vmul.f32 %v8535_v13, %v8535_v13  ;;  %v2761_v40 = vmul.f32 %v8542_v55, %v8542_v55 }
 0x6ec   :  { %v2762_v58 = vmul.f32 %v8545_v30, %v8545_v30  ;;  %v2763_v19 = vmul.f32 %v8550_v21, %v8550_v21  ;;  %v8565_v17 = vsub.f32 %v8339_v44, %v2724_v24  ;;  %v2764_v38 = vmul.f32 %v8555_v2, %v8555_v2 }
 0x6ed   :  { %v2790_v61 = vadd.f32 %v2759_v15, %v2758_v27  ;;  %v8570_v3 = vsub.f32 %v8347_v54, %v2724_v24  ;;  %v2765_v47 = vmul.f32 %v8560_v48, %v8560_v48  ;;  %v8575_v9 = vsub.f32 %v8355_v45, %v2724_v24 }
 0x6ee   :  { %v2766_v60 = vmul.f32 %v8565_v17, %v8565_v17  ;;  %v8580_v44 = vsub.f32 %v8367_v33, %v2724_v24  ;;  %v8585_v54 = vsub.f32 %v8376_v0, %v2724_v24  ;;  %v8590_v45 = vsub.f32 %v8387_v11, %v2724_v24 }
 0x6ef   :  { %v2791_v23 = vadd.f32 %v2790_v61, %v2760_v52  ;;  %v2767_v16 = vmul.f32 %v8570_v3, %v8570_v3  ;;  %v2768_v53 = vmul.f32 %v8575_v9, %v8575_v9  ;;  %v8595_v33 = vsub.f32 %v8396_v1, %v2724_v24 }
 0x6f0   :  { %v2769_v10 = vmul.f32 %v8580_v44, %v8580_v44  ;;  %v2770_v18 = vmul.f32 %v8585_v54, %v8585_v54  ;;  %v8600_v0 = vsub.f32 %v8406_v42, %v2724_v24  ;;  %v2771_v51 = vmul.f32 %v8590_v45, %v8590_v45 }
 0x6f1   :  { %v2792_v35 = vadd.f32 %v2791_v23, %v2761_v40  ;;  %v2772_v11 = vmul.f32 %v8595_v33, %v8595_v33 }
 0x6f2   :  { %v2773_v32 = vmul.f32 %v8600_v0, %v8600_v0 }
 0x6f3   :  { %v2793_v12 = vadd.f32 %v2792_v35, %v2762_v58 }
 0x6f5   :  { %v2794_v56 = vadd.f32 %v2793_v12, %v2763_v19 }
 0x6f7   :  { %v2795_v5 = vadd.f32 %v2794_v56, %v2764_v38 }
 0x6f9   :  { %v2796_v26 = vadd.f32 %v2795_v5, %v2765_v47 }
 0x6fb   :  { %v2797_v59 = vadd.f32 %v2796_v26, %v2766_v60 }
 0x6fd   :  { %v2798_v43 = vadd.f32 %v2797_v59, %v2767_v16 }
 0x6ff   :  { %v2799_v34 = vadd.f32 %v2798_v43, %v2768_v53 }
 0x701   :  { %v2800_v31 = vadd.f32 %v2799_v34, %v2769_v10 }
 0x703   :  { %v2801_v29 = vadd.f32 %v2800_v31, %v2770_v18 }
 0x705   :  { %v2802_v28 = vadd.f32 %v2801_v29, %v2771_v51 }
 0x707   :  { %v2803_v1 = vadd.f32 %v2802_v28, %v2772_v11 }
 0x709   :  { %v2804_v27 = vadd.f32 %v2803_v1, %v2773_v32 }
 0x70b   :  { %2805 = vadd.xlane.f32.xlu0 %v2804_v27 }
 0x70f   :  { %v2723_v15 = vpop.xlane.xlu1 %2722 }
 0x710   :  { %v2725_v52 = vmul.f32 0.00048828125, %v2723_v15 }
 0x712   :  { %v8609_v61 = vsub.f32 %v8427_v22, %v2725_v52  ;;  %v8612_v42 = vsub.f32 %v8431_v7, %v2725_v52  ;;  %v8615_v24 = vsub.f32 %v8436_v57, %v2725_v52  ;;  %v8618_v40 = vsub.f32 %v8443_v37, %v2725_v52 }
 0x713   :  { %v8625_v35 = vsub.f32 %v8450_v63, %v2725_v52  ;;  %v8630_v7 = vsub.f32 %v8457_v39, %v2725_v52  ;;  %v8637_v38 = vsub.f32 %v8464_v50, %v2725_v52  ;;  %v8643_v39 = vsub.f32 %v8471_v62, %v2725_v52 }
 0x714   :  { %v2774_v23 = vmul.f32 %v8609_v61, %v8609_v61  ;;  %v2775_v58 = vmul.f32 %v8612_v42, %v8612_v42  ;;  %v2776_v22 = vmul.f32 %v8615_v24, %v8615_v24  ;;  %v2777_v57 = vmul.f32 %v8618_v40, %v8618_v40 }
 0x715   :  { %v2778_v63 = vmul.f32 %v8625_v35, %v8625_v35  ;;  %v2779_v5 = vmul.f32 %v8630_v7, %v8630_v7  ;;  %v8649_v16 = vsub.f32 %v8478_v49, %v2725_v52  ;;  %v2780_v50 = vmul.f32 %v8637_v38, %v8637_v38 }
 0x716   :  { %v2807_v37 = vsel %vm69_vm0, %v2774_v23, 0.0  ;;  %v2808_v19 = vsel %vm69_vm0, %v2775_v58, 0.0  ;;  %v2810_v56 = vsel %vm69_vm0, %v2776_v22, 0.0  ;;  %v2812_v60 = vsel %vm69_vm0, %v2777_v57, 0.0 }
 0x717   :  { %v2809_v12 = vadd.f32 %v2808_v19, %v2807_v37  ;;  %v2814_v59 = vsel %vm69_vm0, %v2778_v63, 0.0  ;;  %v8655_v43 = vsub.f32 %v8485_v41, %v2725_v52  ;;  %v2781_v62 = vmul.f32 %v8643_v39, %v8643_v39 }
 0x718   :  { %v2816_v10 = vsel %vm69_vm0, %v2779_v5, 0.0  ;;  %v8661_v18 = vsub.f32 %v8492_v46, %v2725_v52  ;;  %v2782_v49 = vmul.f32 %v8649_v16, %v8649_v16  ;;  %v2818_v31 = vsel %vm69_vm0, %v2780_v50, 0.0 }
 0x719   :  { %v2811_v47 = vadd.f32 %v2810_v56, %v2809_v12  ;;  %v8667_v29 = vsub.f32 %v8499_v6, %v2725_v52  ;;  %v2783_v41 = vmul.f32 %v8655_v43, %v8655_v43  ;;  %v2820_v11 = vsel %vm69_vm0, %v2781_v62, 0.0 }
 0x71a   :  { %v8673_v32 = vsub.f32 %v8505_v4, %v2725_v52  ;;  %v2784_v46 = vmul.f32 %v8661_v18, %v8661_v18  ;;  %v2822_v1 = vsel %vm69_vm0, %v2782_v49, 0.0  ;;  %v8679_v15 = vsub.f32 %v8510_v20, %v2725_v52 }
 0x71b   :  { %v2813_v26 = vadd.f32 %v2812_v60, %v2811_v47  ;;  %v2785_v6 = vmul.f32 %v8667_v29, %v8667_v29  ;;  %v2824_v23 = vsel %vm69_vm0, %v2783_v41, 0.0  ;;  %v8685_v22 = vsub.f32 %v8515_v25, %v2725_v52 }
 0x71c   :  { %v2786_v4 = vmul.f32 %v8673_v32, %v8673_v32  ;;  %v2826_v57 = vsel %vm69_vm0, %v2784_v46, 0.0  ;;  %v8691_v19 = vsub.f32 %v8520_v36, %v2725_v52  ;;  %v2787_v20 = vmul.f32 %v8679_v15, %v8679_v15  ;;  %v2671_v46 = vld [vmem:[%s9879_s7 + $0x8] sm:$0xf] }
 0x71d   :  { %v2815_v53 = vadd.f32 %v2814_v59, %v2813_v26  ;;  %v2828_v12 = vsel %vm69_vm0, %v2785_v6, 0.0  ;;  %v2788_v56 = vmul.f32 %v8685_v22, %v8685_v22  ;;  %v2672_v6 = vld [vmem:[%s9880_s8] sm:$0xff] }
 0x71e   :  { %v2830_v25 = vsel %vm69_vm0, %v2786_v4, 0.0  ;;  %v2789_v5 = vmul.f32 %v8691_v19, %v8691_v19  ;;  %v2832_v60 = vsel %vm69_vm0, %v2787_v20, 0.0 }
 0x71f   :  { %v2817_v34 = vadd.f32 %v2816_v10, %v2815_v53  ;;  %v2834_v36 = vsel %vm69_vm0, %v2788_v56, 0.0 }
 0x720   :  { %v2836_v50 = vsel %vm69_vm0, %v2789_v5, 0.0 }
 0x721   :  { %v2819_v51 = vadd.f32 %v2818_v31, %v2817_v34  ;;  %v2670_v34 = vld [vmem:[%s9879_s7] sm:$0xff] }
 0x723   :  { %v2821_v28 = vadd.f32 %v2820_v11, %v2819_v51  ;;  %v2673_v51 = vld [vmem:[%s9880_s8 + $0x8] sm:$0xf] }
 0x725   :  { %v2823_v27 = vadd.f32 %v2822_v1, %v2821_v28 }
 0x727   :  { %v2825_v58 = vadd.f32 %v2824_v23, %v2823_v27  ;;  %v3188_v23 = vlaneseq }
 0x729   :  { %v2827_v37 = vadd.f32 %v2826_v57, %v2825_v58  ;;  %v8716_v58 = vshrl.u32 %v3188_v23, 7  ;;  %v8719_v57 = vand.u32 127, %v3188_v23 }
 0x72b   :  { %v2829_v63 = vadd.f32 %v2828_v12, %v2827_v37  ;;  %v3194_v4 = vadd.s32 1, %v8716_v58  ;;  %v3192_v37 = vmul.u32 4, %v8716_v58 }
 0x72d   :  { %v2831_v47 = vadd.f32 %v2830_v25, %v2829_v63  ;;  %v3195_v20 = vmul.u32 4, %v3194_v4  ;;  %vm3193_vm9 = vcmp.ge.s32.totalorder %v8719_v57, %v3192_v37 }
 0x72f   :  { %v2833_v26 = vadd.f32 %v2832_v60, %v2831_v47  ;;  %vm3196_vm10 = vcmp.lt.s32.totalorder %v8719_v57, %v3195_v20 }
 0x730   :  { %vm3197_vm11 = vmand %vm3193_vm9, %vm3196_vm10  ;;  %vm6482_vm9 = vmmov 1  }
 0x731   :  { %v2835_v52 = vadd.f32 %v2834_v36, %v2833_v26  ;;  %vm8881_vm10 = vmpackc.low %vm69_vm0, %vm6482_vm9 }
 0x733   :  { %v2837_v59 = vadd.f32 %v2836_v50, %v2835_v52  ;;  %v9998_v52 = vmov 0.0  }
 0x734   :  { %v8743_v50 = vsel %vm3197_vm11, 1.0, %v9998_v52 }
 0x735   :  { %2838 = vadd.xlane.f32.xlu1 %v2837_v59 }
 0x798   :  { %v2806_v53 = vpop.xlane.xlu0 %2805 }
 0x799   :  { %v2840_v62 = vmul.f32 0.00048828125, %v2806_v53 }
 0x79b   :  { %v2842_v10 = vadd.f32 1e-05, %v2840_v62 }
 0x79d   :  { %6284 = vrsqrt.f32 %v2842_v10 }
 0x7a7   :  { %v6285_v49 = vpop.eup %6284 }
 0x7a8   :  { %v2846_v31 = vmul.f32 %v6285_v49, %v2670_v34 }
 0x7aa   :  { %2850 = vperm.xlu0 %6104, %v2846_v31  }
 0x7ae   :  { %2897 = vperm.xlu0 %6104, %v2673_v51  }
 0x7c2   :  { %v2839_v41 = vpop.xlane.xlu1 %2838 }
 0x7c3   :  { %v2841_v11 = vmul.f32 0.00048828125, %v2839_v41 }
 0x7c5   :  { %v2843_v28 = vadd.f32 1e-05, %v2841_v11 }
 0x7c7   :  { %6286 = vrsqrt.f32 %v2843_v28 }
 0x7d1   :  { %v6287_v1 = vpop.eup %6286 }
 0x7d2   :  { %v2847_v27 = vmul.f32 %v6287_v1, %v2671_v46 }
 0x7d4   :  { %2855 = vperm.xlu1 %6105, %v2847_v27  }
 0x7d8   :  { %2892 = vperm.xlu1 %6105, %v2672_v6  }
 0x829   :  { %v8722_v12 = vpop.permute.xlu0 %2850 }
 0x82a   :  { %v2859_v60 = vmul.f32 %v8722_v12, %v8532_v14  ;;  %v2861_v26 = vmul.f32 %v8722_v12, %v8542_v55  ;;  %v2858_v36 = vmul.f32 %v8722_v12, %v8529_v8  ;;  %v2863_v8 = vmul.f32 %v8722_v12, %v8550_v21 }
 0x82b   :  { %v2865_v53 = vmul.f32 %v8722_v12, %v8560_v48  ;;  %v2862_v62 = vmul.f32 %v8722_v12, %v8545_v30  ;;  %v2864_v30 = vmul.f32 %v8722_v12, %v8555_v2 }
 0x82d   :  { %v8734_v5 = vpop.permute.xlu0 %2897 }
 0x853   :  { %v8726_v63 = vpop.permute.xlu1 %2855 }
 0x854   :  { %v2875_v56 = vmul.f32 %v8726_v63, %v8612_v42  ;;  %v2877_v25 = vmul.f32 %v8726_v63, %v8618_v40  ;;  %v2874_v47 = vmul.f32 %v8726_v63, %v8609_v61  ;;  %v2860_v61 = vmul.f32 %v8722_v12, %v8535_v13 }
 0x855   :  { %v2876_v14 = vmul.f32 %v8726_v63, %v8615_v24  ;;  %v2879_v55 = vmul.f32 %v8726_v63, %v8630_v7  ;;  %v2881_v48 = vmul.f32 %v8726_v63, %v8643_v39  ;;  %v2878_v41 = vmul.f32 %v8726_v63, %v8625_v35 }
 0x856   :  { %v8746_v42 = vadd.f32 %v8734_v5, %v2875_v56  ;;  %v8749_v40 = vadd.f32 %v8734_v5, %v2877_v25  ;;  %v8773_v34 = vadd.f32 %v8734_v5, %v2874_v47  ;;  %v2880_v35 = vmul.f32 %v8726_v63, %v8637_v38 }
 0x857   :  { %v8755_v59 = vpop.permute.xlu1 %2892  ;;  %v8785_v51 = vadd.f32 %v8734_v5, %v2876_v14  ;;  %v8792_v1 = vadd.f32 %v8734_v5, %v2879_v55  ;;  %v8802_v20 = vadd.f32 %v8734_v5, %v2881_v48  ;;  %v8809_v47 = vadd.f32 %v8734_v5, %v2878_v41 }
 0x858   :  { %v8766_v10 = vadd.f32 %v8755_v59, %v2859_v60  ;;  %v2981_v13 = vmin.f32 %v8746_v42, 0.0  ;;  %v8770_v24 = vadd.f32 %v8755_v59, %v2861_v26  ;;  %v2983_v21 = vmin.f32 %v8749_v40, 0.0 }
 0x859   :  { %v8777_v7 = vadd.f32 %v8755_v59, %v2858_v36  ;;  %v2980_v2 = vmin.f32 %v8773_v34, 0.0  ;;  %v8796_v27 = vadd.f32 %v8755_v59, %v2860_v61  ;;  %v2982_v56 = vmin.f32 %v8785_v51, 0.0 }
 0x85a   :  { %v2965_v49 = vmin.f32 %v8766_v10, 0.0  ;;  %v3030_v31 = vmul.f32 1.442695, %v2981_v13  ;;  %v2967_v11 = vmin.f32 %v8770_v24, 0.0  ;;  %v3034_v28 = vmul.f32 1.442695, %v2983_v21 }
 0x85b   :  { %v2964_v46 = vmin.f32 %v8777_v7, 0.0  ;;  %v3028_v4 = vmul.f32 1.442695, %v2980_v2  ;;  %v2966_v37 = vmin.f32 %v8796_v27, 0.0  ;;  %v8806_v25 = vadd.f32 %v8755_v59, %v2863_v8 }
 0x85c   :  { %v2998_v39 = vmul.f32 1.442695, %v2965_v49  ;;  %6288 = vpow2.f32 %v3030_v31  ;;  %v3002_v6 = vmul.f32 1.442695, %v2967_v11  ;;  %v2985_v38 = vmin.f32 %v8792_v1, 0.0 }
 0x85d   :  { %6290 = vpow2.f32 %v3034_v28  ;;  %v2996_v23 = vmul.f32 1.442695, %v2964_v46  ;;  %v3000_v60 = vmul.f32 1.442695, %v2966_v37  ;;  %v8813_v26 = vadd.f32 %v8755_v59, %v2865_v53 }
 0x85e   :  { %6292 = vpow2.f32 %v2998_v39  ;;  %v3032_v36 = vmul.f32 1.442695, %v2982_v56  ;;  %v2969_v61 = vmin.f32 %v8806_v25, 0.0  ;;  %v8818_v14 = vmul.f32 %v8722_v12, %v8570_v3 }
 0x85f   :  { %6294 = vpow2.f32 %v3002_v6  ;;  %vm2949_vm12 = vcmp.gt.f32.partialorder %v8746_v42, 0.0  ;;  %v3038_v8 = vmul.f32 1.442695, %v2985_v38  ;;  %v8822_v55 = vadd.f32 %v8734_v5, %v2880_v35 }
 0x860   :  { %6296 = vpow2.f32 %v2996_v23  ;;  %v3006_v13 = vmul.f32 1.442695, %v2969_v61  ;;  %v2971_v53 = vmin.f32 %v8813_v26, 0.0  ;;  %v2987_v21 = vmin.f32 %v8802_v20, 0.0 }
 0x861   :  { %6298 = vpow2.f32 %v3028_v4  ;;  %vm2951_vm13 = vcmp.gt.f32.partialorder %v8749_v40, 0.0  ;;  %v8828_v48 = vadd.f32 %v8755_v59, %v2862_v62  ;;  %v2984_v3 = vmin.f32 %v8809_v47, 0.0 }
 0x862   :  { %6300 = vpow2.f32 %v3000_v60  ;;  %v3010_v49 = vmul.f32 1.442695, %v2971_v53  ;;  %v3042_v31 = vmul.f32 1.442695, %v2987_v21  ;;  %v8832_v41 = vadd.f32 %v8755_v59, %v2864_v30 }
 0x863   :  { %6302 = vpow2.f32 %v3032_v36  ;;  %vm2933_vm14 = vcmp.gt.f32.partialorder %v8766_v10, 0.0  ;;  %vm2935_vm15 = vcmp.gt.f32.partialorder %v8770_v24, 0.0  ;;  %v2968_v28 = vmin.f32 %v8828_v48, 0.0 }
 0x864   :  { %6304 = vpow2.f32 %v3038_v8  ;;  %v3036_v46 = vmul.f32 1.442695, %v2984_v3  ;;  %vm2932_vm1 = vcmp.gt.f32.partialorder %v8777_v7, 0.0  ;;  %vm2948_vm3 = vcmp.gt.f32.partialorder %v8773_v34, 0.0 }
 0x865   :  { %6306 = vpow2.f32 %v3006_v13  ;;  %v2970_v62 = vmin.f32 %v8832_v41, 0.0  ;;  %v3004_v23 = vmul.f32 1.442695, %v2968_v28  ;;  %v2986_v35 = vmin.f32 %v8822_v55, 0.0 }
 0x866   :  { %v6289_v11 = vpop.eup %6288  ;;  %6308 = vpow2.f32 %v3010_v49  ;;  %vm2934_vm4 = vcmp.gt.f32.partialorder %v8796_v27, 0.0  ;;  %vm2950_vm5 = vcmp.gt.f32.partialorder %v8785_v51, 0.0  ;;  %vm2937_vm6 = vcmp.gt.f32.partialorder %v8806_v25, 0.0 }
 0x867   :  { %v6291_v39 = vpop.eup %6290  ;;  %v5895_v2 = vadd.f32 -1.0, %v6289_v11  ;;  %6310 = vpow2.f32 %v3042_v31  ;;  %v3008_v60 = vmul.f32 1.442695, %v2970_v62  ;;  %v3040_v8 = vmul.f32 1.442695, %v2986_v35 }
 0x868   :  { %v6293_v6 = vpop.eup %6292  ;;  %v5897_v30 = vadd.f32 -1.0, %v6291_v39  ;;  %6312 = vpow2.f32 %v3036_v46  ;;  %vm2953_vm7 = vcmp.gt.f32.partialorder %v8792_v1, 0.0  ;;  %vm2939_vm8 = vcmp.gt.f32.partialorder %v8813_v26, 0.0 }
 0x869   :  { %v6295_v4 = vpop.eup %6294  ;;  %v5879_v37 = vadd.f32 -1.0, %v6293_v6  ;;  %v3109_v56 = vmul.f32 1.6732632, %v5895_v2  ;;  %6314 = vpow2.f32 %v3004_v23  ;;  %vm2955_vm11 = vcmp.gt.f32.partialorder %v8802_v20, 0.0 }
 0x86a   :  { %v6297_v38 = vpop.eup %6296  ;;  %v5881_v36 = vadd.f32 -1.0, %v6295_v4  ;;  %v3111_v61 = vmul.f32 1.6732632, %v5897_v30  ;;  %6316 = vpow2.f32 %v3008_v60  ;;  %vm2952_vm0 = vcmp.gt.f32.partialorder %v8809_v47, 0.0 }
 0x86b   :  { %v6299_v13 = vpop.eup %6298  ;;  %v3093_v53 = vmul.f32 1.6732632, %v5879_v37  ;;  %v3141_v21 = vsel %vm2949_vm12, %v8746_v42, %v3109_v56  ;;  %v5878_v3 = vadd.f32 -1.0, %v6297_v38  ;;  %vm2936_vm12 = vcmp.gt.f32.partialorder %v8828_v48, 0.0 }
 0x86c   :  { %v6301_v49 = vpop.eup %6300  ;;  %v8846_v31 = vmul.f32 1.050701, %v3141_v21  ;;  %v3095_v11 = vmul.f32 1.6732632, %v5881_v36  ;;  %v3143_v28 = vsel %vm2951_vm13, %v8749_v40, %v3111_v61  ;;  %v5894_v46 = vadd.f32 -1.0, %v6299_v13 }
 0x86d   :  { %v6303_v39 = vpop.eup %6302  ;;  %v3125_v2 = vsel %vm2933_vm14, %v8766_v10, %v3093_v53  ;;  %v8854_v62 = vmul.f32 1.050701, %v3143_v28  ;;  %v3092_v6 = vmul.f32 1.6732632, %v5878_v3  ;;  %v5880_v42 = vadd.f32 -1.0, %v6301_v49 }
 0x86e   :  { %v6305_v30 = vpop.eup %6304  ;;  %v8858_v23 = vmul.f32 1.050701, %v3125_v2  ;;  %v3231_v40 = vmul.f32 %v8846_v31, %v8846_v31  ;;  %v3127_v35 = vsel %vm2935_vm15, %v8770_v24, %v3095_v11  ;;  %v3108_v4 = vmul.f32 1.6732632, %v5894_v46 }
 0x86f   :  { %v6307_v10 = vpop.eup %6306  ;;  %v8865_v37 = vmul.f32 1.050701, %v3127_v35  ;;  %v3233_v56 = vmul.f32 %v8854_v62, %v8854_v62  ;;  %v3124_v60 = vsel %vm2932_vm1, %v8777_v7, %v3092_v6  ;;  %v5896_v38 = vadd.f32 -1.0, %v6303_v39 }
 0x870   :  { %v3215_v36 = vmul.f32 %v8858_v23, %v8858_v23  ;;  %v3140_v24 = vsel %vm2948_vm3, %v8773_v34, %v3108_v4  ;;  %v8877_v61 = vmul.f32 1.050701, %v3124_v60  ;;  %v3094_v13 = vmul.f32 1.6732632, %v5880_v42  ;;  %v6309_v53 = vpop.eup %6308 }
 0x871   :  { %v3217_v7 = vmul.f32 %v8865_v37, %v8865_v37  ;;  %v8887_v3 = vmul.f32 1.050701, %v3140_v24  ;;  %v3110_v49 = vmul.f32 1.6732632, %v5896_v38  ;;  %v5883_v11 = vadd.f32 -1.0, %v6307_v10  ;;  %v6311_v34 = vpop.eup %6310 }
 0x872   :  { %v6029_v28 = vpack.c.bf16 %v3231_v40, %v3215_v36  ;;  %v3214_v46 = vmul.f32 %v8877_v61, %v8877_v61  ;;  %v3126_v39 = vsel %vm2934_vm4, %v8796_v27, %v3094_v13  ;;  %v5899_v2 = vadd.f32 -1.0, %v6305_v30  ;;  %v6313_v6 = vpop.eup %6312 }
 0x873   :  { %v6035_v42 = vpack.c.bf16 %v3233_v56, %v3217_v7  ;;  %v3230_v35 = vmul.f32 %v8887_v3, %v8887_v3  ;;  %v3142_v4 = vsel %vm2950_vm5, %v8785_v51, %v3110_v49  ;;  %v8901_v10 = vmul.f32 1.050701, %v3126_v39  ;;  %v6315_v40 = vpop.eup %6314 }
 0x874   :  { %6031 = vmatprep.subr.msk.bf16.mxu0 %vm8881_vm10, %v6029_v28  ;;  %v8906_v60 = vmul.f32 1.050701, %v3142_v4  ;;  %v3097_v27 = vmul.f32 1.6732632, %v5883_v11  ;;  %v3113_v30 = vmul.f32 1.6732632, %v5899_v2  ;;  %6318 = vpow2.f32 %v3040_v8  ;;  %v6317_v56 = vpop.eup %6316 }
 0x875   :  { %vm2938_vm13 = vcmp.gt.f32.partialorder %v8832_v41, 0.0  ;;  %6037 = vmatprep.subr.msk.bf16.mxu1 %vm8881_vm10, %v6035_v42  ;;  %v6032_v51 = vpack.c.bf16 %v3230_v35, %v3214_v46  ;;  %v3216_v38 = vmul.f32 %v8901_v10, %v8901_v10  ;;  %v5885_v36 = vadd.f32 -1.0, %v6309_v53 }
 0x876   :  { %v5901_v24 = vadd.f32 -1.0, %v6311_v34  ;;  %v3232_v13 = vmul.f32 %v8906_v60, %v8906_v60  ;;  %v3129_v7 = vsel %vm2937_vm6, %v8806_v25, %v3097_v27  ;;  %v3145_v8 = vsel %vm2953_vm7, %v8792_v1, %v3113_v30 }
 0x877   :  { %v5882_v49 = vadd.f32 -1.0, %v6315_v40  ;;  %6034 = vmatpush1.bf16.msk.msra.mxu0 %vm8881_vm10, %v6032_v51  ;;  %v8923_v11 = vmul.f32 1.050701, %v3129_v7  ;;  %v8925_v28 = vmul.f32 1.050701, %v3145_v8  ;;  %v2883_v34 = vmul.f32 %v8726_v63, %v8655_v43 }
 0x878   :  { %v3099_v53 = vmul.f32 1.6732632, %v5885_v36  ;;  %v6038_v46 = vpack.c.bf16 %v3232_v13, %v3216_v38  ;;  %v3115_v39 = vmul.f32 1.6732632, %v5901_v24  ;;  %v5898_v2 = vadd.f32 -1.0, %v6313_v6 }
 0x879   :  { %10001 = vst [vmem:[#allocation22_spill] sm:$0xff] %v8925_v28  ;;  %v3096_v25 = vmul.f32 1.6732632, %v5882_v49  ;;  %v3219_v42 = vmul.f32 %v8923_v11, %v8923_v11  ;;  %v3235_v1 = vmul.f32 %v8925_v28, %v8925_v28  ;;  %v5884_v4 = vadd.f32 -1.0, %v6317_v56 }
 0x87a   :  { %v3131_v35 = vsel %vm2939_vm8, %v8813_v26, %v3099_v53  ;;  %6040 = vmatpush1.bf16.msk.msra.mxu1 %vm8881_vm10, %v6038_v46  ;;  %v3147_v43 = vsel %vm2955_vm11, %v8802_v20, %v3115_v39  ;;  %5915 = vmatmul.mubr.msk.f32.vlgmr.msra.gmra.mrb[40].mxu0 %vm3246_vm2, %v8743_v50  ;;  %v3112_v40 = vmul.f32 1.6732632, %v5898_v2  ;;  %v8960_v36 = vadd.f32 %v8755_v59, %v8818_v14 }
 0x87b   :  { %v8941_v6 = vmul.f32 1.050701, %v3131_v35  ;;  %v3128_v27 = vsel %vm2936_vm12, %v8828_v48, %v3096_v25  ;;  %v6041_v30 = vpack.c.bf16 %v3235_v1, %v3219_v42  ;;  %v8948_v26 = vmul.f32 1.050701, %v3147_v43  ;;  %3504 = vmatprep.mubr.f32.mxu0 %v9998_v52 }
 0x87c   :  { %v8950_v56 = vmul.f32 1.050701, %v3128_v27  ;;  %v3098_v51 = vmul.f32 1.6732632, %v5884_v4  ;;  %v3144_v38 = vsel %vm2952_vm0, %v8809_v47, %v3112_v40  ;;  %v8963_v48 = vadd.f32 %v8734_v5, %v2883_v34 }
 0x87d   :  { %10002 = vst [vmem:[#allocation23_spill] sm:$0xff] %v8941_v6  ;;  %10003 = vst [vmem:[#allocation3_spill] sm:$0xff] %v8948_v26  ;;  %v3221_v20 = vmul.f32 %v8941_v6, %v8941_v6  ;;  %6043 = vmatprep.subr.msk.bf16.mxu0 %vm8881_vm10, %v6041_v30  ;;  %v3237_v24 = vmul.f32 %v8948_v26, %v8948_v26  ;;  %5918 = vmatmul.mubr.msk.f32.vlgmr.msra.gmra.mrb[40].mxu1 %vm3246_vm2, %v8743_v50  ;;  %v8971_v13 = vmul.f32 1.050701, %v3144_v38 }
 0x87e   :  { %v3218_v47 = vmul.f32 %v8950_v56, %v8950_v56  ;;  %v3130_v14 = vsel %vm2938_vm13, %v8832_v41, %v3098_v51  ;;  %v6319_v7 = vpop.eup %6318  ;;  %v2973_v8 = vmin.f32 %v8960_v36, 0.0  ;;  %v2869_v49 = vmul.f32 %v8722_v12, %v8580_v44  ;;  %3575 = vmatprep.mubr.f32.mxu1 %v9998_v52 }
 0x87f   :  { %v2866_v53 = vmul.f32 %v8722_v12, %v8565_v17  ;;  %v2868_v34 = vmul.f32 %v8722_v12, %v8575_v9  ;;  %v6047_v46 = vpack.c.bf16 %v3237_v24, %v3221_v20  ;;  %v3234_v39 = vmul.f32 %v8971_v13, %v8971_v13 }
 0x880   :  { %v5900_v2 = vadd.f32 -1.0, %v6319_v7  ;;  %v2989_v41 = vmin.f32 %v8963_v48, 0.0  ;;  %v8989_v25 = vmul.f32 1.050701, %v3130_v14  ;;  %v3014_v42 = vmul.f32 1.442695, %v2973_v8 }
 0x881   :  { %v2885_v44 = vmul.f32 %v8726_v63, %v8667_v29  ;;  %v8994_v1 = vadd.f32 %v8755_v59, %v2869_v49  ;;  %6049 = vmatprep.subr.msk.bf16.mxu1 %vm8881_vm10, %v6047_v46  ;;  %v6044_v17 = vpack.c.bf16 %v3234_v39, %v3218_v47  ;;  %v2882_v4 = vmul.f32 %v8726_v63, %v8649_v16 }
 0x882   :  { %10004 = vst [vmem:[#allocation24_spill] sm:$0xff] %v8989_v25  ;;  %v3114_v9 = vmul.f32 1.6732632, %v5900_v2  ;;  %v3046_v35 = vmul.f32 1.442695, %v2989_v41  ;;  %vm2954_vm14 = vcmp.gt.f32.partialorder %v8822_v55, 0.0  ;;  %6320 = vpow2.f32 %v3014_v42 }
 0x883   :  { %v9002_v43 = vadd.f32 %v8734_v5, %v2885_v44  ;;  %v2975_v29 = vmin.f32 %v8994_v1, 0.0  ;;  %6046 = vmatpush1.bf16.msk.msra.mxu0 %vm8881_vm10, %v6044_v17  ;;  %v9009_v27 = vadd.f32 %v8755_v59, %v2866_v53  ;;  %v9012_v30 = vadd.f32 %v8734_v5, %v2882_v4 }
 0x884   :  { %v3146_v40 = vsel %vm2954_vm14, %v8822_v55, %v3114_v9  ;;  %6322 = vpow2.f32 %v3046_v35  ;;  %v3220_v51 = vmul.f32 %v8989_v25, %v8989_v25  ;;  %v2871_v55 = vmul.f32 %v8722_v12, %v8590_v45 }
 0x885   :  { %v9014_v16 = vmul.f32 1.050701, %v3146_v40  ;;  %v2991_v20 = vmin.f32 %v9002_v43, 0.0  ;;  %v3018_v38 = vmul.f32 1.442695, %v2975_v29  ;;  %v2972_v24 = vmin.f32 %v9009_v27, 0.0 }
 0x886   :  { %v2988_v47 = vmin.f32 %v9012_v30, 0.0  ;;  %v2873_v14 = vmul.f32 %v8722_v12, %v8600_v0  ;;  %5921 = vmatmul.mubr.msk.f32.vlgmr.msra.gmra.mrb[42].mxu0 %vm3246_vm2, %v8743_v50  ;;  %v2884_v49 = vmul.f32 %v8726_v63, %v8661_v18  ;;  %v9032_v39 = vadd.f32 %v8755_v59, %v2868_v34 }
 0x887   :  { %10005 = vst [vmem:[#allocation12_spill] sm:$0xff] %v9014_v16  ;;  %v3236_v7 = vmul.f32 %v9014_v16, %v9014_v16  ;;  %6324 = vpow2.f32 %v3018_v38  ;;  %v3050_v8 = vmul.f32 1.442695, %v2991_v20  ;;  %v3012_v53 = vmul.f32 1.442695, %v2972_v24  ;;  %3646 = vmatprep.mubr.f32.mxu0 %v9998_v52 }
 0x888   :  { %v3044_v46 = vmul.f32 1.442695, %v2988_v47  ;;  %v2887_v45 = vmul.f32 %v8726_v63, %v8679_v15  ;;  %v9038_v2 = vadd.f32 %v8734_v5, %v2884_v49  ;;  %v9041_v41 = vadd.f32 %v8755_v59, %v2871_v55 }
 0x889   :  { %v6050_v0 = vpack.c.bf16 %v3236_v7, %v3220_v51  ;;  %6326 = vpow2.f32 %v3050_v8  ;;  %v2974_v18 = vmin.f32 %v9032_v39, 0.0  ;;  %v2870_v34 = vmul.f32 %v8722_v12, %v8585_v54 }
 0x88a   :  { %6328 = vpow2.f32 %v3012_v53  ;;  %v9045_v42 = vadd.f32 %v8734_v5, %v2887_v45  ;;  %vm2941_vm15 = vcmp.gt.f32.partialorder %v8960_v36, 0.0  ;;  %v2990_v15 = vmin.f32 %v9038_v2, 0.0 }
 0x88b   :  { %6052 = vmatpush1.bf16.msk.msra.mxu1 %vm8881_vm10, %v6050_v0  ;;  %6330 = vpow2.f32 %v3044_v46  ;;  %v9055_v44 = vmul.f32 %v8722_v12, %v8595_v33  ;;  %vm2957_vm1 = vcmp.gt.f32.partialorder %v8963_v48, 0.0  ;;  %v3016_v17 = vmul.f32 1.442695, %v2974_v18 }
 0x88c   :  { %v2977_v9 = vmin.f32 %v9041_v41, 0.0  ;;  %v2993_v35 = vmin.f32 %v9045_v42, 0.0  ;;  %v6321_v54 = vpop.eup %6320  ;;  %vm2943_vm3 = vcmp.gt.f32.partialorder %v8994_v1, 0.0  ;;  %v3048_v4 = vmul.f32 1.442695, %v2990_v15 }
 0x88d   :  { %v2889_v29 = vmul.f32 %v8726_v63, %v8691_v19  ;;  %v9064_v40 = vadd.f32 %v8755_v59, %v2873_v14  ;;  %v5887_v33 = vadd.f32 -1.0, %v6321_v54  ;;  %6332 = vpow2.f32 %v3016_v17 }
 0x88e   :  { %v6323_v51 = vpop.eup %6322  ;;  %5924 = vmatmul.mubr.msk.f32.vlgmr.msra.gmra.mrb[42].mxu1 %vm3246_vm2, %v8743_v50  ;;  %v3022_v12 = vmul.f32 1.442695, %v2977_v9  ;;  %v3054_v20 = vmul.f32 1.442695, %v2993_v35  ;;  %vm2959_vm4 = vcmp.gt.f32.partialorder %v9002_v43, 0.0  ;;  %6334 = vpow2.f32 %v3048_v4 }
 0x88f   :  { %v5903_v38 = vadd.f32 -1.0, %v6323_v51  ;;  %v9070_v24 = vadd.f32 %v8734_v5, %v2889_v29  ;;  %3717 = vmatprep.mubr.f32.mxu1 %v9998_v52  ;;  %v2886_v19 = vmul.f32 %v8726_v63, %v8673_v32  ;;  %v3101_v47 = vmul.f32 1.6732632, %v5887_v33 }
 0x890   :  { %vm2940_vm5 = vcmp.gt.f32.partialorder %v9009_v27, 0.0  ;;  %6336 = vpow2.f32 %v3022_v12  ;;  %v2979_v55 = vmin.f32 %v9064_v40, 0.0  ;;  %vm2956_vm6 = vcmp.gt.f32.partialorder %v9012_v30, 0.0 }
 0x891   :  { %v6325_v14 = vpop.eup %6324  ;;  %v3117_v7 = vmul.f32 1.6732632, %v5903_v38  ;;  %6338 = vpow2.f32 %v3054_v20  ;;  %v2995_v8 = vmin.f32 %v9070_v24, 0.0  ;;  %v3133_v49 = vsel %vm2941_vm15, %v8960_v36, %v3101_v47 }
 0x892   :  { %v5889_v53 = vadd.f32 -1.0, %v6325_v14  ;;  %v3026_v46 = vmul.f32 1.442695, %v2979_v55  ;;  %v9083_v32 = vadd.f32 %v8755_v59, %v2870_v34  ;;  %v9088_v18 = vmul.f32 1.050701, %v3133_v49 }
 0x893   :  { %v6327_v45 = vpop.eup %6326  ;;  %v3149_v0 = vsel %vm2957_vm1, %v8963_v48, %v3117_v7  ;;  %v3058_v15 = vmul.f32 1.442695, %v2995_v8  ;;  %v9091_v17 = vadd.f32 %v8734_v5, %v2886_v19  ;;  %vm2942_vm7 = vcmp.gt.f32.partialorder %v9032_v39, 0.0 }
 0x894   :  { %v6329_v9 = vpop.eup %6328  ;;  %v9093_v35 = vmul.f32 1.050701, %v3149_v0  ;;  %v5905_v36 = vadd.f32 -1.0, %v6327_v45  ;;  %v3103_v54 = vmul.f32 1.6732632, %v5889_v53  ;;  %6340 = vpow2.f32 %v3026_v46 }
 0x895   :  { %v6331_v34 = vpop.eup %6330  ;;  %v3223_v4 = vmul.f32 %v9088_v18, %v9088_v18  ;;  %v5886_v29 = vadd.f32 -1.0, %v6329_v9  ;;  %vm2958_vm8 = vcmp.gt.f32.partialorder %v9038_v2, 0.0  ;;  %6342 = vpow2.f32 %v3058_v15 }
 0x896   :  { %v3239_v48 = vmul.f32 %v9093_v35, %v9093_v35  ;;  %v3119_v51 = vmul.f32 1.6732632, %v5905_v36  ;;  %v3135_v33 = vsel %vm2943_vm3, %v8994_v1, %v3103_v54  ;;  %v5902_v12 = vadd.f32 -1.0, %v6331_v34 }
 0x897   :  { %vm2945_vm9 = vcmp.gt.f32.partialorder %v9041_v41, 0.0  ;;  %v9105_v20 = vmul.f32 1.050701, %v3135_v33  ;;  %v3100_v38 = vmul.f32 1.6732632, %v5886_v29  ;;  %vm2961_vm11 = vcmp.gt.f32.partialorder %v9045_v42, 0.0  ;;  %v6333_v55 = vpop.eup %6332 }
 0x898   :  { %v2976_v19 = vmin.f32 %v9083_v32, 0.0  ;;  %v2992_v47 = vmin.f32 %v9091_v17, 0.0  ;;  %v6053_v14 = vpack.c.bf16 %v3239_v48, %v3223_v4  ;;  %v3151_v7 = vsel %vm2959_vm4, %v9002_v43, %v3119_v51  ;;  %v6335_v49 = vpop.eup %6334 }
 0x899   :  { %v3116_v8 = vmul.f32 1.6732632, %v5902_v12  ;;  %v2888_v1 = vmul.f32 %v8726_v63, %v8685_v22  ;;  %v9115_v53 = vmul.f32 1.050701, %v3151_v7  ;;  %v3225_v46 = vmul.f32 %v9105_v20, %v9105_v20 }
 0x89a   :  { %v3132_v45 = vsel %vm2940_vm5, %v9009_v27, %v3100_v38  ;;  %v5888_v0 = vadd.f32 -1.0, %v6333_v55  ;;  %v6337_v15 = vpop.eup %6336  ;;  %6055 = vmatprep.subr.msk.bf16.mxu0 %vm8881_vm10, %v6053_v14  ;;  %v5904_v63 = vadd.f32 -1.0, %v6335_v49  ;;  %vm2947_vm12 = vcmp.gt.f32.partialorder %v9064_v40, 0.0 }
 0x89b   :  { %v3148_v43 = vsel %vm2956_vm6, %v9012_v30, %v3116_v8  ;;  %v9127_v22 = vmul.f32 1.050701, %v3132_v45  ;;  %v3020_v9 = vmul.f32 1.442695, %v2976_v19  ;;  %v6339_v36 = vpop.eup %6338  ;;  %v3241_v54 = vmul.f32 %v9115_v53, %v9115_v53 }
 0x89c   :  { %v9132_v27 = vmul.f32 1.050701, %v3148_v43  ;;  %v3102_v34 = vmul.f32 1.6732632, %v5888_v0  ;;  %v5891_v4 = vadd.f32 -1.0, %v6337_v15  ;;  %v5907_v51 = vadd.f32 -1.0, %v6339_v36 }
 0x89d   :  { %v3222_v29 = vmul.f32 %v9127_v22, %v9127_v22  ;;  %v3118_v48 = vmul.f32 1.6732632, %v5904_v63  ;;  %6344 = vpow2.f32 %v3020_v9  ;;  %v6059_v30 = vpack.c.bf16 %v3241_v54, %v3225_v46 }
 0x89e   :  { %v3238_v33 = vmul.f32 %v9132_v27, %v9132_v27  ;;  %v3134_v12 = vsel %vm2942_vm7, %v9032_v39, %v3102_v34  ;;  %v3105_v38 = vmul.f32 1.6732632, %v5891_v4  ;;  %v6341_v19 = vpop.eup %6340  ;;  %v3121_v7 = vmul.f32 1.6732632, %v5907_v51 }
 0x89f   :  { %v3150_v55 = vsel %vm2958_vm8, %v9038_v2, %v3118_v48  ;;  %v9144_v14 = vmul.f32 1.050701, %v3134_v12  ;;  %v3052_v8 = vmul.f32 1.442695, %v2992_v47  ;;  %v6343_v49 = vpop.eup %6342  ;;  %6061 = vmatprep.subr.msk.bf16.mxu1 %vm8881_vm10, %v6059_v30  ;;  %v5893_v0 = vadd.f32 -1.0, %v6341_v19 }
 0x8a0   :  { %v6056_v46 = vpack.c.bf16 %v3238_v33, %v3222_v29  ;;  %v9148_v45 = vmul.f32 1.050701, %v3150_v55  ;;  %v3137_v39 = vsel %vm2945_vm9, %v9041_v41, %v3105_v38  ;;  %v3153_v2 = vsel %vm2961_vm11, %v9045_v42, %v3121_v7 }
 0x8a1   :  { %v3224_v15 = vmul.f32 %v9144_v14, %v9144_v14  ;;  %v9158_v47 = vmul.f32 1.050701, %v3137_v39  ;;  %v5909_v43 = vadd.f32 -1.0, %v6343_v49  ;;  %v9164_v9 = vmul.f32 1.050701, %v3153_v2 }
 0x8a2   :  { %6058 = vmatpush1.bf16.msk.msra.mxu0 %vm8881_vm10, %v6056_v46  ;;  %v3240_v63 = vmul.f32 %v9148_v45, %v9148_v45  ;;  %v3107_v41 = vmul.f32 1.6732632, %v5893_v0  ;;  %6346 = vpow2.f32 %v3052_v8  ;;  %v2914_v42 = vadd.f32 %v8755_v59, %v9055_v44 }
 0x8a3   :  { %10006 = vst [vmem:[#allocation11_spill] sm:$0xff] %v9164_v9  ;;  %v3227_v36 = vmul.f32 %v9158_v47, %v9158_v47  ;;  %v3123_v54 = vmul.f32 1.6732632, %v5909_v43  ;;  %v2930_v34 = vadd.f32 %v8734_v5, %v2888_v1  ;;  %v3243_v29 = vmul.f32 %v9164_v9, %v9164_v9 }
 0x8a4   :  { %v6062_v4 = vpack.c.bf16 %v3240_v63, %v3224_v15  ;;  %vm2963_vm0 = vcmp.gt.f32.partialorder %v9070_v24, 0.0  ;;  %v3139_v48 = vsel %vm2947_vm12, %v9064_v40, %v3107_v41  ;;  %v2978_v44 = vmin.f32 %v2914_v42, 0.0 }
 0x8a5   :  { %v3155_v51 = vsel %vm2963_vm0, %v9070_v24, %v3123_v54  ;;  %v9178_v30 = vmul.f32 1.050701, %v3139_v48  ;;  %5927 = vmatmul.mubr.msk.f32.vlgmr.msra.gmra.mrb[44].mxu0 %vm3246_vm2, %v8743_v50  ;;  %v6065_v5 = vpack.c.bf16 %v3243_v29, %v3227_v36  ;;  %v2994_v1 = vmin.f32 %v2930_v34, 0.0 }
 0x8a6   :  { %6064 = vmatpush1.bf16.msk.msra.mxu1 %vm8881_vm10, %v6062_v4  ;;  %v9184_v59 = vmul.f32 1.050701, %v3155_v51  ;;  %3788 = vmatprep.mubr.f32.mxu0 %v9998_v52  ;;  %v3024_v38 = vmul.f32 1.442695, %v2978_v44  ;;  %vm2944_vm13 = vcmp.gt.f32.partialorder %v9083_v32, 0.0  ;;  %vm2960_vm14 = vcmp.gt.f32.partialorder %v9091_v17, 0.0 }
 0x8a7   :  { %10007 = vst [vmem:[#allocation4_spill] sm:$0xff] %v9178_v30  ;;  %v6345_v33 = vpop.eup %6344  ;;  %v3229_v40 = vmul.f32 %v9178_v30, %v9178_v30  ;;  %6067 = vmatprep.subr.msk.bf16.mxu0 %vm8881_vm10, %v6065_v5  ;;  %v3056_v19 = vmul.f32 1.442695, %v2994_v1  ;;  %vm2946_vm15 = vcmp.gt.f32.partialorder %v2914_v42, 0.0  ;;  %vm2962_vm1 = vcmp.gt.f32.partialorder %v2930_v34, 0.0 }
 0x8a8   :  { %10008 = vst [vmem:[#allocation15_spill] sm:$0xff] %v9184_v59  ;;  %v3245_v24 = vmul.f32 %v9184_v59, %v9184_v59  ;;  %v5890_v12 = vadd.f32 -1.0, %v6345_v33  ;;  %6348 = vpow2.f32 %v3024_v38  ;;  %vm3978_vm3 = vcmask 1042432  }
 0x8a9   :  { %5930 = vmatmul.mubr.msk.f32.vlgmr.msra.gmra.mrb[44].mxu1 %vm3246_vm2, %v8743_v50  ;;  %6350 = vpow2.f32 %v3056_v19 }
 0x8aa   :  { %v6071_v55 = vpack.c.bf16 %v3245_v24, %v3229_v40  ;;  %v3104_v7 = vmul.f32 1.6732632, %v5890_v12  ;;  %3859 = vmatprep.mubr.f32.mxu1 %v9998_v52 }
 0x8ac   :  { %v6347_v8 = vpop.eup %6346  ;;  %6073 = vmatprep.subr.msk.bf16.mxu1 %vm8881_vm10, %v6071_v55  ;;  %v3136_v49 = vsel %vm2944_vm13, %v9083_v32, %v3104_v7 }
 0x8ad   :  { %v5906_v46 = vadd.f32 -1.0, %v6347_v8  ;;  %v9200_v39 = vmul.f32 1.050701, %v3136_v49  ;;  %v9229_v8 = vadd.s32 1, %v8719_v57 }
 0x8af   :  { %v3120_v0 = vmul.f32 1.6732632, %v5906_v46  ;;  %v3226_v43 = vmul.f32 %v9200_v39, %v9200_v39 }
 0x8b1   :  { %v3152_v15 = vsel %vm2960_vm14, %v9091_v17, %v3120_v0 }
 0x8b2   :  { %v9204_v2 = vmul.f32 1.050701, %v3152_v15  ;;  %v6349_v63 = vpop.eup %6348 }
 0x8b3   :  { %v6351_v36 = vpop.eup %6350  ;;  %v5892_v54 = vadd.f32 -1.0, %v6349_v63 }
 0x8b4   :  { %10009 = vst [vmem:[#allocation13_spill] sm:$0xff] %v9204_v2  ;;  %v3242_v41 = vmul.f32 %v9204_v2, %v9204_v2  ;;  %v5908_v4 = vadd.f32 -1.0, %v6351_v36 }
 0x8b5   :  { %v3106_v29 = vmul.f32 1.6732632, %v5892_v54 }
 0x8b6   :  { %v6068_v32 = vpack.c.bf16 %v3242_v41, %v3226_v43  ;;  %v3122_v48 = vmul.f32 1.6732632, %v5908_v4 }
 0x8b7   :  { %v3138_v17 = vsel %vm2946_vm15, %v2914_v42, %v3106_v29 }
 0x8b8   :  { %6070 = vmatpush1.bf16.msk.msra.mxu0 %vm8881_vm10, %v6068_v32  ;;  %v3154_v51 = vsel %vm2962_vm1, %v2930_v34, %v3122_v48  ;;  %v9212_v5 = vmul.f32 1.050701, %v3138_v17 }
 0x8b9   :  { %v9214_v44 = vmul.f32 1.050701, %v3154_v51 }
 0x8ba   :  { %10010 = vst [vmem:[#allocation16_spill] sm:$0xff] %v9212_v5  ;;  %v3228_v1 = vmul.f32 %v9212_v5, %v9212_v5 }
 0x8bb   :  { %10011 = vst [vmem:[#allocation14_spill] sm:$0xff] %v9214_v44  ;;  %5933 = vmatmul.mubr.msk.f32.vlgmr.msra.gmra.mrb[46].mxu0 %vm3246_vm2, %v8743_v50  ;;  %v3244_v33 = vmul.f32 %v9214_v44, %v9214_v44 }
 0x8bc   :  { %4402 = vmatprep.mubr.f32.mxu0 %v9998_v52 }
 0x8bd   :  { %v6074_v40 = vpack.c.bf16 %v3244_v33, %v3228_v1 }
 0x8bf   :  { %6076 = vmatpush1.bf16.msk.msra.mxu1 %vm8881_vm10, %v6074_v40 }
 0x8c2   :  { %5936 = vmatmul.mubr.msk.f32.vlgmr.msra.gmra.mrb[46].mxu1 %vm3246_vm2, %v8743_v50 }
 0x8c3   :  { %4479 = vmatprep.mubr.f32.mxu1 %v9998_v52 }
 0x94d   :  { %v3364_v42 = vpop.f32.mrb[40].mxu0 }
 0x94e   :  { %v3365_v34 = vadd.f32 1e-12, %v3364_v42  ;;  %v3366_v24 = vpop.f32.mrb[41].mxu0 }
 0x94f   :  { %v3367_v12 = vadd.f32 1e-12, %v3366_v24 }
 0x950   :  { %6352 = vrsqrt.f32 %v3365_v34  ;;  %v3435_v38 = vpop.f32.mrb[40].mxu1  ;;  %vm3868_vm4 = vcmp.eq.f32.partialorder %v3365_v34, inf  ;;  %vm3870_vm5 = vcmp.eq.f32.partialorder %v3365_v34, 0.0  ;;  %v3871_v54 = vand.u32 2147483648, %v3365_v34 }
 0x951   :  { %v3436_v19 = vadd.f32 1e-12, %v3435_v38  ;;  %6354 = vrsqrt.f32 %v3367_v12  ;;  %v3437_v55 = vpop.f32.mrb[41].mxu1  ;;  %vm3875_vm6 = vcmp.eq.f32.partialorder %v3367_v12, inf  ;;  %vm3877_vm7 = vcmp.eq.f32.partialorder %v3367_v12, 0.0 }
 0x952   :  { %v3438_v7 = vadd.f32 1e-12, %v3437_v55  ;;  %v3878_v29 = vand.u32 2147483648, %v3367_v12 }
 0x953   :  { %6356 = vrsqrt.f32 %v3436_v19  ;;  %vm3882_vm8 = vcmp.eq.f32.partialorder %v3436_v19, inf  ;;  %vm3884_vm9 = vcmp.eq.f32.partialorder %v3436_v19, 0.0  ;;  %v3885_v40 = vand.u32 2147483648, %v3436_v19 }
 0x954   :  { %6358 = vrsqrt.f32 %v3438_v7  ;;  %vm3889_vm11 = vcmp.eq.f32.partialorder %v3438_v7, inf  ;;  %vm3891_vm12 = vcmp.eq.f32.partialorder %v3438_v7, 0.0 }
 0x959   :  { %v3506_v49 = vpop.f32.mrb[42].mxu0 }
 0x95a   :  { %v6353_v0 = vpop.eup %6352  ;;  %v9232_v15 = vadd.f32 1e-12, %v3506_v49  ;;  %v3508_v43 = vpop.f32.mrb[43].mxu0 }
 0x95b   :  { %v6355_v41 = vpop.eup %6354  ;;  %v3867_v36 = vmul.f32 %v6353_v0, %v3365_v34  ;;  %v9235_v32 = vadd.f32 1e-12, %v3508_v43  ;;  %v3892_v43 = vand.u32 2147483648, %v3438_v7 }
 0x95c   :  { %v3874_v4 = vmul.f32 %v6355_v41, %v3367_v12  ;;  %6360 = vrsqrt.f32 %v9232_v15  ;;  %vm3896_vm0 = vcmp.eq.f32.partialorder %v9232_v15, inf  ;;  %vm3898_vm13 = vcmp.eq.f32.partialorder %v9232_v15, 0.0 }
 0x95d   :  { %v6357_v48 = vpop.eup %6356  ;;  %v3869_v17 = vsel %vm3868_vm4, %v3365_v34, %v3867_v36  ;;  %6362 = vrsqrt.f32 %v9235_v32  ;;  %vm3903_vm14 = vcmp.eq.f32.partialorder %v9235_v32, inf  ;;  %vm3905_vm15 = vcmp.eq.f32.partialorder %v9235_v32, 0.0 }
 0x95e   :  { %v6359_v51 = vpop.eup %6358  ;;  %v9240_v1 = vsel %vm3870_vm5, %v3871_v54, %v3869_v17  ;;  %v3881_v33 = vmul.f32 %v6357_v48, %v3436_v19  ;;  %v3876_v42 = vsel %vm3875_vm6, %v3367_v12, %v3874_v4 }
 0x95f   :  { %v3979_v24 = vsel %vm3978_vm3, %v9240_v1, -inf  ;;  %v3888_v38 = vmul.f32 %v6359_v51, %v3438_v7  ;;  %v9245_v55 = vsel %vm3877_vm7, %v3878_v29, %v3876_v42 }
 0x960   :  { %v3980_v49 = vrot.slane %v3979_v24, 4  ;;  %v3883_v0 = vsel %vm3882_vm8, %v3436_v19, %v3881_v33  ;;  %v3986_v34 = vsel %vm3978_vm3, %v9245_v55, -inf  ;;  %v9262_v19 = vadd.s32 8, %v8716_v58 }
 0x961   :  { %v3577_v41 = vpop.f32.mrb[42].mxu1  ;;  %v9250_v36 = vsel %vm3884_vm9, %v3885_v40, %v3883_v0  ;;  %v3890_v54 = vsel %vm3889_vm11, %v3438_v7, %v3888_v38  ;;  %v3987_v17 = vrot.slane %v3986_v34, 4  ;;  %v3899_v7 = vand.u32 2147483648, %v9232_v15 }
 0x962   :  { %v9252_v4 = vadd.f32 1e-12, %v3577_v41  ;;  %v3579_v48 = vpop.f32.mrb[43].mxu1  ;;  %v3981_v51 = vmax.f32 %v3979_v24, %v3980_v49  ;;  %v3993_v12 = vsel %vm3978_vm3, %v9250_v36, -inf  ;;  %v9259_v42 = vsel %vm3891_vm12, %v3892_v43, %v3890_v54 }
 0x963   :  { %v9256_v29 = vadd.f32 1e-12, %v3579_v48  ;;  %v3994_v33 = vrot.slane %v3993_v12, 4  ;;  %v3988_v38 = vmax.f32 %v3986_v34, %v3987_v17  ;;  %v3906_v43 = vand.u32 2147483648, %v9235_v32 }
 0x964   :  { %6364 = vrsqrt.f32 %v9252_v4  ;;  %v3982_v40 = vrot.slane %v3981_v51, 2  ;;  %v4000_v41 = vsel %vm3978_vm3, %v9259_v42, -inf  ;;  %vm3910_vm1 = vcmp.eq.f32.partialorder %v9252_v4, inf }
 0x965   :  { %6366 = vrsqrt.f32 %v9256_v29  ;;  %v3995_v24 = vmax.f32 %v3993_v12, %v3994_v33  ;;  %v3989_v46 = vrot.slane %v3988_v38, 2  ;;  %v4001_v12 = vrot.slane %v4000_v41, 4 }
 0x966   :  { %v6361_v49 = vpop.eup %6360  ;;  %v3983_v0 = vmax.f32 %v3981_v51, %v3982_v40  ;;  %vm3912_vm4 = vcmp.eq.f32.partialorder %v9252_v4, 0.0  ;;  %v3913_v44 = vand.u32 2147483648, %v9252_v4  ;;  %vm3917_vm5 = vcmp.eq.f32.partialorder %v9256_v29, inf }
 0x967   :  { %v6363_v54 = vpop.eup %6362  ;;  %v3996_v48 = vrot.slane %v3995_v24, 2  ;;  %v3895_v63 = vmul.f32 %v6361_v49, %v9232_v15  ;;  %v3990_v40 = vmax.f32 %v3988_v38, %v3989_v46  ;;  %v4002_v59 = vmax.f32 %v4000_v41, %v4001_v12 }
 0x968   :  { %v3984_v33 = vrot.slane %v3983_v0, 1  ;;  %v3902_v34 = vmul.f32 %v6363_v54, %v9235_v32  ;;  %vm3919_vm6 = vcmp.eq.f32.partialorder %v9256_v29, 0.0 }
 0x969   :  { %v3997_v17 = vmax.f32 %v3995_v24, %v3996_v48  ;;  %v3897_v51 = vsel %vm3896_vm0, %v9232_v15, %v3895_v63  ;;  %v3991_v54 = vrot.slane %v3990_v40, 1  ;;  %v4003_v48 = vrot.slane %v4002_v59, 2 }
 0x96a   :  { %v3985_v26 = vmax.f32 %v3983_v0, %v3984_v33  ;;  %v9282_v49 = vsel %vm3898_vm13, %v3899_v7, %v3897_v51  ;;  %v3904_v16 = vsel %vm3903_vm14, %v9235_v32, %v3902_v34 }
 0x96b   :  { %v3998_v30 = vrot.slane %v3997_v17, 1  ;;  %v4007_v24 = vsel %vm3978_vm3, %v9282_v49, -inf  ;;  %v9294_v15 = vsel %vm3905_vm15, %v3906_v43, %v3904_v16  ;;  %v3992_v0 = vmax.f32 %v3990_v40, %v3991_v54 }
 0x96c   :  { %v4091_v46 = vsub.f32 %v9240_v1, %v3985_v26  ;;  %v4008_v63 = vrot.slane %v4007_v24, 4  ;;  %v4004_v41 = vmax.f32 %v4002_v59, %v4003_v48  ;;  %v4014_v12 = vsel %vm3978_vm3, %v9294_v15, -inf }
 0x96d   :  { %v3999_v38 = vmax.f32 %v3997_v17, %v3998_v30  ;;  %v4015_v26 = vrot.slane %v4014_v12, 4  ;;  %v4092_v16 = vsub.f32 %v9245_v55, %v3992_v0 }
 0x96e   :  { %v6365_v7 = vpop.eup %6364  ;;  %v4107_v34 = vmul.f32 1.442695, %v4091_v46  ;;  %v4009_v51 = vmax.f32 %v4007_v24, %v4008_v63  ;;  %v4005_v32 = vrot.slane %v4004_v41, 1 }
 0x96f   :  { %v6367_v33 = vpop.eup %6366  ;;  %v3909_v6 = vmul.f32 %v6365_v7, %v9252_v4  ;;  %v4093_v1 = vsub.f32 %v9250_v36, %v3999_v38  ;;  %v4016_v43 = vmax.f32 %v4014_v12, %v4015_v26  ;;  %v4109_v24 = vmul.f32 1.442695, %v4092_v16 }
 0x970   :  { %v3916_v5 = vmul.f32 %v6367_v33, %v9256_v29  ;;  %6368 = vpow2.f32 %v4107_v34  ;;  %v4010_v30 = vrot.slane %v4009_v51, 2  ;;  %v4006_v48 = vmax.f32 %v4004_v41, %v4005_v32 }
 0x971   :  { %v3911_v59 = vsel %vm3910_vm1, %v9252_v4, %v3909_v6  ;;  %v4111_v17 = vmul.f32 1.442695, %v4093_v1  ;;  %v4017_v46 = vrot.slane %v4016_v43, 2  ;;  %v3920_v6 = vand.u32 2147483648, %v9256_v29 }
 0x972   :  { %v9307_v40 = vsel %vm3912_vm4, %v3913_v44, %v3911_v59  ;;  %v3918_v36 = vsel %vm3917_vm5, %v9256_v29, %v3916_v5  ;;  %v4011_v54 = vmax.f32 %v4009_v51, %v4010_v30  ;;  %v4094_v44 = vsub.f32 %v9259_v42, %v4006_v48 }
 0x973   :  { %v4021_v55 = vsel %vm3978_vm3, %v9307_v40, -inf  ;;  %6370 = vpow2.f32 %v4111_v17  ;;  %v4018_v7 = vmax.f32 %v4016_v43, %v4017_v46  ;;  %v10012_v5 = vmul.u32 4, %v8719_v57 }
 0x974   :  { %v4022_v63 = vrot.slane %v4021_v55, 4  ;;  %v4012_v4 = vrot.slane %v4011_v54, 1  ;;  %6372 = vpow2.f32 %v4109_v24  ;;  %v9324_v41 = vsel %vm3919_vm6, %v3920_v6, %v3918_v36 }
 0x975   :  { %vm9320_vm7 = vcmp.ge.s32.totalorder %v8716_v58, %v10012_v5  ;;  %v4113_v34 = vmul.f32 1.442695, %v4094_v44  ;;  %v10015_v29 = vmul.u32 4, %v9229_v8  ;;  %v4019_v42 = vrot.slane %v4018_v7, 1 }
 0x976   :  { %v4023_v38 = vmax.f32 %v4021_v55, %v4022_v63  ;;  %v4013_v12 = vmax.f32 %v4011_v54, %v4012_v4  ;;  %v10018_v32 = vmov %v10012_v5  ;;  %v4028_v36 = vsel %vm3978_vm3, %v9324_v41, -inf }
 0x977   :  { %vm9329_vm8 = vcmp.lt.s32.totalorder %v8716_v58, %v10015_v29  ;;  %vm9338_vm9 = vcmp.ge.s32.totalorder %v9262_v19, %v10018_v32  ;;  %v10021_v59 = vmov %v10015_v29  ;;  %6374 = vpow2.f32 %v4113_v34 }
 0x978   :  { %v3648_v33 = vpop.f32.mrb[44].mxu0  ;;  %v4024_v26 = vrot.slane %v4023_v38, 2  ;;  %vm9345_vm11 = vcmp.lt.s32.totalorder %v9262_v19, %v10021_v59  ;;  %v4020_v17 = vmax.f32 %v4018_v7, %v4019_v42  ;;  %v4095_v57 = vsub.f32 %v9282_v49, %v4013_v12  ;;  %vm3208_vm12 = vmand %vm9320_vm7, %vm9329_vm8 }
 0x979   :  { %v9333_v1 = vadd.f32 1e-12, %v3648_v33  ;;  %v3650_v16 = vpop.f32.mrb[45].mxu0  ;;  %v4029_v46 = vrot.slane %v4028_v36, 4  ;;  %vm3209_vm0 = vmand %vm9338_vm9, %vm9345_vm11  ;;  %v9386_v5 = vsel %vm3208_vm12, 1.0, %v9998_v52  ;;  %vm4283_vm7 = vcmask 23552  }
 0x97a   :  { %v9349_v43 = vadd.f32 1e-12, %v3650_v16  ;;  %v4025_v24 = vmax.f32 %v4023_v38, %v4024_v26  ;;  %v9355_v54 = vpop.eup %6368  ;;  %v4096_v6 = vsub.f32 %v9294_v15, %v4020_v17  ;;  %v4115_v44 = vmul.f32 1.442695, %v4095_v57 }
 0x97b   :  { %6376 = vrsqrt.f32 %v9333_v1  ;;  %v4139_v63 = vsel %vm3978_vm3, %v9355_v54, 0.0  ;;  %vm3924_vm13 = vcmp.eq.f32.partialorder %v9333_v1, inf  ;;  %v9389_v15 = vsel %vm3209_vm0, 1.0, %v9998_v52 }
 0x97c   :  { %v3719_v8 = vpop.f32.mrb[44].mxu1  ;;  %v4026_v19 = vrot.slane %v4025_v24, 1  ;;  %6378 = vrsqrt.f32 %v9349_v43  ;;  %vm3926_vm14 = vcmp.eq.f32.partialorder %v9333_v1, 0.0  ;;  %v4140_v34 = vrot.slane %v4139_v63, 4 }
 0x97d   :  { %v9361_v55 = vadd.f32 1e-12, %v3719_v8  ;;  %v3721_v48 = vpop.f32.mrb[45].mxu1  ;;  %v9373_v4 = vpop.eup %6370  ;;  %v4117_v42 = vmul.f32 1.442695, %v4096_v6  ;;  %v4030_v51 = vmax.f32 %v4028_v36, %v4029_v46  ;;  %v3927_v26 = vand.u32 2147483648, %v9333_v1 }
 0x97e   :  { %v9368_v49 = vadd.f32 1e-12, %v3721_v48  ;;  %v4027_v7 = vmax.f32 %v4025_v24, %v4026_v19  ;;  %v9376_v38 = vpop.eup %6372  ;;  %v4153_v0 = vsel %vm3978_vm3, %v9373_v4, 0.0  ;;  %v4141_v16 = vadd.f32 %v4140_v34, %v4139_v63 }
 0x97f   :  { %6380 = vrsqrt.f32 %v9361_v55  ;;  %v4146_v33 = vsel %vm3978_vm3, %v9376_v38, 0.0  ;;  %v4154_v32 = vrot.slane %v4153_v0, 4  ;;  %v4031_v58 = vrot.slane %v4030_v51, 2 }
 0x980   :  { %6382 = vrsqrt.f32 %v9368_v49  ;;  %v4097_v12 = vsub.f32 %v9307_v40, %v4027_v7  ;;  %v4147_v29 = vrot.slane %v4146_v33, 4  ;;  %vm3938_vm15 = vcmp.eq.f32.partialorder %v9361_v55, inf }
 0x981   :  { %6384 = vpow2.f32 %v4115_v44  ;;  %v9398_v30 = vpop.eup %6374  ;;  %v4142_v24 = vrot.slane %v4141_v16, 2  ;;  %v4155_v8 = vadd.f32 %v4154_v32, %v4153_v0  ;;  %v4032_v46 = vmax.f32 %v4030_v51, %v4031_v58 }
 0x982   :  { %v4119_v40 = vmul.f32 1.442695, %v4097_v12  ;;  %v4148_v59 = vadd.f32 %v4147_v29, %v4146_v33  ;;  %6386 = vpow2.f32 %v4117_v42  ;;  %v4160_v57 = vsel %vm3978_vm3, %v9398_v30, 0.0 }
 0x983   :  { %v4161_v48 = vrot.slane %v4160_v57, 4  ;;  %vm3940_vm1 = vcmp.eq.f32.partialorder %v9361_v55, 0.0  ;;  %v3941_v63 = vand.u32 2147483648, %v9361_v55  ;;  %v4143_v6 = vadd.f32 %v4142_v24, %v4141_v16 }
 0x984   :  { %v4149_v19 = vrot.slane %v4148_v59, 2  ;;  %v4156_v44 = vrot.slane %v4155_v8, 2  ;;  %6388 = vpow2.f32 %v4119_v40  ;;  %vm3931_vm4 = vcmp.eq.f32.partialorder %v9349_v43, inf }
 0x985   :  { %v6377_v17 = vpop.eup %6376  ;;  %v4162_v34 = vadd.f32 %v4161_v48, %v4160_v57  ;;  %v4144_v42 = vrot.slane %v4143_v6, 1  ;;  %v4033_v32 = vrot.slane %v4032_v46, 1  ;;  %vm3933_vm5 = vcmp.eq.f32.partialorder %v9349_v43, 0.0 }
 0x986   :  { %v3923_v36 = vmul.f32 %v6377_v17, %v9333_v1  ;;  %v6379_v7 = vpop.eup %6378  ;;  %v4150_v33 = vadd.f32 %v4149_v19, %v4148_v59  ;;  %v4157_v51 = vadd.f32 %v4156_v44, %v4155_v8  ;;  %vm3945_vm6 = vcmp.eq.f32.partialorder %v9368_v49, inf }
 0x987   :  { %v4163_v24 = vrot.slane %v4162_v34, 2  ;;  %v3930_v57 = vmul.f32 %v6379_v7, %v9349_v43  ;;  %v4034_v25 = vmax.f32 %v4032_v46, %v4033_v32  ;;  %vm3947_vm9 = vcmp.eq.f32.partialorder %v9368_v49, 0.0 }
 0x988   :  { %v3925_v12 = vsel %vm3924_vm13, %v9333_v1, %v3923_v36  ;;  %v4151_v17 = vrot.slane %v4150_v33, 1  ;;  %v4145_v36 = vadd.f32 %v4144_v42, %v4143_v6  ;;  %v4158_v1 = vrot.slane %v4157_v51, 1 }
 0x989   :  { %v6381_v29 = vpop.eup %6380  ;;  %v9411_v0 = vsel %vm3926_vm14, %v3927_v26, %v3925_v12  ;;  %v4164_v48 = vadd.f32 %v4163_v24, %v4162_v34 }
 0x98a   :  { %v6383_v16 = vpop.eup %6382  ;;  %v4035_v40 = vsel %vm3978_vm3, %v9411_v0, -inf  ;;  %v3937_v58 = vmul.f32 %v6381_v29, %v9361_v55  ;;  %v4152_v19 = vadd.f32 %v4151_v17, %v4150_v33  ;;  %6390 = vrcp.f32 %v4145_v36 }
 0x98b   :  { %v4036_v59 = vrot.slane %v4035_v40, 4  ;;  %v3944_v8 = vmul.f32 %v6383_v16, %v9368_v49  ;;  %v9422_v44 = vpop.eup %6384  ;;  %v4165_v33 = vrot.slane %v4164_v48, 1  ;;  %v4159_v34 = vadd.f32 %v4158_v1, %v4157_v51 }
 0x98c   :  { %v3939_v26 = vsel %vm3938_vm15, %v9361_v55, %v3937_v58  ;;  %v9428_v7 = vpop.eup %6386  ;;  %6392 = vrcp.f32 %v4152_v19  ;;  %v3934_v36 = vand.u32 2147483648, %v9349_v43  ;;  %v3932_v1 = vsel %vm3931_vm4, %v9349_v43, %v3930_v57 }
 0x98d   :  { %v4037_v12 = vmax.f32 %v4035_v40, %v4036_v59  ;;  %v9426_v29 = vsel %vm3940_vm1, %v3941_v63, %v3939_v26  ;;  %v4174_v63 = vsel %vm3978_vm3, %v9428_v7, 0.0  ;;  %v4166_v32 = vadd.f32 %v4165_v33, %v4164_v48 }
 0x98e   :  { %v4049_v6 = vsel %vm3978_vm3, %v9426_v29, -inf  ;;  %v3790_v42 = vpop.f32.mrb[46].mxu0  ;;  %6394 = vrcp.f32 %v4159_v34  ;;  %v4175_v17 = vrot.slane %v4174_v63, 4  ;;  %v9441_v51 = vpop.eup %6388  ;;  %v4167_v57 = vsel %vm3978_vm3, %v9422_v44, 0.0 }
 0x98f   :  { %v4038_v16 = vrot.slane %v4037_v12, 2  ;;  %v4050_v58 = vrot.slane %v4049_v6, 4  ;;  %v9433_v40 = vadd.f32 1e-12, %v3790_v42  ;;  %v3792_v55 = vpop.f32.mrb[47].mxu0  ;;  %v4098_v42 = vsub.f32 %v9324_v41, %v4034_v25 }
 0x990   :  { %v9437_v46 = vadd.f32 1e-12, %v3792_v55 }
 0x991   :  { %v4039_v24 = vmax.f32 %v4037_v12, %v4038_v16  ;;  %v4051_v59 = vmax.f32 %v4049_v6, %v4050_v58  ;;  %6396 = vrsqrt.f32 %v9433_v40  ;;  %v3946_v12 = vsel %vm3945_vm6, %v9368_v49, %v3944_v8 }
 0x992   :  { %6398 = vrsqrt.f32 %v9437_v46  ;;  %vm3952_vm8 = vcmp.eq.f32.partialorder %v9433_v40, inf  ;;  %v4176_v6 = vadd.f32 %v4175_v17, %v4174_v63  ;;  %vm3954_vm11 = vcmp.eq.f32.partialorder %v9433_v40, 0.0 }
 0x993   :  { %v4040_v19 = vrot.slane %v4039_v24, 1  ;;  %v4052_v48 = vrot.slane %v4051_v59, 2  ;;  %6400 = vrcp.f32 %v4166_v32  ;;  %v4168_v16 = vrot.slane %v4167_v57, 4 }
 0x994   :  { %v3955_v58 = vand.u32 2147483648, %v9433_v40  ;;  %vm3959_vm12 = vcmp.eq.f32.partialorder %v9437_v46, inf  ;;  %v4177_v8 = vrot.slane %v4176_v6, 2  ;;  %v4121_v55 = vmul.f32 1.442695, %v4098_v42  ;;  %v6391_v32 = vpop.eup %6390 }
 0x995   :  { %v4041_v33 = vmax.f32 %v4039_v24, %v4040_v19  ;;  %v4053_v34 = vmax.f32 %v4051_v59, %v4052_v48  ;;  %v3861_v41 = vpop.f32.mrb[46].mxu1  ;;  %v4181_v17 = vsel %vm3978_vm3, %v9441_v51, 0.0  ;;  %v9463_v24 = vsel %vm3933_vm5, %v3934_v36, %v3932_v1 }
 0x996   :  { %v6393_v59 = vpop.eup %6392  ;;  %v9465_v19 = vadd.f32 1e-12, %v3861_v41  ;;  %v3863_v48 = vpop.f32.mrb[47].mxu1  ;;  %v4178_v26 = vadd.f32 %v4177_v8, %v4176_v6  ;;  %6402 = vpow2.f32 %v4121_v55  ;;  %v4169_v9 = vadd.f32 %v4168_v16, %v4167_v57 }
 0x997   :  { %v4099_v63 = vsub.f32 %v9411_v0, %v4041_v33  ;;  %v4054_v25 = vrot.slane %v4053_v34, 1  ;;  %v9467_v2 = vadd.f32 1e-12, %v3863_v48  ;;  %v4254_v0 = vmul.f32 %v6393_v59, %v9376_v38 }
 0x998   :  { %v6395_v33 = vpop.eup %6394  ;;  %6404 = vrsqrt.f32 %v9465_v19  ;;  %vm3961_vm0 = vcmp.eq.f32.partialorder %v9437_v46, 0.0  ;;  %v4252_v43 = vmul.f32 %v6391_v32, %v9355_v54  ;;  %v4182_v36 = vrot.slane %v4181_v17, 4 }
 0x999   :  { %v4123_v42 = vmul.f32 1.442695, %v4099_v63  ;;  %v4055_v28 = vmax.f32 %v4053_v34, %v4054_v25  ;;  %v3962_v57 = vand.u32 2147483648, %v9437_v46  ;;  %5937 = vmatprep.subr.msk.mxu0 %vm3978_vm3, %v4254_v0  ;;  %v4042_v34 = vsel %vm3978_vm3, %v9463_v24, -inf }
 0x99a   :  { %vm3966_vm13 = vcmp.eq.f32.partialorder %v9465_v19, inf  ;;  %5938 = vmatpush1.msk.msra.mxu0 %vm3978_vm3, %v4252_v43  ;;  %v4256_v54 = vmul.f32 %v6395_v33, %v9373_v4  ;;  %v4170_v55 = vrot.slane %v4169_v9, 2  ;;  %v4183_v25 = vadd.f32 %v4182_v36, %v4181_v17 }
 0x99b   :  { %v6397_v1 = vpop.eup %6396  ;;  %6406 = vpow2.f32 %v4123_v42  ;;  %v4101_v6 = vsub.f32 %v9426_v29, %v4055_v28  ;;  %5939 = vmatmul.mubr.msk.f32.vlgmr.msra.gmra.mrb[48].mxu0 %vm4283_vm7, %v9386_v5  ;;  %v4179_v29 = vrot.slane %v4178_v26, 1  ;;  %v4043_v41 = vrot.slane %v4042_v34, 4 }
 0x99c   :  { %v6399_v38 = vpop.eup %6398  ;;  %v3951_v16 = vmul.f32 %v6397_v1, %v9433_v40  ;;  %6408 = vrsqrt.f32 %v9467_v2  ;;  %4408 = vmatprep.mubr.f32.mxu0 %v9998_v52  ;;  %v10024_v59 = vand.u32 2147483648, %v9368_v49  ;;  %v4171_v43 = vadd.f32 %v4170_v55, %v4169_v9 }
 0x99d   :  { %v4127_v8 = vmul.f32 1.442695, %v4101_v6  ;;  %v3958_v28 = vmul.f32 %v6399_v38, %v9437_v46  ;;  %v6401_v32 = vpop.eup %6400  ;;  %v4180_v33 = vadd.f32 %v4179_v29, %v4178_v26  ;;  %v4184_v36 = vrot.slane %v4183_v25, 2 }
 0x99e   :  { %v3953_v63 = vsel %vm3952_vm8, %v9433_v40, %v3951_v16  ;;  %v9494_v4 = vsel %vm3947_vm9, %v10024_v59, %v3946_v12  ;;  %v4258_v0 = vmul.f32 %v6401_v32, %v9398_v30  ;;  %v3969_v12 = vand.u32 2147483648, %v9465_v19 }
 0x99f   :  { %6410 = vpow2.f32 %v4127_v8  ;;  %v9498_v48 = vsel %vm3954_vm11, %v3955_v58, %v3953_v63  ;;  %v3960_v42 = vsel %vm3959_vm12, %v9437_v46, %v3958_v28  ;;  %5940 = vmatmul.mubr.msk.f32.gmra.mrb[50].mxu0 %vm4283_vm7, %v9389_v15  ;;  %v4044_v40 = vmax.f32 %v4042_v34, %v4043_v41 }
 0x9a0   :  { %v4063_v17 = vsel %vm3978_vm3, %v9498_v48, -inf  ;;  %5941 = vmatprep.subr.msk.mxu1 %vm3978_vm3, %v4258_v0  ;;  %v4056_v58 = vsel %vm3978_vm3, %v9494_v4, -inf  ;;  %v9512_v1 = vpop.eup %6402  ;;  %6412 = vrcp.f32 %v4180_v33  ;;  %v4172_v30 = vrot.slane %v4171_v43, 1  ;;  %4556 = vmatprep.mubr.f32.mxu0 %v9998_v52 }
 0x9a1   :  { %v4064_v49 = vrot.slane %v4063_v17, 4  ;;  %5942 = vmatpush1.msk.msra.mxu1 %vm3978_vm3, %v4256_v54  ;;  %v4185_v9 = vadd.f32 %v4184_v36, %v4183_v25  ;;  %v4057_v26 = vrot.slane %v4056_v58, 4  ;;  %v4188_v34 = vsel %vm3978_vm3, %v9512_v1, 0.0 }
 0x9a2   :  { %5943 = vmatmul.mubr.msk.f32.vlgmr.msra.gmra.mrb[48].mxu1 %vm4283_vm7, %v9386_v5  ;;  %v4045_v38 = vrot.slane %v4044_v40, 2  ;;  %v9522_v16 = vsel %vm3961_vm0, %v3962_v57, %v3960_v42  ;;  %v6405_v8 = vpop.eup %6404  ;;  %v4189_v54 = vrot.slane %v4188_v34, 4  ;;  %v4173_v28 = vadd.f32 %v4172_v30, %v4171_v43 }
 0x9a3   :  { %v4065_v6 = vmax.f32 %v4063_v17, %v4064_v49  ;;  %4485 = vmatprep.mubr.f32.mxu1 %v9998_v52  ;;  %v4186_v29 = vrot.slane %v4185_v9, 1  ;;  %v4058_v55 = vmax.f32 %v4056_v58, %v4057_v26  ;;  %v3965_v25 = vmul.f32 %v6405_v8, %v9465_v19 }
 0x9a4   :  { %vm3968_vm14 = vcmp.eq.f32.partialorder %v9465_v19, 0.0  ;;  %v4046_v41 = vmax.f32 %v4044_v40, %v4045_v38  ;;  %vm3973_vm15 = vcmp.eq.f32.partialorder %v9467_v2, inf  ;;  %v4190_v46 = vadd.f32 %v4189_v54, %v4188_v34 }
 0x9a5   :  { %v9525_v32 = vpop.eup %6406  ;;  %v4066_v63 = vrot.slane %v4065_v6, 2  ;;  %6414 = vrcp.f32 %v4173_v28  ;;  %v4059_v57 = vrot.slane %v4058_v55, 2  ;;  %v3967_v0 = vsel %vm3966_vm13, %v9465_v19, %v3965_v25 }
 0x9a6   :  { %v6409_v59 = vpop.eup %6408  ;;  %5944 = vmatmul.mubr.msk.f32.gmra.mrb[50].mxu1 %vm4283_vm7, %v9389_v15  ;;  %v4047_v17 = vrot.slane %v4046_v41, 1  ;;  %v4070_v33 = vsel %vm3978_vm3, %v9522_v16, -inf  ;;  %v9537_v43 = vsel %vm3968_vm14, %v3969_v12, %v3967_v0  ;;  %v4191_v36 = vrot.slane %v4190_v46, 2 }
 0x9a7   :  { %v4067_v42 = vmax.f32 %v4065_v6, %v4066_v63  ;;  %v4187_v49 = vadd.f32 %v4186_v29, %v4185_v9  ;;  %v4060_v40 = vmax.f32 %v4058_v55, %v4059_v57  ;;  %4633 = vmatprep.mubr.f32.mxu1 %v9998_v52  ;;  %v4077_v19 = vsel %vm3978_vm3, %v9537_v43, -inf }
 0x9a8   :  { %v3976_v26 = vand.u32 2147483648, %v9467_v2  ;;  %v4048_v6 = vmax.f32 %v4046_v41, %v4047_v17  ;;  %v4078_v34 = vrot.slane %v4077_v19, 4  ;;  %v4192_v38 = vadd.f32 %v4191_v36, %v4190_v46 }
 0x9a9   :  { %v9540_v58 = vpop.eup %6410  ;;  %v4068_v30 = vrot.slane %v4067_v42, 1  ;;  %v4061_v8 = vrot.slane %v4060_v40, 1  ;;  %v4071_v54 = vrot.slane %v4070_v33, 4  ;;  %v3972_v28 = vmul.f32 %v6409_v59, %v9467_v2 }
 0x9aa   :  { %v4100_v9 = vsub.f32 %v9463_v24, %v4048_v6  ;;  %v4195_v29 = vsel %vm3978_vm3, %v9525_v32, 0.0  ;;  %v6413_v55 = vpop.eup %6412  ;;  %v4079_v63 = vmax.f32 %v4077_v19, %v4078_v34  ;;  %v4193_v25 = vrot.slane %v4192_v38, 1 }
 0x9ab   :  { %v4069_v12 = vmax.f32 %v4067_v42, %v4068_v30  ;;  %6416 = vrcp.f32 %v4187_v49  ;;  %v4062_v57 = vmax.f32 %v4060_v40, %v4061_v8  ;;  %v4262_v41 = vmul.f32 %v6413_v55, %v9428_v7 }
 0x9ac   :  { %v4125_v46 = vmul.f32 1.442695, %v4100_v9  ;;  %v4209_v42 = vsel %vm3978_vm3, %v9540_v58, 0.0  ;;  %v4080_v17 = vrot.slane %v4079_v63, 2  ;;  %v4194_v59 = vadd.f32 %v4193_v25, %v4192_v38 }
 0x9ad   :  { %v4103_v0 = vsub.f32 %v9498_v48, %v4069_v12  ;;  %v4102_v24 = vsub.f32 %v9494_v4, %v4062_v57  ;;  %v4196_v36 = vrot.slane %v4195_v29, 4  ;;  %v3974_v19 = vsel %vm3973_vm15, %v9467_v2, %v3972_v28  ;;  %5945 = vmatprep.subr.msk.mxu0 %vm3978_vm3, %v4262_v41 }
 0x9ae   :  { %6418 = vpow2.f32 %v4125_v46  ;;  %v4072_v48 = vmax.f32 %v4070_v33, %v4071_v54  ;;  %v4081_v7 = vmax.f32 %v4079_v63, %v4080_v17  ;;  %v4210_v6 = vrot.slane %v4209_v42, 4 }
 0x9af   :  { %v4131_v30 = vmul.f32 1.442695, %v4103_v0  ;;  %v6415_v49 = vpop.eup %6414  ;;  %6420 = vrcp.f32 %v4194_v59  ;;  %v4129_v40 = vmul.f32 1.442695, %v4102_v24  ;;  %vm3975_vm1 = vcmp.eq.f32.partialorder %v9467_v2, 0.0 }
 0x9b0   :  { %v4260_v4 = vmul.f32 %v6415_v49, %v9422_v44  ;;  %v4073_v34 = vrot.slane %v4072_v48, 2  ;;  %v4082_v38 = vrot.slane %v4081_v7, 1  ;;  %v4197_v8 = vadd.f32 %v4196_v36, %v4195_v29 }
 0x9b1   :  { %6422 = vpow2.f32 %v4131_v30  ;;  %v3977_v12 = vsel %vm3975_vm1, %v3976_v26, %v3974_v19  ;;  %v4211_v9 = vadd.f32 %v4210_v6, %v4209_v42 }
 0x9b2   :  { %6424 = vpow2.f32 %v4129_v40  ;;  %5946 = vmatpush1.msk.msra.mxu0 %vm3978_vm3, %v4260_v4  ;;  %v4074_v28 = vmax.f32 %v4072_v48, %v4073_v34  ;;  %v4084_v33 = vsel %vm3978_vm3, %v3977_v12, -inf  ;;  %v4083_v54 = vmax.f32 %v4081_v7, %v4082_v38 }
 0x9b3   :  { %5947 = vmatmul.mubr.msk.f32.vlgmr.msra.gmra.mrb[52].mxu0 %vm4283_vm7, %v9386_v5  ;;  %v4085_v55 = vrot.slane %v4084_v33, 4  ;;  %v4198_v25 = vrot.slane %v4197_v8, 2  ;;  %v4212_v0 = vrot.slane %v4211_v9, 2 }
 0x9b4   :  { %v4075_v63 = vrot.slane %v4074_v28, 1  ;;  %4562 = vmatprep.mubr.f32.mxu0 %v9998_v52  ;;  %v4105_v44 = vsub.f32 %v9537_v43, %v4083_v54 }
 0x9b5   :  { %v6417_v2 = vpop.eup %6416  ;;  %v4086_v29 = vmax.f32 %v4084_v33, %v4085_v55  ;;  %v4199_v59 = vadd.f32 %v4198_v25, %v4197_v8 }
 0x9b6   :  { %v4076_v26 = vmax.f32 %v4074_v28, %v4075_v63  ;;  %v4135_v57 = vmul.f32 1.442695, %v4105_v44  ;;  %v4264_v7 = vmul.f32 %v6417_v2, %v9441_v51 }
 0x9b7   :  { %v4087_v41 = vrot.slane %v4086_v29, 2  ;;  %5948 = vmatmul.mubr.msk.f32.gmra.mrb[54].mxu0 %vm4283_vm7, %v9389_v15  ;;  %v4200_v8 = vrot.slane %v4199_v59, 1 }
 0x9b8   :  { %v9568_v46 = vpop.eup %6418  ;;  %v4104_v42 = vsub.f32 %v9522_v16, %v4076_v26  ;;  %4710 = vmatprep.mubr.f32.mxu0 %v9998_v52  ;;  %6426 = vpow2.f32 %v4135_v57  ;;  %v4213_v16 = vadd.f32 %v4212_v0, %v4211_v9 }
 0x9b9   :  { %v6421_v17 = vpop.eup %6420  ;;  %v4202_v43 = vsel %vm3978_vm3, %v9568_v46, 0.0  ;;  %v4088_v24 = vmax.f32 %v4086_v29, %v4087_v41  ;;  %v4201_v44 = vadd.f32 %v4200_v8, %v4199_v59 }
 0x9ba   :  { %v4266_v30 = vmul.f32 %v6421_v17, %v9512_v1  ;;  %v4203_v19 = vrot.slane %v4202_v43, 4  ;;  %v4133_v48 = vmul.f32 1.442695, %v4104_v42  ;;  %v4214_v63 = vrot.slane %v4213_v16, 1 }
 0x9bb   :  { %v9574_v36 = vpop.eup %6422  ;;  %v4089_v40 = vrot.slane %v4088_v24, 1 }
 0x9bc   :  { %v9577_v49 = vpop.eup %6424  ;;  %v4223_v6 = vsel %vm3978_vm3, %v9574_v36, 0.0  ;;  %5949 = vmatprep.subr.msk.mxu1 %vm3978_vm3, %v4266_v30  ;;  %v4204_v4 = vadd.f32 %v4203_v19, %v4202_v43  ;;  %6428 = vpow2.f32 %v4133_v48  ;;  %v4215_v41 = vadd.f32 %v4214_v63, %v4213_v16 }
 0x9bd   :  { %v4216_v34 = vsel %vm3978_vm3, %v9577_v49, 0.0  ;;  %v4224_v38 = vrot.slane %v4223_v6, 4  ;;  %5950 = vmatpush1.msk.msra.mxu1 %vm3978_vm3, %v4264_v7  ;;  %v4090_v28 = vmax.f32 %v4088_v24, %v4089_v40 }
 0x9be   :  { %v4217_v1 = vrot.slane %v4216_v34, 4  ;;  %v4205_v33 = vrot.slane %v4204_v4, 2  ;;  %5951 = vmatmul.mubr.msk.f32.vlgmr.msra.gmra.mrb[52].mxu1 %vm4283_vm7, %v9386_v5 }
 0x9bf   :  { %v4106_v54 = vsub.f32 %v3977_v12, %v4090_v28  ;;  %4639 = vmatprep.mubr.f32.mxu1 %v9998_v52  ;;  %v4225_v9 = vadd.f32 %v4224_v38, %v4223_v6 }
 0x9c0   :  { %v4218_v51 = vadd.f32 %v4217_v1, %v4216_v34  ;;  %v4206_v55 = vadd.f32 %v4205_v33, %v4204_v4 }
 0x9c1   :  { %v4137_v25 = vmul.f32 1.442695, %v4106_v54  ;;  %v4226_v0 = vrot.slane %v4225_v9, 2 }
 0x9c2   :  { %v4219_v2 = vrot.slane %v4218_v51, 2  ;;  %v4207_v29 = vrot.slane %v4206_v55, 1  ;;  %5952 = vmatmul.mubr.msk.f32.gmra.mrb[54].mxu1 %vm4283_vm7, %v9389_v15  ;;  %v9591_v26 = vpop.eup %6426 }
 0x9c3   :  { %6430 = vpow2.f32 %v4137_v25  ;;  %4787 = vmatprep.mubr.f32.mxu1 %v9998_v52  ;;  %v4237_v42 = vsel %vm3978_vm3, %v9591_v26, 0.0  ;;  %v4227_v19 = vadd.f32 %v4226_v0, %v4225_v9 }
 0x9c4   :  { %v4220_v57 = vadd.f32 %v4219_v2, %v4218_v51  ;;  %v4208_v12 = vadd.f32 %v4207_v29, %v4206_v55  ;;  %6432 = vrcp.f32 %v4201_v44  ;;  %v4238_v43 = vrot.slane %v4237_v42, 4 }
 0x9c5   :  { %v4228_v4 = vrot.slane %v4227_v19, 1 }
 0x9c6   :  { %v4221_v17 = vrot.slane %v4220_v57, 1  ;;  %v6429_v59 = vpop.eup %6428  ;;  %6434 = vrcp.f32 %v4208_v12  ;;  %v4239_v48 = vadd.f32 %v4238_v43, %v4237_v42 }
 0x9c7   :  { %v4230_v30 = vsel %vm3978_vm3, %v6429_v59, 0.0  ;;  %6436 = vrcp.f32 %v4215_v41  ;;  %v4229_v51 = vadd.f32 %v4228_v4, %v4227_v19 }
 0x9c8   :  { %v4222_v24 = vadd.f32 %v4221_v17, %v4220_v57  ;;  %v4231_v7 = vrot.slane %v4230_v30, 4  ;;  %v4240_v6 = vrot.slane %v4239_v48, 2 }
 0x9ca   :  { %6438 = vrcp.f32 %v4222_v24  ;;  %v4232_v40 = vadd.f32 %v4231_v7, %v4230_v30  ;;  %v4241_v8 = vadd.f32 %v4240_v6, %v4239_v48 }
 0x9cb   :  { %6440 = vrcp.f32 %v4229_v51 }
 0x9cc   :  { %v4233_v16 = vrot.slane %v4232_v40, 2  ;;  %v4242_v29 = vrot.slane %v4241_v8, 1 }
 0x9cd   :  { %v6431_v34 = vpop.eup %6430 }
 0x9ce   :  { %v4234_v38 = vadd.f32 %v4233_v16, %v4232_v40  ;;  %v4244_v1 = vsel %vm3978_vm3, %v6431_v34, 0.0  ;;  %v6433_v28 = vpop.eup %6432 }
 0x9cf   :  { %v4245_v33 = vrot.slane %v4244_v1, 4  ;;  %v4268_v44 = vmul.f32 %v6433_v28, %v9525_v32  ;;  %v4243_v32 = vadd.f32 %v4242_v29, %v4241_v8 }
 0x9d0   :  { %v6435_v54 = vpop.eup %6434  ;;  %v4235_v55 = vrot.slane %v4234_v38, 1 }
 0x9d1   :  { %v4270_v9 = vmul.f32 %v6435_v54, %v9568_v46  ;;  %v4246_v63 = vadd.f32 %v4245_v33, %v4244_v1  ;;  %v6437_v2 = vpop.eup %6436 }
 0x9d2   :  { %v4236_v25 = vadd.f32 %v4235_v55, %v4234_v38  ;;  %v4272_v41 = vmul.f32 %v6437_v2, %v9540_v58 }
 0x9d3   :  { %5953 = vmatprep.subr.msk.mxu0 %vm3978_vm3, %v4270_v9  ;;  %v4247_v0 = vrot.slane %v4246_v63, 2 }
 0x9d4   :  { %v6439_v57 = vpop.eup %6438  ;;  %5954 = vmatpush1.msk.msra.mxu0 %vm3978_vm3, %v4268_v44  ;;  %6442 = vrcp.f32 %v4236_v25 }
 0x9d5   :  { %v4274_v12 = vmul.f32 %v6439_v57, %v9577_v49  ;;  %v4248_v42 = vadd.f32 %v4247_v0, %v4246_v63  ;;  %5955 = vmatmul.mubr.msk.f32.vlgmr.msra.gmra.mrb[56].mxu0 %vm4283_vm7, %v9386_v5  ;;  %6444 = vrcp.f32 %v4243_v32  ;;  %v6441_v58 = vpop.eup %6440 }
 0x9d6   :  { %4716 = vmatprep.mubr.f32.mxu0 %v9998_v52  ;;  %v4276_v24 = vmul.f32 %v6441_v58, %v9574_v36 }
 0x9d7   :  { %5957 = vmatprep.subr.msk.mxu1 %vm3978_vm3, %v4274_v12  ;;  %v4249_v46 = vrot.slane %v4248_v42, 1 }
 0x9d8   :  { %5958 = vmatpush1.msk.msra.mxu1 %vm3978_vm3, %v4272_v41 }
 0x9d9   :  { %5959 = vmatmul.mubr.msk.f32.vlgmr.msra.gmra.mrb[56].mxu1 %vm4283_vm7, %v9386_v5  ;;  %v4250_v49 = vadd.f32 %v4249_v46, %v4248_v42  ;;  %5956 = vmatmul.mubr.msk.f32.gmra.mrb[58].mxu0 %vm4283_vm7, %v9389_v15 }
 0x9da   :  { %4793 = vmatprep.mubr.f32.mxu1 %v9998_v52  ;;  %4864 = vmatprep.mubr.f32.mxu0 %v9998_v52 }
 0x9db   :  { %6446 = vrcp.f32 %v4250_v49 }
 0x9dd   :  { %5960 = vmatmul.mubr.msk.f32.gmra.mrb[58].mxu1 %vm4283_vm7, %v9389_v15 }
 0x9de   :  { %4941 = vmatprep.mubr.f32.mxu1 %v9998_v52  ;;  %v6443_v17 = vpop.eup %6442 }
 0x9df   :  { %v4278_v43 = vmul.f32 %v6443_v17, %v6429_v59  ;;  %v6445_v30 = vpop.eup %6444 }
 0x9e0   :  { %v4280_v7 = vmul.f32 %v6445_v30, %v9591_v26 }
 0x9e1   :  { %5961 = vmatprep.subr.msk.mxu0 %vm3978_vm3, %v4278_v43 }
 0x9e2   :  { %5962 = vmatpush1.msk.msra.mxu0 %vm3978_vm3, %v4276_v24 }
 0x9e3   :  { %5963 = vmatmul.mubr.msk.f32.vlgmr.msra.gmra.mrb[60].mxu0 %vm4283_vm7, %v9386_v5 }
 0x9e4   :  { %4870 = vmatprep.mubr.f32.mxu0 %v9998_v52 }
 0x9e5   :  { %v6447_v19 = vpop.eup %6446 }
 0x9e6   :  { %v4282_v48 = vmul.f32 %v6447_v19, %v6431_v34 }
 0x9e7   :  { %5964 = vmatmul.mubr.msk.f32.gmra.mrb[62].mxu0 %vm4283_vm7, %v9389_v15 }
 0x9e8   :  { %5965 = vmatprep.subr.msk.mxu1 %vm3978_vm3, %v4282_v48  ;;  %5106 = vmatprep.mubr.f32.mxu0 %v9998_v52 }
 0x9e9   :  { %5966 = vmatpush1.msk.msra.mxu1 %vm3978_vm3, %v4280_v7 }
 0x9ea   :  { %5967 = vmatmul.mubr.msk.f32.vlgmr.msra.gmra.mrb[60].mxu1 %vm4283_vm7, %v9386_v5 }
 0x9eb   :  { %4947 = vmatprep.mubr.f32.mxu1 %v9998_v52 }
 0x9ee   :  { %5968 = vmatmul.mubr.msk.f32.gmra.mrb[62].mxu1 %vm4283_vm7, %v9389_v15 }
 0x9ef   :  { %5177 = vmatprep.mubr.f32.mxu1 %v9998_v52 }
 0xa6e   :  { %v4404_v36 = vpop.f32.mrb[48].mxu0 }
 0xa6f   :  { %v4406_v26 = vpop.f32.mrb[49].mxu0  ;;  %v4954_v63 = vmul.f32 %v4404_v36, %v8877_v61 }
 0xa70   :  { %v4955_v25 = vmul.f32 %v4406_v26, %v8858_v23 }
 0xa72   :  { %v4410_v59 = vpop.f32.mrb[50].mxu0 }
 0xa73   :  { %v4412_v40 = vpop.f32.mrb[51].mxu0 }
 0xa74   :  { %v4971_v58 = vmul.f32 %v4412_v40, %v8846_v31 }
 0xa75   :  { %v4481_v6 = vpop.f32.mrb[48].mxu1 }
 0xa76   :  { %v4483_v4 = vpop.f32.mrb[49].mxu1  ;;  %v4956_v12 = vmul.f32 %v4481_v6, %v8901_v10 }
 0xa77   :  { %v4957_v61 = vmul.f32 %v4483_v4, %v8865_v37 }
 0xa79   :  { %v4487_v16 = vpop.f32.mrb[50].mxu1 }
 0xa7a   :  { %v4489_v34 = vpop.f32.mrb[51].mxu1  ;;  %v4972_v37 = vmul.f32 %v4487_v16, %v8906_v60 }
 0xa86   :  { %v4558_v38 = vpop.f32.mrb[52].mxu0 }
 0xa87   :  { %v4560_v1 = vpop.f32.mrb[53].mxu0  ;;  %v4958_v4 = vmul.f32 %v4558_v38, %v8950_v56 }
 0xa8a   :  { %v9636_v8 = vpop.f32.mrb[54].mxu0 }
 0xa8b   :  { %v9638_v28 = vpop.f32.mrb[55].mxu0 }
 0xa91   :  { %v9640_v33 = vpop.f32.mrb[52].mxu1 }
 0xa92   :  { %v9642_v51 = vpop.f32.mrb[53].mxu1 }
 0xa95   :  { %v9644_v54 = vpop.f32.mrb[54].mxu1 }
 0xa96   :  { %v9646_v55 = vpop.f32.mrb[55].mxu1 }
 0xaa8   :  { %v4712_v9 = vpop.f32.mrb[56].mxu0 }
 0xaa9   :  { %v4962_v2 = vmul.f32 %v4712_v9, %v9127_v22  ;;  %v4714_v44 = vpop.f32.mrb[57].mxu0  ;;  %v4970_v22 = vmul.f32 %v4410_v59, %v8887_v3 }
 0xaaa   :  { %v4963_v29 = vmul.f32 %v4714_v44, %v9088_v18 }
 0xaab   :  { %v9652_v57 = vadd.f32 %v4962_v2, %v4954_v63  ;;  %v4959_v63 = vmul.f32 %v4560_v1, %v8923_v11  ;;  %v4974_v11 = vmul.f32 %v9636_v8, %v8971_v13  ;;  %v10026_v1 = vld [vmem:[#allocation22_spill] sm:$0xff]  ;;  %v10029_v13 = vld [vmem:[#allocation16_spill] sm:$0xff] }
 0xaac   :  { %v4789_v0 = vpop.f32.mrb[56].mxu1  ;;  %v9656_v42 = vadd.f32 %v4963_v29, %v4955_v25  ;;  %v4718_v46 = vpop.f32.mrb[58].mxu0 }
 0xaad   :  { %v4964_v41 = vmul.f32 %v4789_v0, %v9144_v14  ;;  %v4791_v32 = vpop.f32.mrb[57].mxu1  ;;  %v4978_v23 = vmul.f32 %v4718_v46, %v9132_v27  ;;  %v4720_v18 = vpop.f32.mrb[59].mxu0  ;;  %v4973_v27 = vmul.f32 %v4489_v34, %v8854_v62  ;;  %v4975_v0 = vmul.f32 %v9638_v28, %v10026_v1 }
 0xaae   :  { %v4965_v49 = vmul.f32 %v4791_v32, %v9105_v20  ;;  %v4979_v10 = vmul.f32 %v4720_v18, %v9093_v35  ;;  %v5003_v35 = vmul.f32 %v9656_v42, %v9656_v42  ;;  %v10030_v18 = vld [vmem:[#allocation23_spill] sm:$0xff] }
 0xaaf   :  { %v9663_v17 = vadd.f32 %v4964_v41, %v4956_v12  ;;  %v9668_v43 = vadd.f32 %v4978_v23, %v4970_v22  ;;  %v10027_v12 = vld [vmem:[#allocation11_spill] sm:$0xff]  ;;  %v4961_v28 = vmul.f32 %v9642_v51, %v10030_v18  ;;  %v10032_v51 = vld [vmem:[#allocation12_spill] sm:$0xff] }
 0xab0   :  { %v9666_v14 = vadd.f32 %v4965_v49, %v4957_v61  ;;  %v4795_v24 = vpop.f32.mrb[58].mxu1  ;;  %v9672_v30 = vadd.f32 %v4979_v10, %v4971_v58  ;;  %v10028_v61 = vld [vmem:[#allocation24_spill] sm:$0xff] }
 0xab1   :  { %v4980_v3 = vmul.f32 %v4795_v24, %v9148_v45  ;;  %v4797_v20 = vpop.f32.mrb[59].mxu1  ;;  %v5010_v31 = vmul.f32 %v9668_v43, %v9668_v43  ;;  %v5002_v45 = vmul.f32 %v9652_v57, %v9652_v57  ;;  %v5004_v40 = vmul.f32 %v9663_v17, %v9663_v17  ;;  %v10031_v58 = vld [vmem:[#allocation4_spill] sm:$0xff] }
 0xab2   :  { %v4981_v19 = vmul.f32 %v4797_v20, %v9115_v53  ;;  %v5011_v60 = vmul.f32 %v9672_v30, %v9672_v30  ;;  %v5005_v53 = vmul.f32 %v9666_v14, %v9666_v14  ;;  %v4960_v22 = vmul.f32 %v9640_v33, %v10028_v61 }
 0xab3   :  { %v9680_v48 = vadd.f32 %v4980_v3, %v4972_v37  ;;  %v6080_v26 = vpack.c.bf16 %v5010_v31, %v5002_v45 }
 0xab4   :  { %v9686_v7 = vadd.f32 %v4981_v19, %v4973_v27  ;;  %v6077_v36 = vpack.c.bf16 %v5011_v60, %v5003_v35  ;;  %v4976_v19 = vmul.f32 %v9644_v54, %v10032_v51  ;;  %v10033_v35 = vld [vmem:[#allocation14_spill] sm:$0xff] }
 0xab5   :  { %v5012_v62 = vmul.f32 %v9680_v48, %v9680_v48 }
 0xab6   :  { %v5013_v59 = vmul.f32 %v9686_v7, %v9686_v7  ;;  %v4866_v6 = vpop.f32.mrb[60].mxu0  ;;  %6079 = vmatprep.subr.msk.bf16.mxu0 %vm8881_vm10, %v6077_v36  ;;  %v10034_v36 = vld [vmem:[#allocation3_spill] sm:$0xff] }
 0xab7   :  { %v4966_v34 = vmul.f32 %v4866_v6, %v9200_v39  ;;  %v4868_v9 = vpop.f32.mrb[61].mxu0  ;;  %6082 = vmatpush1.bf16.msk.msra.mxu0 %vm8881_vm10, %v6080_v26  ;;  %v6086_v2 = vpack.c.bf16 %v5012_v62, %v5004_v40  ;;  %v10025_v39 = vld [vmem:[#allocation13_spill] sm:$0xff] }
 0xab8   :  { %v6083_v16 = vpack.c.bf16 %v5013_v59, %v5005_v53  ;;  %v4967_v44 = vmul.f32 %v4868_v9, %v9158_v47  ;;  %v4977_v53 = vmul.f32 %v9646_v55, %v10034_v36  ;;  %v10035_v59 = vld [vmem:[#allocation15_spill] sm:$0xff] }
 0xab9   :  { %v9704_v25 = vadd.f32 %v4966_v34, %v4958_v4 }
 0xaba   :  { %6085 = vmatprep.subr.msk.bf16.mxu1 %vm8881_vm10, %v6083_v16  ;;  %v9708_v29 = vadd.f32 %v4967_v44, %v4959_v63  ;;  %v4872_v56 = vpop.f32.mrb[62].mxu0  ;;  %5971 = vmatmul.mubr.msk.f32.vlgmr.msra.gmra.mrb[64].mxu0 %vm3246_vm2, %v8743_v50 }
 0xabb   :  { %6088 = vmatpush1.bf16.msk.msra.mxu1 %vm8881_vm10, %v6086_v2  ;;  %v4982_v38 = vmul.f32 %v4872_v56, %v10025_v39  ;;  %v4874_v47 = vpop.f32.mrb[63].mxu0  ;;  %5248 = vmatprep.mubr.f32.mxu0 %v9998_v52  ;;  %v5006_v20 = vmul.f32 %v9704_v25, %v9704_v25 }
 0xabc   :  { %v4983_v41 = vmul.f32 %v4874_v47, %v10027_v12  ;;  %v5007_v33 = vmul.f32 %v9708_v29, %v9708_v29 }
 0xabd   :  { %v4943_v32 = vpop.f32.mrb[60].mxu1  ;;  %v9721_v46 = vadd.f32 %v4982_v38, %v4974_v11 }
 0xabe   :  { %5974 = vmatmul.mubr.msk.f32.vlgmr.msra.gmra.mrb[64].mxu1 %vm3246_vm2, %v8743_v50  ;;  %v4968_v8 = vmul.f32 %v4943_v32, %v10029_v13  ;;  %v4945_v49 = vpop.f32.mrb[61].mxu1  ;;  %v9728_v23 = vadd.f32 %v4983_v41, %v4975_v0 }
 0xabf   :  { %5319 = vmatprep.mubr.f32.mxu1 %v9998_v52  ;;  %v4969_v10 = vmul.f32 %v4945_v49, %v10031_v58  ;;  %v5014_v24 = vmul.f32 %v9721_v46, %v9721_v46 }
 0xac0   :  { %v9736_v37 = vadd.f32 %v4968_v8, %v4960_v22  ;;  %v5015_v3 = vmul.f32 %v9728_v23, %v9728_v23 }
 0xac1   :  { %v9744_v27 = vadd.f32 %v4969_v10, %v4961_v28  ;;  %v4949_v31 = vpop.f32.mrb[62].mxu1  ;;  %v6092_v26 = vpack.c.bf16 %v5014_v24, %v5006_v20 }
 0xac2   :  { %v4984_v60 = vmul.f32 %v4949_v31, %v10033_v35  ;;  %v6089_v45 = vpack.c.bf16 %v5015_v3, %v5007_v33  ;;  %v4951_v62 = vpop.f32.mrb[63].mxu1  ;;  %v5008_v34 = vmul.f32 %v9736_v37, %v9736_v37 }
 0xac3   :  { %v4985_v40 = vmul.f32 %v4951_v62, %v10035_v59  ;;  %v5009_v16 = vmul.f32 %v9744_v27, %v9744_v27 }
 0xac4   :  { %v9752_v6 = vadd.f32 %v4984_v60, %v4976_v19  ;;  %6091 = vmatprep.subr.msk.bf16.mxu0 %vm8881_vm10, %v6089_v45 }
 0xac5   :  { %v9756_v4 = vadd.f32 %v4985_v40, %v4977_v53  ;;  %6094 = vmatpush1.bf16.msk.msra.mxu0 %vm8881_vm10, %v6092_v26 }
 0xac6   :  { %v5016_v54 = vmul.f32 %v9752_v6, %v9752_v6 }
 0xac7   :  { %v5017_v55 = vmul.f32 %v9756_v4, %v9756_v4 }
 0xac8   :  { %5977 = vmatmul.mubr.msk.f32.vlgmr.msra.gmra.mrb[66].mxu0 %vm3246_vm2, %v8743_v50  ;;  %v6098_v63 = vpack.c.bf16 %v5016_v54, %v5008_v34 }
 0xac9   :  { %v6095_v9 = vpack.c.bf16 %v5017_v55, %v5009_v16  ;;  %5462 = vmatprep.mubr.f32.mxu0 %v9998_v52 }
 0xacb   :  { %6097 = vmatprep.subr.msk.bf16.mxu1 %vm8881_vm10, %v6095_v9 }
 0xacc   :  { %6100 = vmatpush1.bf16.msk.msra.mxu1 %vm8881_vm10, %v6098_v63 }
 0xacf   :  { %5980 = vmatmul.mubr.msk.f32.vlgmr.msra.gmra.mrb[66].mxu1 %vm3246_vm2, %v8743_v50 }
 0xad0   :  { %5539 = vmatprep.mubr.f32.mxu1 %v9998_v52 }
 0xb8d   :  { %v5108_v2 = vpop.f32.mrb[64].mxu0 }
 0xb8e   :  { %v5326_v44 = vadd.f32 1e-09, %v5108_v2  ;;  %v5110_v56 = vpop.f32.mrb[65].mxu0  ;;  %v5350_v39 = vadd.f32 1.0, %v5108_v2 }
 0xb8f   :  { %v5327_v11 = vadd.f32 1e-09, %v5110_v56  ;;  %v5351_v1 = vadd.f32 1.0, %v5110_v56 }
 0xb90   :  { %6448 = vrsqrt.f32 %v5326_v44 }
 0xb91   :  { %v5179_v38 = vpop.f32.mrb[64].mxu1  ;;  %6450 = vrsqrt.f32 %v5327_v11 }
 0xb92   :  { %v5328_v47 = vadd.f32 1e-09, %v5179_v38  ;;  %v5181_v0 = vpop.f32.mrb[65].mxu1  ;;  %v5352_v41 = vadd.f32 1.0, %v5179_v38 }
 0xb93   :  { %v5329_v12 = vadd.f32 1e-09, %v5181_v0  ;;  %v5353_v21 = vadd.f32 1.0, %v5181_v0 }
 0xb94   :  { %6452 = vrsqrt.f32 %v5328_v47 }
 0xb95   :  { %6454 = vrcp.f32 %v5350_v39 }
 0xb96   :  { %6456 = vrcp.f32 %v5351_v1 }
 0xb97   :  { %6458 = vrsqrt.f32 %v5329_v12 }
 0xb98   :  { %6460 = vrcp.f32 %v5353_v21 }
 0xb99   :  { %6462 = vrcp.f32 %v5352_v41 }
 0xb9a   :  { %v6449_v50 = vpop.eup %6448 }
 0xb9b   :  { %v5250_v32 = vpop.f32.mrb[66].mxu0  ;;  %v6451_v61 = vpop.eup %6450  ;;  %v5342_v49 = vmul.f32 %v6449_v50, %v5108_v2 }
 0xb9c   :  { %v5330_v22 = vadd.f32 1e-09, %v5250_v32  ;;  %v5252_v13 = vpop.f32.mrb[67].mxu0  ;;  %v5343_v18 = vmul.f32 %v6451_v61, %v5110_v56  ;;  %v5354_v33 = vadd.f32 1.0, %v5250_v32 }
 0xb9d   :  { %v5331_v28 = vadd.f32 1e-09, %v5252_v13  ;;  %v5355_v10 = vadd.f32 1.0, %v5252_v13 }
 0xb9e   :  { %v6453_v8 = vpop.eup %6452  ;;  %6464 = vrsqrt.f32 %v5330_v22 }
 0xb9f   :  { %v6455_v58 = vpop.eup %6454  ;;  %v5344_v20 = vmul.f32 %v6453_v8, %v5179_v38  ;;  %6466 = vrsqrt.f32 %v5331_v28 }
 0xba0   :  { %v6457_v24 = vpop.eup %6456  ;;  %v5359_v51 = vmul.f32 %v6455_v58, %v5342_v49  ;;  %6468 = vrcp.f32 %v5355_v10 }
 0xba1   :  { %v6459_v3 = vpop.eup %6458  ;;  %v5361_v31 = vmul.f32 %v6457_v24, %v5343_v18  ;;  %6470 = vrcp.f32 %v5354_v33 }
 0xba2   :  { %v5345_v19 = vmul.f32 %v6459_v3, %v5181_v0  ;;  %v6461_v35 = vpop.eup %6460  ;;  %v5321_v60 = vpop.f32.mrb[66].mxu1 }
 0xba3   :  { %5981 = vmatprep.subr.msk.mxu0 %vm3978_vm3, %v5361_v31  ;;  %v6463_v45 = vpop.eup %6462  ;;  %v5332_v36 = vadd.f32 1e-09, %v5321_v60  ;;  %v5323_v53 = vpop.f32.mrb[67].mxu1  ;;  %v5356_v54 = vadd.f32 1.0, %v5321_v60 }
 0xba4   :  { %v5365_v62 = vmul.f32 %v6461_v35, %v5345_v19  ;;  %5982 = vmatpush1.msk.msra.mxu0 %vm3978_vm3, %v5359_v51  ;;  %v5363_v26 = vmul.f32 %v6463_v45, %v5344_v20  ;;  %v5333_v59 = vadd.f32 1e-09, %v5323_v53  ;;  %v5357_v40 = vadd.f32 1.0, %v5323_v53 }
 0xba5   :  { %5983 = vmatmul.mubr.msk.f32.vlgmr.msra.gmra.mrb[68].mxu0 %vm4283_vm7, %v9386_v5  ;;  %6472 = vrsqrt.f32 %v5332_v36 }
 0xba6   :  { %5985 = vmatprep.subr.msk.mxu1 %vm3978_vm3, %v5365_v62  ;;  %5468 = vmatprep.mubr.f32.mxu0 %v9998_v52  ;;  %6474 = vrsqrt.f32 %v5333_v59 }
 0xba7   :  { %5986 = vmatpush1.msk.msra.mxu1 %vm3978_vm3, %v5363_v26  ;;  %6476 = vrcp.f32 %v5357_v40 }
 0xba8   :  { %5987 = vmatmul.mubr.msk.f32.vlgmr.msra.gmra.mrb[68].mxu1 %vm4283_vm7, %v9386_v5  ;;  %v6465_v16 = vpop.eup %6464  ;;  %6478 = vrcp.f32 %v5356_v54 }
 0xba9   :  { %5545 = vmatprep.mubr.f32.mxu1 %v9998_v52  ;;  %5984 = vmatmul.mubr.msk.f32.gmra.mrb[70].mxu0 %vm4283_vm7, %v9389_v15  ;;  %v6467_v55 = vpop.eup %6466  ;;  %v5346_v34 = vmul.f32 %v6465_v16, %v5250_v32 }
 0xbaa   :  { %5616 = vmatprep.mubr.f32.mxu0 %v9998_v52  ;;  %v5347_v9 = vmul.f32 %v6467_v55, %v5252_v13  ;;  %v6469_v63 = vpop.eup %6468 }
 0xbab   :  { %v6471_v2 = vpop.eup %6470 }
 0xbac   :  { %5988 = vmatmul.mubr.msk.f32.gmra.mrb[70].mxu1 %vm4283_vm7, %v9389_v15  ;;  %v5369_v44 = vmul.f32 %v6469_v63, %v5347_v9  ;;  %v5367_v56 = vmul.f32 %v6471_v2, %v5346_v34 }
 0xbad   :  { %5693 = vmatprep.mubr.f32.mxu1 %v9998_v52 }
 0xbae   :  { %5989 = vmatprep.subr.msk.mxu0 %vm3978_vm3, %v5369_v44 }
 0xbaf   :  { %v6473_v11 = vpop.eup %6472  ;;  %5990 = vmatpush1.msk.msra.mxu0 %vm3978_vm3, %v5367_v56 }
 0xbb0   :  { %v6475_v39 = vpop.eup %6474  ;;  %v5348_v38 = vmul.f32 %v6473_v11, %v5321_v60  ;;  %5991 = vmatmul.mubr.msk.f32.vlgmr.msra.gmra.mrb[72].mxu0 %vm4283_vm7, %v9386_v5 }
 0xbb1   :  { %v5349_v47 = vmul.f32 %v6475_v39, %v5323_v53  ;;  %5622 = vmatprep.mubr.f32.mxu0 %v9998_v52  ;;  %v6477_v1 = vpop.eup %6476 }
 0xbb2   :  { %v6479_v0 = vpop.eup %6478 }
 0xbb3   :  { %v5373_v12 = vmul.f32 %v6477_v1, %v5349_v47  ;;  %v5371_v21 = vmul.f32 %v6479_v0, %v5348_v38 }
 0xbb4   :  { %5992 = vmatmul.mubr.msk.f32.gmra.mrb[74].mxu0 %vm4283_vm7, %v9389_v15 }
 0xbb5   :  { %5993 = vmatprep.subr.msk.mxu1 %vm3978_vm3, %v5373_v12 }
 0xbb6   :  { %5994 = vmatpush1.msk.msra.mxu1 %vm3978_vm3, %v5371_v21 }
 0xbb7   :  { %5995 = vmatmul.mubr.msk.f32.vlgmr.msra.gmra.mrb[72].mxu1 %vm4283_vm7, %v9386_v5 }
 0xbb8   :  { %5699 = vmatprep.mubr.f32.mxu1 %v9998_v52 }
 0xbbb   :  { %5996 = vmatmul.mubr.msk.f32.gmra.mrb[74].mxu1 %vm4283_vm7, %v9389_v15 }
 0xc78   :  { %v5464_v41 = vpop.f32.mrb[68].mxu0 }
 0xc79   :  { %v5706_v50 = vmul.f32 %v5464_v41, %v9652_v57  ;;  %v5466_v32 = vpop.f32.mrb[69].mxu0 }
 0xc7a   :  { %v5707_v61 = vmul.f32 %v5466_v32, %v9656_v42 }
 0xc7b   :  { %5722 = vst [vmem:[%s9881_s9] sm:$0xff] %v5706_v50  ;;  %v5541_v22 = vpop.f32.mrb[68].mxu1 }
 0xc7c   :  { %v5708_v13 = vmul.f32 %v5541_v22, %v9663_v17  ;;  %5723 = vst [vmem:[%s9881_s9 + $0x8] sm:$0xff] %v5707_v61  ;;  %v5543_v52 = vpop.f32.mrb[69].mxu1  ;;  %v5470_v5 = vpop.f32.mrb[70].mxu0 }
 0xc7d   :  { %v5709_v15 = vmul.f32 %v5543_v52, %v9666_v14  ;;  %v5714_v57 = vmul.f32 %v5470_v5, %v9668_v43  ;;  %v5472_v8 = vpop.f32.mrb[71].mxu0 }
 0xc7e   :  { %5724 = vst [vmem:[%s9881_s9 + $0x10] sm:$0xff] %v5708_v13  ;;  %v5715_v42 = vmul.f32 %v5472_v8, %v9672_v30 }
 0xc7f   :  { %5725 = vst [vmem:[%s9881_s9 + $0x18] sm:$0xff] %v5709_v15  ;;  %5730 = vst [vmem:[%s9881_s9 + $0x40] sm:$0xf] %v5714_v57  ;;  %v5547_v17 = vpop.f32.mrb[70].mxu1 }
 0xc80   :  { %v5716_v14 = vmul.f32 %v5547_v17, %v9680_v48  ;;  %5731 = vst [vmem:[%s9881_s9 + $0x48] sm:$0xf] %v5715_v42  ;;  %v5549_v43 = vpop.f32.mrb[71].mxu1 }
 0xc81   :  { %v5717_v49 = vmul.f32 %v5549_v43, %v9686_v7 }
 0xc82   :  { %5732 = vst [vmem:[%s9881_s9 + $0x50] sm:$0xf] %v5716_v14 }
 0xc83   :  { %5733 = vst [vmem:[%s9881_s9 + $0x58] sm:$0xf] %v5717_v49  ;;  %v5618_v30 = vpop.f32.mrb[72].mxu0 }
 0xc84   :  { %v5710_v18 = vmul.f32 %v5618_v30, %v9704_v25  ;;  %v5620_v28 = vpop.f32.mrb[73].mxu0 }
 0xc85   :  { %v5711_v48 = vmul.f32 %v5620_v28, %v9708_v29 }
 0xc86   :  { %5726 = vst [vmem:[%s9881_s9 + $0x20] sm:$0xff] %v5710_v18 }
 0xc87   :  { %5727 = vst [vmem:[%s9881_s9 + $0x28] sm:$0xff] %v5711_v48  ;;  %v5624_v7 = vpop.f32.mrb[74].mxu0 }
 0xc88   :  { %v5718_v58 = vmul.f32 %v5624_v7, %v9721_v46  ;;  %v5626_v10 = vpop.f32.mrb[75].mxu0 }
 0xc89   :  { %v5719_v24 = vmul.f32 %v5626_v10, %v9728_v23 }
 0xc8a   :  { %v5695_v33 = vpop.f32.mrb[72].mxu1  ;;  %5734 = vst [vmem:[%s9881_s9 + $0x60] sm:$0xf] %v5718_v58 }
 0xc8b   :  { %v5712_v25 = vmul.f32 %v5695_v33, %v9736_v37  ;;  %v5697_v29 = vpop.f32.mrb[73].mxu1  ;;  %5735 = vst [vmem:[%s9881_s9 + $0x68] sm:$0xf] %v5719_v24 }
 0xc8c   :  { %v5713_v3 = vmul.f32 %v5697_v29, %v9744_v27 }
 0xc8d   :  { %5728 = vst [vmem:[%s9881_s9 + $0x30] sm:$0xff] %v5712_v25 }
 0xc8e   :  { %5729 = vst [vmem:[%s9881_s9 + $0x38] sm:$0xff] %v5713_v3  ;;  %v5701_v46 = vpop.f32.mrb[74].mxu1 }
 0xc8f   :  { %v5720_v23 = vmul.f32 %v5701_v46, %v9752_v6  ;;  %v5703_v20 = vpop.f32.mrb[75].mxu1 }
 0xc90   :  { %v5721_v37 = vmul.f32 %v5703_v20, %v9756_v4 }
 0xc91   :  { %5736 = vst [vmem:[%s9881_s9 + $0x70] sm:$0xf] %v5720_v23 }
 0xc92   :  { %5737 = vst [vmem:[%s9881_s9 + $0x78] sm:$0xf] %v5721_v37 }

</bundles_post_ra>
